<compile_context>
chip_gen: v6e
topology: v6e:2x2x1
jax: 0.10.0
libtpu: 0.0.40
codegen_flags: <defaults>
</compile_context>

<pallas_src>
import jax
import jax.numpy as jnp
from jax.experimental import pallas as pl
from jax.experimental.pallas import tpu as pltpu

# ----------------------------- config (small) -------------------------------
BATCH = 2
CHANNELS = 3
IMAGE = 32
PATCH = 8
HIDDEN = 128            # lane-dense (multiple of 128)
HEADS = 4
HEAD_DIM = HIDDEN // HEADS
INTER = 256
LAYERS = 2
EPS = 1e-6

GRID_HW = IMAGE // PATCH
NUM_PATCHES = GRID_HW * GRID_HW          # 16
KDIM = CHANNELS * PATCH * PATCH          # 192
ROWS = BATCH * NUM_PATCHES               # 32  (batch folded into rows)
BH = BATCH * HEADS                       # 8   (attention batch dim)


# ------------------------------ kernel helpers ------------------------------
def _layernorm(x, w, b):
    # x: (R, D) f32; w, b: (1, D) f32
    mu = jnp.mean(x, axis=-1, keepdims=True)
    var = jnp.mean((x - mu) ** 2, axis=-1, keepdims=True)
    return (x - mu) * jax.lax.rsqrt(var + EPS) * w + b


def _quick_gelu(x):
    # The module spec's default act_layer is QuickGELU (x * sigmoid(1.702 x)).
    # TODO(synk): HF SiglipVisionConfig defaults to gelu_pytorch_tanh; swap in
    # jax.nn.gelu(approximate=True) if matching that config is required.
    return x * jax.nn.sigmoid(1.702 * x)


# ------------------------------- fused kernel -------------------------------
def fused_kernel(patch_ref,
                 pw_ref, pb_ref, pos_ref,
                 ln1w_ref, ln1b_ref, qkvw_ref, qkvb_ref, ow_ref, ob_ref,
                 ln2w_ref, ln2b_ref, f1w_ref, f1b_ref, f2w_ref, f2b_ref,
                 postw_ref, postb_ref,
                 o_ref):
    layer = pl.program_id(0)

    # ---- patch + position embedding (only at layer step 0) -----------------
    @pl.when(layer == 0)
    def _():
        emb = jnp.dot(patch_ref[...], pw_ref[...],
                      preferred_element_type=jnp.float32)        # (R, D) f32
        o_ref[...] = emb + pb_ref[...] + pos_ref[...]

    x = o_ref[...]                                               # (R, D) f32

    # ---- attention block ----------------------------------------------------
    h = _layernorm(x, ln1w_ref[...], ln1b_ref[...]).astype(jnp.bfloat16)
    qkv = jnp.dot(h, qkvw_ref[...],
                  preferred_element_type=jnp.float32) + qkvb_ref[...]  # (R, 3D)
    # (head_dim**-0.5 is pre-folded into the Q columns of qkv_w / qkv_b.)

    # One fused head-major relayout of the whole qkv slab: (B,P,3H,hd)->(B,3H,P,hd)
    t = jnp.transpose(qkv.reshape(BATCH, NUM_PATCHES, 3 * HEADS, HEAD_DIM),
                      (0, 2, 1, 3))                              # (B, 3H, P, hd)
    qh = t[:, :HEADS].reshape(BH, NUM_PATCHES, HEAD_DIM).astype(jnp.bfloat16)
    vh = t[:, 2 * HEADS:].reshape(BH, NUM_PATCHES, HEAD_DIM).astype(jnp.bfloat16)
    # K directly in (BH, hd, P) so the score matmul needs no implicit transpose.
    kh = jnp.transpose(t[:, HEADS:2 * HEADS], (0, 1, 3, 2)
                       ).reshape(BH, HEAD_DIM, NUM_PATCHES).astype(jnp.bfloat16)

    s = jnp.einsum('bqd,bdk->bqk', qh, kh,
                   preferred_element_type=jnp.float32)           # (BH, P, P) f32
    s = s - jnp.max(s, axis=-1, keepdims=True)
    p = jnp.exp(s)
    p = p * pl.reciprocal(jnp.sum(p, axis=-1, keepdims=True), approx=True)

    ctx = jnp.einsum('bqk,bkd->bqd', p.astype(jnp.bfloat16), vh,
                     preferred_element_type=jnp.float32)         # (BH, P, hd)

    # Relayout back to (B*P, H*hd) = (R, 128) and do ONE K=128 output proj.
    ctx = jnp.transpose(ctx.reshape(BATCH, HEADS, NUM_PATCHES, HEAD_DIM),
                        (0, 2, 1, 3)).reshape(ROWS, HIDDEN).astype(jnp.bfloat16)
    attn = jnp.dot(ctx, ow_ref[...],
                   preferred_element_type=jnp.float32) + ob_ref[...]   # (R, D)
    x = x + attn                                                 # residual 1

    # ---- MLP block -----------------------------------------------------------
    h2 = _layernorm(x, ln2w_ref[...], ln2b_ref[...]).astype(jnp.bfloat16)
    h2 = jnp.dot(h2, f1w_ref[...],
                 preferred_element_type=jnp.float32) + f1b_ref[...]
    h2 = _quick_gelu(h2).astype(jnp.bfloat16)
    h2 = jnp.dot(h2, f2w_ref[...],
                 preferred_element_type=jnp.float32) + f2b_ref[...]
    x = x + h2                                                   # residual 2

    o_ref[...] = x                                               # stays resident

    # ---- post LayerNorm (only at last layer step) ----------------------------
    @pl.when(layer == pl.num_programs(0) - 1)
    def _():
        o_ref[...] = _layernorm(x, postw_ref[...], postb_ref[...])


# ------------------------------ wrappers -------------------------------------
PARAM_ORDER = ["patch_w", "patch_b", "pos_emb",
               "ln1_w", "ln1_b", "qkv_w", "qkv_b", "out_w", "out_b",
               "ln2_w", "ln2_b", "fc1_w", "fc1_b", "fc2_w", "fc2_b",
               "post_ln_w", "post_ln_b"]
PER_LAYER = {"ln1_w", "ln1_b", "qkv_w", "qkv_b", "out_w", "out_b",
             "ln2_w", "ln2_b", "fc1_w", "fc1_b", "fc2_w", "fc2_b"}


def _const_spec(arr):
    n = arr.ndim
    return pl.BlockSpec(arr.shape, lambda l, _n=n: (0,) * _n)


def _layer_spec(arr):
    # Leading (LAYERS,) axis indexed by the layer grid coord and squeezed.
    n = arr.ndim
    return pl.BlockSpec((None,) + tuple(arr.shape[1:]),
                        lambda l, _n=n: (l,) + (0,) * (_n - 1))


def patchify(pixel_values):
    # NCHW -> (B*P, C*ps*ps): Conv2d(kernel=stride=ps) + flatten(2).transpose(1,2)
    B = pixel_values.shape[0]
    x = pixel_values.reshape(B, CHANNELS, GRID_HW, PATCH, GRID_HW, PATCH)
    x = x.transpose(0, 2, 4, 1, 3, 5)                 # (B, gh, gw, C, ps, ps)
    return x.reshape(B * NUM_PATCHES, KDIM).astype(jnp.bfloat16)


@jax.jit
def siglip_vision_transformer(pixel_values, params):
    patches = patchify(pixel_values)
    # Positional embedding tiled across the folded batch rows.
    args = {**params, "pos_emb": jnp.tile(params["pos_emb"], (BATCH, 1))}
    ordered = [args[n] for n in PARAM_ORDER]

    in_specs = [_const_spec(patches)]
    in_specs += [_layer_spec(args[n]) if n in PER_LAYER else _const_spec(args[n])
                 for n in PARAM_ORDER]

    out = pl.pallas_call(
        fused_kernel,
        out_shape=jax.ShapeDtypeStruct((ROWS, HIDDEN), jnp.float32),
        grid=(LAYERS,),
        in_specs=in_specs,
        out_specs=pl.BlockSpec((ROWS, HIDDEN), lambda l: (0, 0)),
        compiler_params=pltpu.CompilerParams(
            dimension_semantics=("arbitrary",)),
    )(patches, *ordered)
    return out.reshape(BATCH, NUM_PATCHES, HIDDEN)


# ----------------------------- parameter init --------------------------------
def init_params(key):
    keys = iter(jax.random.split(key, 16))

    def nrm(shape, scale=0.02):
        return scale * jax.random.normal(next(keys), shape, dtype=jnp.float32)

    p = {}
    # patch embedding: Conv2d(C, D, ps, stride=ps) == linear over flattened patch
    p["patch_w"] = nrm((KDIM, HIDDEN)).astype(jnp.bfloat16)
    p["patch_b"] = nrm((1, HIDDEN))
    p["pos_emb"] = nrm((NUM_PATCHES, HIDDEN))

    p["ln1_w"] = jnp.ones((LAYERS, 1, HIDDEN), jnp.float32)
    p["ln1_b"] = jnp.zeros((LAYERS, 1, HIDDEN), jnp.float32)

    # Fused qkv in (in, out) layout, columns [q | k | v]; the attention scale
    # 1/sqrt(head_dim) is folded into the Q columns here (host/init time).
    scale = HEAD_DIM ** -0.5
    qkv_w = nrm((LAYERS, HIDDEN, 3 * HIDDEN))
    qkv_b = nrm((LAYERS, 1, 3 * HIDDEN))
    qkv_w = qkv_w.at[:, :, :HIDDEN].multiply(scale)
    qkv_b = qkv_b.at[:, :, :HIDDEN].multiply(scale)
    p["qkv_w"] = qkv_w.astype(jnp.bfloat16)
    p["qkv_b"] = qkv_b

    # Output projection as a single (D, D) matrix; input rows are head-major
    # (head0's 32 dims first, ...) matching the in-kernel ctx relayout.
    p["out_w"] = nrm((LAYERS, HIDDEN, HIDDEN)).astype(jnp.bfloat16)
    p["out_b"] = nrm((LAYERS, 1, HIDDEN))

    p["ln2_w"] = jnp.ones((LAYERS, 1, HIDDEN), jnp.float32)
    p["ln2_b"] = jnp.zeros((LAYERS, 1, HIDDEN), jnp.float32)
    p["fc1_w"] = nrm((LAYERS, HIDDEN, INTER)).astype(jnp.bfloat16)
    p["fc1_b"] = nrm((LAYERS, 1, INTER))
    p["fc2_w"] = nrm((LAYERS, INTER, HIDDEN)).astype(jnp.bfloat16)
    p["fc2_b"] = nrm((LAYERS, 1, HIDDEN))

    p["post_ln_w"] = jnp.ones((1, HIDDEN), jnp.float32)
    p["post_ln_b"] = jnp.zeros((1, HIDDEN), jnp.float32)
    return p


# ---------------------------------- main --------------------------------------
if __name__ == "__main__":
    key = jax.random.PRNGKey(0)
    k_pix, k_par = jax.random.split(key)
    pixel_values = jax.random.normal(
        k_pix, (BATCH, CHANNELS, IMAGE, IMAGE), dtype=jnp.float32
    )
    params = init_params(k_par)
    out = siglip_vision_transformer(pixel_values, params)
    jax.block_until_ready(out)
    assert out.shape == (BATCH, NUM_PATCHES, HIDDEN)
    assert bool(jnp.all(jnp.isfinite(out)))
    print("KERNEL_OK")
</pallas_src>

<mosaic_0001>
module attributes {stable_mosaic.version = 11 : i64} {
  func.func @fused_kernel(%arg0: i32, %arg1: memref<32x192xbf16, #tpu.memory_space<vmem>>, %arg2: memref<192x128xbf16, #tpu.memory_space<vmem>>, %arg3: memref<1x128xf32, #tpu.memory_space<vmem>>, %arg4: memref<32x128xf32, #tpu.memory_space<vmem>>, %arg5: memref<1x1x128xf32, #tpu.memory_space<vmem>>, %arg6: memref<1x1x128xf32, #tpu.memory_space<vmem>>, %arg7: memref<1x128x384xbf16, #tpu.memory_space<vmem>>, %arg8: memref<1x1x384xf32, #tpu.memory_space<vmem>>, %arg9: memref<1x128x128xbf16, #tpu.memory_space<vmem>>, %arg10: memref<1x1x128xf32, #tpu.memory_space<vmem>>, %arg11: memref<1x1x128xf32, #tpu.memory_space<vmem>>, %arg12: memref<1x1x128xf32, #tpu.memory_space<vmem>>, %arg13: memref<1x128x256xbf16, #tpu.memory_space<vmem>>, %arg14: memref<1x1x256xf32, #tpu.memory_space<vmem>>, %arg15: memref<1x256x128xbf16, #tpu.memory_space<vmem>>, %arg16: memref<1x1x128xf32, #tpu.memory_space<vmem>>, %arg17: memref<1x128xf32, #tpu.memory_space<vmem>>, %arg18: memref<1x128xf32, #tpu.memory_space<vmem>>, %arg19: memref<32x128xf32, #tpu.memory_space<vmem>>) attributes {dimension_semantics = [#tpu.dimension_semantics<arbitrary>], iteration_bounds = array<i64: 2>, scalar_prefetch = 0 : i64, scratch_operands = 0 : i64, tpu.core_type = #tpu.core_type<tc>, window_params = [{pipeline_mode = #tpu.pipeline_mode<synchronous>, transform_indices = @transform_0, window_bounds = array<i64: 32, 192>}, {pipeline_mode = #tpu.pipeline_mode<synchronous>, transform_indices = @transform_1, window_bounds = array<i64: 192, 128>}, {pipeline_mode = #tpu.pipeline_mode<synchronous>, transform_indices = @transform_2, window_bounds = array<i64: 1, 128>}, {pipeline_mode = #tpu.pipeline_mode<synchronous>, transform_indices = @transform_3, window_bounds = array<i64: 32, 128>}, {transform_indices = @transform_4, window_bounds = array<i64: 1, 1, 128>}, {transform_indices = @transform_5, window_bounds = array<i64: 1, 1, 128>}, {transform_indices = @transform_6, window_bounds = array<i64: 1, 128, 384>}, {transform_indices = @transform_7, window_bounds = array<i64: 1, 1, 384>}, {transform_indices = @transform_8, window_bounds = array<i64: 1, 128, 128>}, {transform_indices = @transform_9, window_bounds = array<i64: 1, 1, 128>}, {transform_indices = @transform_10, window_bounds = array<i64: 1, 1, 128>}, {transform_indices = @transform_11, window_bounds = array<i64: 1, 1, 128>}, {transform_indices = @transform_12, window_bounds = array<i64: 1, 128, 256>}, {transform_indices = @transform_13, window_bounds = array<i64: 1, 1, 256>}, {transform_indices = @transform_14, window_bounds = array<i64: 1, 256, 128>}, {transform_indices = @transform_15, window_bounds = array<i64: 1, 1, 128>}, {pipeline_mode = #tpu.pipeline_mode<synchronous>, transform_indices = @transform_16, window_bounds = array<i64: 1, 128>}, {pipeline_mode = #tpu.pipeline_mode<synchronous>, transform_indices = @transform_17, window_bounds = array<i64: 1, 128>}, {pipeline_mode = #tpu.pipeline_mode<synchronous>, transform_indices = @transform_18, window_bounds = array<i64: 32, 128>}]} {
    %c0_i32 = arith.constant 0 : i32
    %0 = arith.cmpi eq, %arg0, %c0_i32 : i32
    %1 = arith.extui %0 : i1 to i32
    %c0_i32_0 = arith.constant 0 : i32
    %2 = arith.cmpi ne, %1, %c0_i32_0 : i32
    scf.if %2 {
      %c0_60 = arith.constant 0 : index
      %c0_61 = arith.constant 0 : index
      %130 = vector.load %arg1[%c0_60, %c0_61] : memref<32x192xbf16, #tpu.memory_space<vmem>>, vector<32x192xbf16>
      %c0_62 = arith.constant 0 : index
      %c0_63 = arith.constant 0 : index
      %131 = vector.load %arg2[%c0_62, %c0_63] : memref<192x128xbf16, #tpu.memory_space<vmem>>, vector<192x128xbf16>
      %cst_64 = arith.constant dense<0.000000e+00> : vector<32x128xf32>
      %132 = tpu.matmul %130, %131, %cst_64 {dimension_numbers = #tpu.dot_dimension_numbers<[1], [0], [0], [1], [0, 0, 1, 1], [], []>} : vector<32x192xbf16>, vector<192x128xbf16>, vector<32x128xf32> -> vector<32x128xf32>
      %c0_65 = arith.constant 0 : index
      %c0_66 = arith.constant 0 : index
      %133 = vector.load %arg3[%c0_65, %c0_66] : memref<1x128xf32, #tpu.memory_space<vmem>>, vector<1x128xf32>
      %134 = vector.broadcast %133 : vector<1x128xf32> to vector<32x128xf32>
      %135 = arith.addf %132, %134 : vector<32x128xf32>
      %c0_67 = arith.constant 0 : index
      %c0_68 = arith.constant 0 : index
      %136 = vector.load %arg4[%c0_67, %c0_68] : memref<32x128xf32, #tpu.memory_space<vmem>>, vector<32x128xf32>
      %137 = arith.addf %135, %136 : vector<32x128xf32>
      %c0_69 = arith.constant 0 : index
      %c0_70 = arith.constant 0 : index
      %138 = vector.load %arg19[%c0_69, %c0_70] : memref<32x128xf32, #tpu.memory_space<vmem>>, vector<32x128xf32>
      tpu.vector_store %arg19[%c0_69, %c0_70], %137 {strides = array<i32>} : memref<32x128xf32, #tpu.memory_space<vmem>>, vector<32x128xf32>,
    } else {
    }
    %c0 = arith.constant 0 : index
    %c0_1 = arith.constant 0 : index
    %3 = vector.load %arg19[%c0, %c0_1] : memref<32x128xf32, #tpu.memory_space<vmem>>, vector<32x128xf32>
    %c0_2 = arith.constant 0 : index
    %c0_3 = arith.constant 0 : index
    %c0_4 = arith.constant 0 : index
    %4 = vector.load %arg5[%c0_2, %c0_3, %c0_4] : memref<1x1x128xf32, #tpu.memory_space<vmem>>, vector<1x1x128xf32>
    %5 = vector.shape_cast %4 : vector<1x1x128xf32> to vector<1x128xf32>
    %c0_5 = arith.constant 0 : index
    %c0_6 = arith.constant 0 : index
    %c0_7 = arith.constant 0 : index
    %6 = vector.load %arg6[%c0_5, %c0_6, %c0_7] : memref<1x1x128xf32, #tpu.memory_space<vmem>>, vector<1x1x128xf32>
    %7 = vector.shape_cast %6 : vector<1x1x128xf32> to vector<1x128xf32>
    %cst = arith.constant dense<0.000000e+00> : vector<32xf32>
    %8 = vector.multi_reduction <add>, %3, %cst [1] : vector<32x128xf32> to vector<32xf32>
    %9 = vector.shape_cast %8 : vector<32xf32> to vector<32x1xf32>
    %cst_8 = arith.constant 1.280000e+02 : f32
    %10 = vector.broadcast %cst_8 : f32 to vector<32x1xf32>
    %11 = arith.divf %9, %10 : vector<32x1xf32>
    %12 = vector.broadcast %11 : vector<32x1xf32> to vector<32x128xf32>
    %13 = arith.subf %3, %12 : vector<32x128xf32>
    %14 = arith.mulf %13, %13 : vector<32x128xf32>
    %cst_9 = arith.constant dense<0.000000e+00> : vector<32xf32>
    %15 = vector.multi_reduction <add>, %14, %cst_9 [1] : vector<32x128xf32> to vector<32xf32>
    %16 = vector.shape_cast %15 : vector<32xf32> to vector<32x1xf32>
    %cst_10 = arith.constant 1.280000e+02 : f32
    %17 = vector.broadcast %cst_10 : f32 to vector<32x1xf32>
    %18 = arith.divf %16, %17 : vector<32x1xf32>
    %19 = vector.broadcast %11 : vector<32x1xf32> to vector<32x128xf32>
    %20 = arith.subf %3, %19 : vector<32x128xf32>
    %cst_11 = arith.constant 9.99999997E-7 : f32
    %21 = vector.broadcast %cst_11 : f32 to vector<32x1xf32>
    %22 = arith.addf %18, %21 : vector<32x1xf32>
    %23 = math.rsqrt %22 : vector<32x1xf32>
    %24 = vector.broadcast %23 : vector<32x1xf32> to vector<32x128xf32>
    %25 = arith.mulf %20, %24 : vector<32x128xf32>
    %26 = vector.broadcast %5 : vector<1x128xf32> to vector<32x128xf32>
    %27 = arith.mulf %25, %26 : vector<32x128xf32>
    %28 = vector.broadcast %7 : vector<1x128xf32> to vector<32x128xf32>
    %29 = arith.addf %27, %28 : vector<32x128xf32>
    %30 = arith.truncf %29 : vector<32x128xf32> to vector<32x128xbf16>
    %c0_12 = arith.constant 0 : index
    %c0_13 = arith.constant 0 : index
    %c0_14 = arith.constant 0 : index
    %31 = vector.load %arg7[%c0_12, %c0_13, %c0_14] : memref<1x128x384xbf16, #tpu.memory_space<vmem>>, vector<1x128x384xbf16>
    %32 = vector.shape_cast %31 : vector<1x128x384xbf16> to vector<128x384xbf16>
    %cst_15 = arith.constant dense<0.000000e+00> : vector<32x384xf32>
    %33 = tpu.matmul %30, %32, %cst_15 {dimension_numbers = #tpu.dot_dimension_numbers<[1], [0], [0], [1], [0, 0, 1, 1], [], []>} : vector<32x128xbf16>, vector<128x384xbf16>, vector<32x384xf32> -> vector<32x384xf32>
    %c0_16 = arith.constant 0 : index
    %c0_17 = arith.constant 0 : index
    %c0_18 = arith.constant 0 : index
    %34 = vector.load %arg8[%c0_16, %c0_17, %c0_18] : memref<1x1x384xf32, #tpu.memory_space<vmem>>, vector<1x1x384xf32>
    %35 = vector.shape_cast %34 : vector<1x1x384xf32> to vector<1x384xf32>
    %36 = vector.broadcast %35 : vector<1x384xf32> to vector<32x384xf32>
    %37 = arith.addf %33, %36 : vector<32x384xf32>
    %38 = vector.shape_cast %37 : vector<32x384xf32> to vector<2x16x12x32xf32>
    %39 = tpu.transpose %38, [0, 2, 1, 3] : vector<2x16x12x32xf32> -> vector<2x12x16x32xf32>
    %40 = vector.extract_strided_slice %39 {offsets = [0, 0, 0, 0], sizes = [2, 4, 16, 32], strides = [1, 1, 1, 1]} : vector<2x12x16x32xf32> to vector<2x4x16x32xf32>
    %41 = vector.shape_cast %40 : vector<2x4x16x32xf32> to vector<8x16x32xf32>
    %42 = arith.truncf %41 : vector<8x16x32xf32> to vector<8x16x32xbf16>
    %43 = vector.extract_strided_slice %39 {offsets = [0, 8, 0, 0], sizes = [2, 4, 16, 32], strides = [1, 1, 1, 1]} : vector<2x12x16x32xf32> to vector<2x4x16x32xf32>
    %44 = vector.shape_cast %43 : vector<2x4x16x32xf32> to vector<8x16x32xf32>
    %45 = arith.truncf %44 : vector<8x16x32xf32> to vector<8x16x32xbf16>
    %46 = vector.extract_strided_slice %39 {offsets = [0, 4, 0, 0], sizes = [2, 4, 16, 32], strides = [1, 1, 1, 1]} : vector<2x12x16x32xf32> to vector<2x4x16x32xf32>
    %47 = tpu.transpose %46, [0, 1, 3, 2] : vector<2x4x16x32xf32> -> vector<2x4x32x16xf32>
    %48 = vector.shape_cast %47 : vector<2x4x32x16xf32> to vector<8x32x16xf32>
    %49 = arith.truncf %48 : vector<8x32x16xf32> to vector<8x32x16xbf16>
    "tpu.trace_start"() <{level = 10 : i32, message = "bqd,bdk->bqk"}> : () -> ()
    %cst_19 = arith.constant dense<0.000000e+00> : vector<8x16x16xf32>
    %50 = tpu.matmul %42, %49, %cst_19 {dimension_numbers = #tpu.dot_dimension_numbers<[2], [1], [1], [2], [0, 0, 0, 1, 1, 2], [0], [0]>} : vector<8x16x32xbf16>, vector<8x32x16xbf16>, vector<8x16x16xf32> -> vector<8x16x16xf32>
    "tpu.trace_stop"() : () -> ()
    %cst_20 = arith.constant dense<0xFF800000> : vector<8x16xf32>
    %51 = vector.multi_reduction <maximumf>, %50, %cst_20 [2] : vector<8x16x16xf32> to vector<8x16xf32>
    %52 = vector.shape_cast %51 : vector<8x16xf32> to vector<8x16x1xf32>
    %53 = vector.broadcast %52 : vector<8x16x1xf32> to vector<8x16x16xf32>
    %54 = arith.subf %50, %53 : vector<8x16x16xf32>
    %55 = math.exp %54 : vector<8x16x16xf32>
    %cst_21 = arith.constant dense<0.000000e+00> : vector<8x16xf32>
    %56 = vector.multi_reduction <add>, %55, %cst_21 [2] : vector<8x16x16xf32> to vector<8x16xf32>
    %57 = vector.shape_cast %56 : vector<8x16xf32> to vector<8x16x1xf32>
    %58 = tpu.reciprocal %57 {approx = true} : vector<8x16x1xf32> -> vector<8x16x1xf32>
    %59 = vector.broadcast %58 : vector<8x16x1xf32> to vector<8x16x16xf32>
    %60 = arith.mulf %55, %59 : vector<8x16x16xf32>
    %61 = arith.truncf %60 : vector<8x16x16xf32> to vector<8x16x16xbf16>
    "tpu.trace_start"() <{level = 10 : i32, message = "bqk,bkd->bqd"}> : () -> ()
    %cst_22 = arith.constant dense<0.000000e+00> : vector<8x16x32xf32>
    %62 = tpu.matmul %61, %45, %cst_22 {dimension_numbers = #tpu.dot_dimension_numbers<[2], [1], [1], [2], [0, 0, 0, 1, 1, 2], [0], [0]>} : vector<8x16x16xbf16>, vector<8x16x32xbf16>, vector<8x16x32xf32> -> vector<8x16x32xf32>
    "tpu.trace_stop"() : () -> ()
    %63 = vector.shape_cast %62 : vector<8x16x32xf32> to vector<2x4x16x32xf32>
    %64 = tpu.transpose %63, [0, 2, 1, 3] : vector<2x4x16x32xf32> -> vector<2x16x4x32xf32>
    %65 = vector.shape_cast %64 : vector<2x16x4x32xf32> to vector<32x128xf32>
    %66 = arith.truncf %65 : vector<32x128xf32> to vector<32x128xbf16>
    %c0_23 = arith.constant 0 : index
    %c0_24 = arith.constant 0 : index
    %c0_25 = arith.constant 0 : index
    %67 = vector.load %arg9[%c0_23, %c0_24, %c0_25] : memref<1x128x128xbf16, #tpu.memory_space<vmem>>, vector<1x128x128xbf16>
    %68 = vector.shape_cast %67 : vector<1x128x128xbf16> to vector<128x128xbf16>
    %cst_26 = arith.constant dense<0.000000e+00> : vector<32x128xf32>
    %69 = tpu.matmul %66, %68, %cst_26 {dimension_numbers = #tpu.dot_dimension_numbers<[1], [0], [0], [1], [0, 0, 1, 1], [], []>} : vector<32x128xbf16>, vector<128x128xbf16>, vector<32x128xf32> -> vector<32x128xf32>
    %c0_27 = arith.constant 0 : index
    %c0_28 = arith.constant 0 : index
    %c0_29 = arith.constant 0 : index
    %70 = vector.load %arg10[%c0_27, %c0_28, %c0_29] : memref<1x1x128xf32, #tpu.memory_space<vmem>>, vector<1x1x128xf32>
    %71 = vector.shape_cast %70 : vector<1x1x128xf32> to vector<1x128xf32>
    %72 = vector.broadcast %71 : vector<1x128xf32> to vector<32x128xf32>
    %73 = arith.addf %69, %72 : vector<32x128xf32>
    %74 = arith.addf %3, %73 : vector<32x128xf32>
    %c0_30 = arith.constant 0 : index
    %c0_31 = arith.constant 0 : index
    %c0_32 = arith.constant 0 : index
    %75 = vector.load %arg11[%c0_30, %c0_31, %c0_32] : memref<1x1x128xf32, #tpu.memory_space<vmem>>, vector<1x1x128xf32>
    %76 = vector.shape_cast %75 : vector<1x1x128xf32> to vector<1x128xf32>
    %c0_33 = arith.constant 0 : index
    %c0_34 = arith.constant 0 : index
    %c0_35 = arith.constant 0 : index
    %77 = vector.load %arg12[%c0_33, %c0_34, %c0_35] : memref<1x1x128xf32, #tpu.memory_space<vmem>>, vector<1x1x128xf32>
    %78 = vector.shape_cast %77 : vector<1x1x128xf32> to vector<1x128xf32>
    %cst_36 = arith.constant dense<0.000000e+00> : vector<32xf32>
    %79 = vector.multi_reduction <add>, %74, %cst_36 [1] : vector<32x128xf32> to vector<32xf32>
    %80 = vector.shape_cast %79 : vector<32xf32> to vector<32x1xf32>
    %cst_37 = arith.constant 1.280000e+02 : f32
    %81 = vector.broadcast %cst_37 : f32 to vector<32x1xf32>
    %82 = arith.divf %80, %81 : vector<32x1xf32>
    %83 = vector.broadcast %82 : vector<32x1xf32> to vector<32x128xf32>
    %84 = arith.subf %74, %83 : vector<32x128xf32>
    %85 = arith.mulf %84, %84 : vector<32x128xf32>
    %cst_38 = arith.constant dense<0.000000e+00> : vector<32xf32>
    %86 = vector.multi_reduction <add>, %85, %cst_38 [1] : vector<32x128xf32> to vector<32xf32>
    %87 = vector.shape_cast %86 : vector<32xf32> to vector<32x1xf32>
    %cst_39 = arith.constant 1.280000e+02 : f32
    %88 = vector.broadcast %cst_39 : f32 to vector<32x1xf32>
    %89 = arith.divf %87, %88 : vector<32x1xf32>
    %90 = vector.broadcast %82 : vector<32x1xf32> to vector<32x128xf32>
    %91 = arith.subf %74, %90 : vector<32x128xf32>
    %cst_40 = arith.constant 9.99999997E-7 : f32
    %92 = vector.broadcast %cst_40 : f32 to vector<32x1xf32>
    %93 = arith.addf %89, %92 : vector<32x1xf32>
    %94 = math.rsqrt %93 : vector<32x1xf32>
    %95 = vector.broadcast %94 : vector<32x1xf32> to vector<32x128xf32>
    %96 = arith.mulf %91, %95 : vector<32x128xf32>
    %97 = vector.broadcast %76 : vector<1x128xf32> to vector<32x128xf32>
    %98 = arith.mulf %96, %97 : vector<32x128xf32>
    %99 = vector.broadcast %78 : vector<1x128xf32> to vector<32x128xf32>
    %100 = arith.addf %98, %99 : vector<32x128xf32>
    %101 = arith.truncf %100 : vector<32x128xf32> to vector<32x128xbf16>
    %c0_41 = arith.constant 0 : index
    %c0_42 = arith.constant 0 : index
    %c0_43 = arith.constant 0 : index
    %102 = vector.load %arg13[%c0_41, %c0_42, %c0_43] : memref<1x128x256xbf16, #tpu.memory_space<vmem>>, vector<1x128x256xbf16>
    %103 = vector.shape_cast %102 : vector<1x128x256xbf16> to vector<128x256xbf16>
    %cst_44 = arith.constant dense<0.000000e+00> : vector<32x256xf32>
    %104 = tpu.matmul %101, %103, %cst_44 {dimension_numbers = #tpu.dot_dimension_numbers<[1], [0], [0], [1], [0, 0, 1, 1], [], []>} : vector<32x128xbf16>, vector<128x256xbf16>, vector<32x256xf32> -> vector<32x256xf32>
    %c0_45 = arith.constant 0 : index
    %c0_46 = arith.constant 0 : index
    %c0_47 = arith.constant 0 : index
    %105 = vector.load %arg14[%c0_45, %c0_46, %c0_47] : memref<1x1x256xf32, #tpu.memory_space<vmem>>, vector<1x1x256xf32>
    %106 = vector.shape_cast %105 : vector<1x1x256xf32> to vector<1x256xf32>
    %107 = vector.broadcast %106 : vector<1x256xf32> to vector<32x256xf32>
    %108 = arith.addf %104, %107 : vector<32x256xf32>
    %cst_48 = arith.constant 1.702000e+00 : f32
    %109 = vector.broadcast %cst_48 : f32 to vector<32x256xf32>
    %110 = arith.mulf %109, %108 : vector<32x256xf32>
    %111 = arith.negf %110 : vector<32x256xf32>
    %112 = math.exp %111 : vector<32x256xf32>
    %cst_49 = arith.constant 1.000000e+00 : f32
    %113 = vector.broadcast %cst_49 : f32 to vector<32x256xf32>
    %114 = arith.addf %113, %112 : vector<32x256xf32>
    %115 = arith.divf %113, %114 : vector<32x256xf32>
    %116 = arith.mulf %108, %115 : vector<32x256xf32>
    %117 = arith.truncf %116 : vector<32x256xf32> to vector<32x256xbf16>
    %c0_50 = arith.constant 0 : index
    %c0_51 = arith.constant 0 : index
    %c0_52 = arith.constant 0 : index
    %118 = vector.load %arg15[%c0_50, %c0_51, %c0_52] : memref<1x256x128xbf16, #tpu.memory_space<vmem>>, vector<1x256x128xbf16>
    %119 = vector.shape_cast %118 : vector<1x256x128xbf16> to vector<256x128xbf16>
    %cst_53 = arith.constant dense<0.000000e+00> : vector<32x128xf32>
    %120 = tpu.matmul %117, %119, %cst_53 {dimension_numbers = #tpu.dot_dimension_numbers<[1], [0], [0], [1], [0, 0, 1, 1], [], []>} : vector<32x256xbf16>, vector<256x128xbf16>, vector<32x128xf32> -> vector<32x128xf32>
    %c0_54 = arith.constant 0 : index
    %c0_55 = arith.constant 0 : index
    %c0_56 = arith.constant 0 : index
    %121 = vector.load %arg16[%c0_54, %c0_55, %c0_56] : memref<1x1x128xf32, #tpu.memory_space<vmem>>, vector<1x1x128xf32>
    %122 = vector.shape_cast %121 : vector<1x1x128xf32> to vector<1x128xf32>
    %123 = vector.broadcast %122 : vector<1x128xf32> to vector<32x128xf32>
    %124 = arith.addf %120, %123 : vector<32x128xf32>
    %125 = arith.addf %74, %124 : vector<32x128xf32>
    %c0_57 = arith.constant 0 : index
    %c0_58 = arith.constant 0 : index
    %126 = vector.load %arg19[%c0_57, %c0_58] : memref<32x128xf32, #tpu.memory_space<vmem>>, vector<32x128xf32>
    tpu.vector_store %arg19[%c0_57, %c0_58], %125 {strides = array<i32>} : memref<32x128xf32, #tpu.memory_space<vmem>>, vector<32x128xf32>,
    %c1_i32 = arith.constant 1 : i32
    %127 = arith.cmpi eq, %arg0, %c1_i32 : i32
    %128 = arith.extui %127 : i1 to i32
    %c0_i32_59 = arith.constant 0 : i32
    %129 = arith.cmpi ne, %128, %c0_i32_59 : i32
    scf.if %129 {
      %c0_60 = arith.constant 0 : index
      %c0_61 = arith.constant 0 : index
      %130 = vector.load %arg17[%c0_60, %c0_61] : memref<1x128xf32, #tpu.memory_space<vmem>>, vector<1x128xf32>
      %c0_62 = arith.constant 0 : index
      %c0_63 = arith.constant 0 : index
      %131 = vector.load %arg18[%c0_62, %c0_63] : memref<1x128xf32, #tpu.memory_space<vmem>>, vector<1x128xf32>
      %cst_64 = arith.constant dense<0.000000e+00> : vector<32xf32>
      %132 = vector.multi_reduction <add>, %125, %cst_64 [1] : vector<32x128xf32> to vector<32xf32>
      %133 = vector.shape_cast %132 : vector<32xf32> to vector<32x1xf32>
      %cst_65 = arith.constant 1.280000e+02 : f32
      %134 = vector.broadcast %cst_65 : f32 to vector<32x1xf32>
      %135 = arith.divf %133, %134 : vector<32x1xf32>
      %136 = vector.broadcast %135 : vector<32x1xf32> to vector<32x128xf32>
      %137 = arith.subf %125, %136 : vector<32x128xf32>
      %138 = arith.mulf %137, %137 : vector<32x128xf32>
      %cst_66 = arith.constant dense<0.000000e+00> : vector<32xf32>
      %139 = vector.multi_reduction <add>, %138, %cst_66 [1] : vector<32x128xf32> to vector<32xf32>
      %140 = vector.shape_cast %139 : vector<32xf32> to vector<32x1xf32>
      %cst_67 = arith.constant 1.280000e+02 : f32
      %141 = vector.broadcast %cst_67 : f32 to vector<32x1xf32>
      %142 = arith.divf %140, %141 : vector<32x1xf32>
      %143 = vector.broadcast %135 : vector<32x1xf32> to vector<32x128xf32>
      %144 = arith.subf %125, %143 : vector<32x128xf32>
      %cst_68 = arith.constant 9.99999997E-7 : f32
      %145 = vector.broadcast %cst_68 : f32 to vector<32x1xf32>
      %146 = arith.addf %142, %145 : vector<32x1xf32>
      %147 = math.rsqrt %146 : vector<32x1xf32>
      %148 = vector.broadcast %147 : vector<32x1xf32> to vector<32x128xf32>
      %149 = arith.mulf %144, %148 : vector<32x128xf32>
      %150 = vector.broadcast %130 : vector<1x128xf32> to vector<32x128xf32>
      %151 = arith.mulf %149, %150 : vector<32x128xf32>
      %152 = vector.broadcast %131 : vector<1x128xf32> to vector<32x128xf32>
      %153 = arith.addf %151, %152 : vector<32x128xf32>
      %c0_69 = arith.constant 0 : index
      %c0_70 = arith.constant 0 : index
      %154 = vector.load %arg19[%c0_69, %c0_70] : memref<32x128xf32, #tpu.memory_space<vmem>>, vector<32x128xf32>
      tpu.vector_store %arg19[%c0_69, %c0_70], %153 {strides = array<i32>} : memref<32x128xf32, #tpu.memory_space<vmem>>, vector<32x128xf32>,
    } else {
    }
    return
  }
  func.func @transform_0(%arg0: i32) -> (i32, i32) {
    %c0_i32 = arith.constant 0 : i32
    %c0_i32_0 = arith.constant 0 : i32
    %c0_i32_1 = arith.constant 0 : i32
    return %c0_i32, %c0_i32_0 : i32, i32
  }
  func.func @transform_1(%arg0: i32) -> (i32, i32) {
    %c0_i32 = arith.constant 0 : i32
    %c0_i32_0 = arith.constant 0 : i32
    %c0_i32_1 = arith.constant 0 : i32
    return %c0_i32, %c0_i32_0 : i32, i32
  }
  func.func @transform_2(%arg0: i32) -> (i32, i32) {
    %c0_i32 = arith.constant 0 : i32
    %c0_i32_0 = arith.constant 0 : i32
    %c0_i32_1 = arith.constant 0 : i32
    return %c0_i32, %c0_i32_0 : i32, i32
  }
  func.func @transform_3(%arg0: i32) -> (i32, i32) {
    %c0_i32 = arith.constant 0 : i32
    %c0_i32_0 = arith.constant 0 : i32
    %c0_i32_1 = arith.constant 0 : i32
    return %c0_i32, %c0_i32_0 : i32, i32
  }
  func.func @transform_4(%arg0: i32) -> (i32, i32, i32) {
    %c0_i32 = arith.constant 0 : i32
    %c0_i32_0 = arith.constant 0 : i32
    %c0_i32_1 = arith.constant 0 : i32
    return %arg0, %c0_i32, %c0_i32_0 : i32, i32, i32
  }
  func.func @transform_5(%arg0: i32) -> (i32, i32, i32) {
    %c0_i32 = arith.constant 0 : i32
    %c0_i32_0 = arith.constant 0 : i32
    %c0_i32_1 = arith.constant 0 : i32
    return %arg0, %c0_i32, %c0_i32_0 : i32, i32, i32
  }
  func.func @transform_6(%arg0: i32) -> (i32, i32, i32) {
    %c0_i32 = arith.constant 0 : i32
    %c0_i32_0 = arith.constant 0 : i32
    %c0_i32_1 = arith.constant 0 : i32
    return %arg0, %c0_i32, %c0_i32_0 : i32, i32, i32
  }
  func.func @transform_7(%arg0: i32) -> (i32, i32, i32) {
    %c0_i32 = arith.constant 0 : i32
    %c0_i32_0 = arith.constant 0 : i32
    %c0_i32_1 = arith.constant 0 : i32
    return %arg0, %c0_i32, %c0_i32_0 : i32, i32, i32
  }
  func.func @transform_8(%arg0: i32) -> (i32, i32, i32) {
    %c0_i32 = arith.constant 0 : i32
    %c0_i32_0 = arith.constant 0 : i32
    %c0_i32_1 = arith.constant 0 : i32
    return %arg0, %c0_i32, %c0_i32_0 : i32, i32, i32
  }
  func.func @transform_9(%arg0: i32) -> (i32, i32, i32) {
    %c0_i32 = arith.constant 0 : i32
    %c0_i32_0 = arith.constant 0 : i32
    %c0_i32_1 = arith.constant 0 : i32
    return %arg0, %c0_i32, %c0_i32_0 : i32, i32, i32
  }
  func.func @transform_10(%arg0: i32) -> (i32, i32, i32) {
    %c0_i32 = arith.constant 0 : i32
    %c0_i32_0 = arith.constant 0 : i32
    %c0_i32_1 = arith.constant 0 : i32
    return %arg0, %c0_i32, %c0_i32_0 : i32, i32, i32
  }
  func.func @transform_11(%arg0: i32) -> (i32, i32, i32) {
    %c0_i32 = arith.constant 0 : i32
    %c0_i32_0 = arith.constant 0 : i32
    %c0_i32_1 = arith.constant 0 : i32
    return %arg0, %c0_i32, %c0_i32_0 : i32, i32, i32
  }
  func.func @transform_12(%arg0: i32) -> (i32, i32, i32) {
    %c0_i32 = arith.constant 0 : i32
    %c0_i32_0 = arith.constant 0 : i32
    %c0_i32_1 = arith.constant 0 : i32
    return %arg0, %c0_i32, %c0_i32_0 : i32, i32, i32
  }
  func.func @transform_13(%arg0: i32) -> (i32, i32, i32) {
    %c0_i32 = arith.constant 0 : i32
    %c0_i32_0 = arith.constant 0 : i32
    %c0_i32_1 = arith.constant 0 : i32
    return %arg0, %c0_i32, %c0_i32_0 : i32, i32, i32
  }
  func.func @transform_14(%arg0: i32) -> (i32, i32, i32) {
    %c0_i32 = arith.constant 0 : i32
    %c0_i32_0 = arith.constant 0 : i32
    %c0_i32_1 = arith.constant 0 : i32
    return %arg0, %c0_i32, %c0_i32_0 : i32, i32, i32
  }
  func.func @transform_15(%arg0: i32) -> (i32, i32, i32) {
    %c0_i32 = arith.constant 0 : i32
    %c0_i32_0 = arith.constant 0 : i32
    %c0_i32_1 = arith.constant 0 : i32
    return %arg0, %c0_i32, %c0_i32_0 : i32, i32, i32
  }
  func.func @transform_16(%arg0: i32) -> (i32, i32) {
    %c0_i32 = arith.constant 0 : i32
    %c0_i32_0 = arith.constant 0 : i32
    %c0_i32_1 = arith.constant 0 : i32
    return %c0_i32, %c0_i32_0 : i32, i32
  }
  func.func @transform_17(%arg0: i32) -> (i32, i32) {
    %c0_i32 = arith.constant 0 : i32
    %c0_i32_0 = arith.constant 0 : i32
    %c0_i32_1 = arith.constant 0 : i32
    return %c0_i32, %c0_i32_0 : i32, i32
  }
  func.func @transform_18(%arg0: i32) -> (i32, i32) {
    %c0_i32 = arith.constant 0 : i32
    %c0_i32_0 = arith.constant 0 : i32
    %c0_i32_1 = arith.constant 0 : i32
    return %c0_i32, %c0_i32_0 : i32, i32
  }
}

</mosaic_0001>

<bundles_post_ra>
// kernel: siglip_vision_transformer.1
= control target key start
LH: loop header
LB: loop body
LE: loop exit
PB: predicated region body
PF: predicated region fallthrough
CT: control target
= control target key end

     0   :  { %s7813_s0 = inlined_call_operand.vmem [shape: bf16[32,192], index: 0, kind: input, shape index: {}]   ;;  %s7814_s1 = inlined_call_operand.vmem [shape: bf16[192,128], index: 1, kind: input, shape index: {}]   ;;  %s7815_s2 = inlined_call_operand.vmem [shape: f32[1,128], index: 2, kind: input, shape index: {}]   ;;  %s7816_s3 = inlined_call_operand.vmem [shape: f32[32,128], index: 3, kind: input, shape index: {}]   ;;  %s7817_s4 = inlined_call_operand.vmem [shape: f32[2,1,128], index: 4, kind: input, shape index: {}]   ;;  %s7818_s5 = inlined_call_operand.vmem [shape: f32[2,1,128], index: 5, kind: input, shape index: {}]   ;;  %s7819_s6 = inlined_call_operand.vmem [shape: bf16[2,128,384], index: 6, kind: input, shape index: {}]   ;;  %s7820_s7 = inlined_call_operand.vmem [shape: f32[2,1,384], index: 7, kind: input, shape index: {}]   ;;  %s7821_s8 = inlined_call_operand.vmem [shape: bf16[2,128,128], index: 8, kind: input, shape index: {}]   ;;  %s7822_s9 = inlined_call_operand.vmem [shape: f32[2,1,128], index: 9, kind: input, shape index: {}]   ;;  %s7823_s10 = inlined_call_operand.vmem [shape: f32[2,1,128], index: 10, kind: input, shape index: {}]   ;;  %s7824_s11 = inlined_call_operand.vmem [shape: f32[2,1,128], index: 11, kind: input, shape index: {}]   ;;  %s7825_s12 = inlined_call_operand.vmem [shape: bf16[2,128,256], index: 12, kind: input, shape index: {}]   ;;  %s7826_s13 = inlined_call_operand.vmem [shape: f32[2,1,256], index: 13, kind: input, shape index: {}]   ;;  %s7827_s14 = inlined_call_operand.vmem [shape: bf16[2,256,128], index: 14, kind: input, shape index: {}]   ;;  %s7828_s15 = inlined_call_operand.vmem [shape: f32[2,1,128], index: 15, kind: input, shape index: {}]   ;;  %s7829_s16 = inlined_call_operand.vmem [shape: f32[1,128], index: 16, kind: input, shape index: {}]   ;;  %s7830_s17 = inlined_call_operand.vmem [shape: f32[1,128], index: 17, kind: input, shape index: {}]   ;;  %s7831_s18 = inlined_call_operand.hbm [shape: f32[32,128], index: 18, kind: output, shape index: {}]  }
   0x1   :  { %7835 = sst [smem:[#allocation6_spill]] %s7813_s0 }
   0x2   :  { %7836 = sst [smem:[#allocation7_spill]] %s7814_s1 }
   0x3   :  { %7837 = sst [smem:[#allocation8_spill]] %s7815_s2 }
   0x4   :  { %7838 = sst [smem:[#allocation9_spill]] %s7818_s5 }
   0x5   :  { %7839 = sst [smem:[#allocation10_spill]] %s7819_s6 }
   0x6   :  { %7840 = sst [smem:[#allocation11_spill]] %s7821_s8 }
   0x7   :  { %7841 = sst [smem:[#allocation12_spill]] %s7829_s16 }
   0x8   :  { %7842 = sst [smem:[#allocation13_spill]] %s7830_s17 }
   0x9   :  { %7843 = sst [smem:[#allocation14_spill]] %s7831_s18 }
   0xa   :  { %23 = vsyncpa [#allocation3], 0  ;;  %s6644_s27 = smov 0  }
   0xb LB: > { %7844 = sst [smem:[#allocation5_spill]] %s6535_s27  ;;  %s6650_s28 = sadd.s32 4294967295, %s6535_s27   ;;  %s6535_s27 = sphi %s6644_s27, %s29_s27  }
   0xc   : > { %p5680_p0 = scmp.ge.s32.totalorder %s6535_s27, 1  ;;  %p604_p1 = scmp.lt.s32.totalorder %s6535_s27, 3 }
   0xe   : > { %p605_p2 = pnand %p5680_p0, %p604_p1 }
   0xf   : > { %p694_p3 = scmp.lt.s32.totalorder (!%p605_p2), %s6650_s28, 1  ;;  %s7846_s8 = sld [smem:[#allocation11_spill]] (!%p605_p2) }
  0x10   : > { %608 = sbr.rel (%p605_p2) target bundleno = 3337 (0xd09), region = 92  ;;  %s7847_s6 = sld [smem:[#allocation10_spill]] (!%p605_p2) }
  0x11   : > { %p5689_p4 = scmp.ne.s32.totalorder (!%p605_p2), %s6650_s28, 0 }
  0x15   : > { %s6656_s29 = scalar_select %p694_p3, %s6650_s28, 1 }
  0x16   : > { %s7850_s20 = sld [smem:[#allocation8_spill]] (!%p5689_p4) }
  0x17   : > { %s6125_s22 = smul.u32 192, %s6656_s29  ;;  %s5858_s2 = sshll.u32 %s6656_s29, 6 }
  0x18   : > { %s6126_s23 = smul.u32 3, %s6656_s29  ;;  %s6672_s26 = scalar_lea.vmem %s7846_s8, %s5858_s2 }
  0x19   : > { %s6677_s27 = scalar_lea.vmem %s7847_s6, %s6125_s22  ;;  %s719_s24 = scalar_lea.vmem %s7823_s10, %s6656_s29 }
  0x1a   : > { %s6686_s21 = scalar_lea.vmem %s7820_s7, %s6126_s23  ;;  %s5859_s30 = sshll.u32 %s6656_s29, 7 }
  0x1b   : > { %s6700_s6 = scalar_lea.vmem %s7825_s12, %s5859_s30  ;;  %s5686_s18 = sshll.u32 %s6656_s29, 1 }
  0x1c   : > { %s6706_s23 = scalar_lea.vmem %s7826_s13, %s5686_s18  ;;  %s6711_s5 = scalar_lea.vmem %s7827_s14, %s5859_s30 }
  0x1d   : > { %s739_s25 = scalar_lea.vmem %s7828_s15, %s6656_s29  ;;  %744 = sbr.rel (%p5689_p4) target bundleno = 286 (0x11e), region = 96 }
  0x1e   : > { %s7848_s8 = sld [smem:[#allocation7_spill]] (!%p5689_p4) }
  0x1f   : > { %s7849_s22 = sld [smem:[#allocation6_spill]] (!%p5689_p4) }
  0x22   : > { %v6537_v1 = vmov 0   ;;  %vm870_vm0 = vcmask 523264   ;;  %v5690_v17 = vld [vmem:[%s7850_s20] ss:$0 sm:$0xff]  ;;  %v928_v21 = vld [vmem:[%s7816_s3 + $0x10] sm:$0xff]  ;;  %v927_v29 = vld [vmem:[%s7816_s3 + $0x8] sm:$0xff] }
  0x23   : > { %877 = vmatprep.subr.bf16.mxu0 %v6537_v1  ;;  %6101 = vmatprep.subr.bf16.mxu1 %v6537_v1  ;;  %v926_v19 = vld [vmem:[%s7816_s3] sm:$0xff]  ;;  %v929_v31 = vld [vmem:[%s7816_s3 + $0x18] sm:$0xff] }
  0x24   : > { %v6153_v0 = vld [vmem:[%s7848_s8 + $0x38] sm:$0xff]   ;;  %v6154_v2 = vld [vmem:[%s7848_s8 + $0x30] sm:$0xff]   ;;  %v6155_v3 = vld [vmem:[%s7848_s8 + $0x28] sm:$0xff]  }
  0x25   : > { %878 = vmatpush1.bf16.msra.mxu0 %v6153_v0  ;;  %6113 = vmatpush1.bf16.msra.mxu1 %v6153_v0  ;;  %v6156_v4 = vld [vmem:[%s7848_s8 + $0x20] sm:$0xff]   ;;  %v6157_v6 = vld [vmem:[%s7848_s8 + $0x18] sm:$0xff]   ;;  %v6158_v8 = vld [vmem:[%s7848_s8 + $0x10] sm:$0xff]  }
  0x26   : > { %879 = vmatprep.subr.bf16.mxu0 %v6537_v1  ;;  %6102 = vmatprep.subr.bf16.mxu1 %v6537_v1  ;;  %v6167_v5 = vld [vmem:[%s7849_s22 + $0x4] ss:$8 sps:$4 sm:$0xff]   ;;  %v6170_v7 = vld [vmem:[%s7849_s22 + $0x14] ss:$8 sps:$4 sm:$0xff]   ;;  %v6165_v15 = vld [vmem:[%s7849_s22] ss:$8 sps:$4 sm:$0xff]  }
  0x27   : > { %5707 = vmatprep.mubr.msk.bf16.mxu0 %vm870_vm0, %v6167_v5  ;;  %5708 = vmatprep.mubr.msk.bf16.mxu1 %vm870_vm0, %v6170_v7  ;;  %v6159_v9 = vld [vmem:[%s7848_s8 + $0x8] sm:$0xff]   ;;  %v6160_v10 = vld [vmem:[%s7848_s8] sm:$0xff]   ;;  %v6161_v11 = vld [vmem:[%s7848_s8 + $0x58] sm:$0xff]  }
  0x28   : > { %v6162_v12 = vld [vmem:[%s7848_s8 + $0x50] sm:$0xff]   ;;  %v6163_v13 = vld [vmem:[%s7848_s8 + $0x48] sm:$0xff]   ;;  %v6164_v14 = vld [vmem:[%s7848_s8 + $0x40] sm:$0xff]  }
  0x29   : > { %880 = vmatpush1.bf16.msra.mxu0 %v6154_v2  ;;  %6114 = vmatpush1.bf16.msra.mxu1 %v6154_v2  ;;  %v6168_v16 = vld [vmem:[%s7849_s22 + $0x10] ss:$8 sps:$4 sm:$0xff]  }
  0x2a   : > { %881 = vmatprep.subr.bf16.mxu0 %v6537_v1  ;;  %6103 = vmatprep.subr.bf16.mxu1 %v6537_v1 }
  0x2d   : > { %882 = vmatpush1.bf16.msra.mxu0 %v6155_v3  ;;  %6115 = vmatpush1.bf16.msra.mxu1 %v6155_v3 }
  0x2e   : > { %883 = vmatprep.subr.bf16.mxu0 %v6537_v1  ;;  %6104 = vmatprep.subr.bf16.mxu1 %v6537_v1 }
  0x31   : > { %884 = vmatpush1.bf16.msra.mxu0 %v6156_v4  ;;  %6116 = vmatpush1.bf16.msra.mxu1 %v6156_v4 }
  0x32   : > { %885 = vmatprep.subr.bf16.mxu0 %v6537_v1  ;;  %6105 = vmatprep.subr.bf16.mxu1 %v6537_v1 }
  0x35   : > { %886 = vmatpush1.bf16.msra.mxu0 %v6157_v6  ;;  %6117 = vmatpush1.bf16.msra.mxu1 %v6157_v6 }
  0x36   : > { %887 = vmatprep.subr.bf16.mxu0 %v6537_v1  ;;  %6106 = vmatprep.subr.bf16.mxu1 %v6537_v1 }
  0x39   : > { %888 = vmatpush1.bf16.msra.mxu0 %v6158_v8  ;;  %6118 = vmatpush1.bf16.msra.mxu1 %v6158_v8 }
  0x3a   : > { %889 = vmatprep.subr.bf16.mxu0 %v6537_v1  ;;  %6107 = vmatprep.subr.bf16.mxu1 %v6537_v1 }
  0x3d   : > { %890 = vmatpush1.bf16.msra.mxu0 %v6159_v9  ;;  %6119 = vmatpush1.bf16.msra.mxu1 %v6159_v9 }
  0x3e   : > { %891 = vmatprep.subr.bf16.mxu0 %v6537_v1  ;;  %6108 = vmatprep.subr.bf16.mxu1 %v6537_v1 }
  0x41   : > { %892 = vmatpush1.bf16.msra.mxu0 %v6160_v10  ;;  %6120 = vmatpush1.bf16.msra.mxu1 %v6160_v10 }
  0x42   : > { %901 = vmatprep.subr.bf16.mxu0 %v6537_v1  ;;  %6109 = vmatprep.subr.bf16.mxu1 %v6537_v1 }
  0x45   : > { %902 = vmatpush2.bf16.msra.mxu0 %v6161_v11  ;;  %6121 = vmatpush2.bf16.msra.mxu1 %v6161_v11 }
  0x46   : > { %903 = vmatprep.subr.bf16.mxu0 %v6537_v1  ;;  %6110 = vmatprep.subr.bf16.mxu1 %v6537_v1 }
  0x49   : > { %904 = vmatpush2.bf16.msra.mxu0 %v6162_v12  ;;  %6122 = vmatpush2.bf16.msra.mxu1 %v6162_v12 }
  0x4a   : > { %905 = vmatprep.subr.bf16.mxu0 %v6537_v1  ;;  %6111 = vmatprep.subr.bf16.mxu1 %v6537_v1 }
  0x4d   : > { %906 = vmatpush2.bf16.msra.mxu0 %v6163_v13  ;;  %6123 = vmatpush2.bf16.msra.mxu1 %v6163_v13 }
  0x4e   : > { %907 = vmatprep.subr.bf16.mxu0 %v6537_v1  ;;  %6112 = vmatprep.subr.bf16.mxu1 %v6537_v1 }
  0x51   : > { %908 = vmatpush2.bf16.msra.mxu0 %v6164_v14  ;;  %6124 = vmatpush2.bf16.msra.mxu1 %v6164_v14 }
  0x54   : > { %910 = vmatmul.mubr.bf16.vlgmr.msra.gmra.mxu0 %v6165_v15  ;;  %918 = vmatmul.mubr.bf16.vlgmr.msra.gmra.mxu1 %v6168_v16 }
 0x114   : > { %v911_v18 = vpop.f32.mrf.mxu0  ;;  %v919_v20 = vpop.f32.mrf.mxu1 }
 0x115   : > { %v912_v22 = vadd.f32 %v5690_v17, %v911_v18  ;;  %v920_v23 = vadd.f32 %v5690_v17, %v919_v20 }
 0x116   : > { %v913_v24 = vpop.f32.mrf.mxu0  ;;  %v921_v25 = vpop.f32.mrf.mxu1 }
 0x117   : > { %v930_v26 = vadd.f32 %v926_v19, %v912_v22  ;;  %v932_v27 = vadd.f32 %v928_v21, %v920_v23 }
 0x118   : > { %v914_v28 = vpop.f32.mrf.mxu0  ;;  %v922_v30 = vpop.f32.mrf.mxu1 }
 0x119   : > { %934 = vst [vmem:[#allocation2] sm:$0xff] %v930_v26  ;;  %936 = vst [vmem:[#allocation2 + $0x10] sm:$0xff] %v932_v27  ;;  %v915_v32 = vadd.f32 %v5690_v17, %v914_v28  ;;  %v923_v33 = vadd.f32 %v5690_v17, %v922_v30 }
 0x11a   : > { %v916_v34 = vpop.f32.mrf.mxu0  ;;  %v924_v35 = vpop.f32.mrf.mxu1 }
 0x11b   : > { %v931_v36 = vadd.f32 %v927_v29, %v915_v32  ;;  %v933_v37 = vadd.f32 %v929_v31, %v923_v33 }
 0x11d   : > { %935 = vst [vmem:[#allocation2 + $0x8] sm:$0xff] %v931_v36  ;;  %937 = vst [vmem:[#allocation2 + $0x18] sm:$0xff] %v933_v37 }
 0x11e PF: > { %v6297_v42 = vld [vmem:[%s6677_s27 + $0xac] ss:$12 sps:$4 sm:$0xff]   ;;  %v6299_v43 = vld [vmem:[%s6677_s27 + $0xa8] ss:$12 sps:$4 sm:$0xff]   ;;  %v6302_v61 = vld [vmem:[%s6677_s27 + $0xb0] ss:$12 sps:$4 sm:$0xff]   ;;  %s7851_s16 = scalar_lea.vmem %s7817_s4, %s6656_s29  ;;  %s7855_s0 = scalar_lea.vmem %s7824_s11, %s6656_s29 }
 0x11f   : > { %1188 = vmatprep.subr.bf16.mxu0 %v6297_v42  ;;  %v6300_v60 = vld [vmem:[%s6677_s27 + $0x94] ss:$12 sps:$4 sm:$0xff]   ;;  %v6303_v62 = vld [vmem:[%s6677_s27 + $0x90] ss:$12 sps:$4 sm:$0xff]   ;;  %5949 = vmatprep.subr.bf16.mxu1 %v6302_v61  ;;  %v6306_v0 = vld [vmem:[%s6677_s27 + $0x98] ss:$12 sps:$4 sm:$0xff]  }
 0x120   : > { %v938_v38 = vld [vmem:[#allocation2] sm:$0xff]  ;;  %v940_v39 = vld [vmem:[#allocation2 + $0x10] sm:$0xff]  ;;  %1189 = vmatpush1.bf16.msra.mxu0 %v6299_v43  ;;  %5950 = vmatpush3.bf16.msra.mxu1 %v6302_v61  ;;  %v6304_v63 = vld [vmem:[%s6677_s27 + $0x7c] ss:$12 sps:$4 sm:$0xff]   ;;  %v6538_v13 = vmov 0   ;;  %s7852_s17 = sld [smem:[#allocation9_spill]] }
 0x121   : > { %944 = vadd.xlane.f32.xlu0 %v938_v38  ;;  %948 = vadd.xlane.f32.xlu1 %v940_v39  ;;  %v6307_v1 = vld [vmem:[%s6677_s27 + $0x78] ss:$12 sps:$4 sm:$0xff]   ;;  %v6310_v3 = vld [vmem:[%s6677_s27 + $0x80] ss:$12 sps:$4 sm:$0xff]   ;;  %v6314_v6 = vld [vmem:[%s6677_s27 + $0x68] ss:$12 sps:$4 sm:$0xff]  }
 0x122   : > { %1190 = vmatprep.subr.bf16.mxu0 %v6300_v60  ;;  %5951 = vmatprep.subr.bf16.mxu1 %v6306_v0  ;;  %v6308_v2 = vld [vmem:[%s6677_s27 + $0x64] ss:$12 sps:$4 sm:$0xff]   ;;  %v6311_v4 = vld [vmem:[%s6677_s27 + $0x60] ss:$12 sps:$4 sm:$0xff]   ;;  %v6315_v7 = vld [vmem:[%s6677_s27 + $0x48] ss:$12 sps:$4 sm:$0xff]  }
 0x123   : > { %v6312_v5 = vld [vmem:[%s6677_s27 + $0x4c] ss:$12 sps:$4 sm:$0xff]   ;;  %v6316_v8 = vld [vmem:[%s6677_s27 + $0x34] ss:$12 sps:$4 sm:$0xff]   ;;  %v6318_v9 = vld [vmem:[%s6677_s27 + $0x50] ss:$12 sps:$4 sm:$0xff]   ;;  %1220 = vmatprep.mubr.bf16.mxu0 %v6538_v13 }
 0x124   : > { %v939_v40 = vld [vmem:[#allocation2 + $0x8] sm:$0xff]  ;;  %v941_v41 = vld [vmem:[#allocation2 + $0x18] sm:$0xff]  ;;  %1191 = vmatpush1.bf16.msra.mxu0 %v6303_v62  ;;  %5952 = vmatpush3.bf16.msra.mxu1 %v6306_v0  ;;  %v6324_v15 = vld [vmem:[%s6677_s27 + $0x4] ss:$12 sps:$4 sm:$0xff]   ;;  %s6539_s30 = smov 64   ;;  %s6540_s19 = smov 96  }
 0x125   : > { %946 = vadd.xlane.f32.xlu0 %v939_v40  ;;  %950 = vadd.xlane.f32.xlu1 %v941_v41  ;;  %v6319_v10 = vld [vmem:[%s6677_s27 + $0x30] ss:$12 sps:$4 sm:$0xff]   ;;  %v6322_v12 = vld [vmem:[%s6677_s27 + $0x38] ss:$12 sps:$4 sm:$0xff]   ;;  %v6326_v16 = vld [vmem:[%s6677_s27 + $0x20] ss:$12 sps:$4 sm:$0xff]  }
 0x126   : > { %1192 = vmatprep.subr.bf16.mxu0 %v6304_v63  ;;  %5953 = vmatprep.subr.bf16.mxu1 %v6310_v3  ;;  %v6320_v11 = vld [vmem:[%s6677_s27 + $0x1c] ss:$12 sps:$4 sm:$0xff]   ;;  %v6323_v14 = vld [vmem:[%s6677_s27 + $0x18] ss:$12 sps:$4 sm:$0xff]   ;;  %v6327_v17 = vld [vmem:[%s6677_s27] ss:$12 sps:$4 sm:$0xff]   ;;  %s7853_s18 = scalar_lea.vmem %s7852_s17, %s6656_s29 }
 0x127   : > { %v6328_v18 = vld [vmem:[%s6677_s27 + $0x8] ss:$12 sps:$4 sm:$0xff]   ;;  %v5709_v33 = vld [vmem:[%s7851_s16] ss:$0 sm:$0xff]  ;;  %vm6545_vm1 = vmmov 0   ;;  %vm3330_vm2 = vcmask 261120   ;;  %s7854_s27 = scalar_lea.vmem %s7822_s9, %s6656_s29 }
 0x128   : > { %1193 = vmatpush1.bf16.msra.mxu0 %v6307_v1  ;;  %5954 = vmatpush3.bf16.msra.mxu1 %v6310_v3  ;;  %vm3683_vm3 = vcmask 130048   ;;  %vm4816_vm4 = vcmask 523264   ;;  %vm4821_vm5 = vcmask 785408   ;;  %p5851_p5 = scmp.ne.s32.totalorder %s6650_s28, 1 }
 0x129   : > { %1194 = vmatprep.subr.bf16.mxu0 %v6308_v2  ;;  %5955 = vmatprep.subr.bf16.mxu1 %v6314_v6 }
 0x12c   : > { %1195 = vmatpush1.bf16.msra.mxu0 %v6311_v4  ;;  %5956 = vmatpush3.bf16.msra.mxu1 %v6314_v6 }
 0x12d   : > { %1196 = vmatprep.subr.bf16.mxu0 %v6312_v5  ;;  %5957 = vmatprep.subr.bf16.mxu1 %v6318_v9 }
 0x130   : > { %1197 = vmatpush1.bf16.msra.mxu0 %v6315_v7  ;;  %5958 = vmatpush3.bf16.msra.mxu1 %v6318_v9 }
 0x131   : > { %1198 = vmatprep.subr.bf16.mxu0 %v6316_v8  ;;  %5959 = vmatprep.subr.bf16.mxu1 %v6322_v12 }
 0x134   : > { %1199 = vmatpush1.bf16.msra.mxu0 %v6319_v10  ;;  %5960 = vmatpush3.bf16.msra.mxu1 %v6322_v12 }
 0x135   : > { %1200 = vmatprep.subr.bf16.mxu0 %v6320_v11  ;;  %5961 = vmatprep.subr.bf16.mxu1 %v6326_v16 }
 0x138   : > { %1201 = vmatpush1.bf16.msra.mxu0 %v6323_v14  ;;  %5962 = vmatpush3.bf16.msra.mxu1 %v6326_v16 }
 0x139   : > { %1202 = vmatprep.subr.bf16.mxu0 %v6324_v15  ;;  %5963 = vmatprep.subr.bf16.mxu1 %v6328_v18 }
 0x13c   : > { %1203 = vmatpush1.bf16.msra.mxu0 %v6327_v17  ;;  %5964 = vmatpush3.bf16.msra.mxu1 %v6328_v18  ;;  %v6542_v17 = vmov 1983009808  }
 0x13d   : > { %v1413_v18 = vunpack.c.l.s4 %v6542_v17 }
 0x1aa   : > { %v945_v44 = vpop.xlane.xlu0 %944  ;;  %v949_v45 = vpop.xlane.xlu1 %948 }
 0x1ab   : > { %v953_v46 = vmul.f32 0.0078125, %v945_v44  ;;  %v955_v47 = vmul.f32 0.0078125, %v949_v45 }
 0x1ad   : > { %v6783_v48 = vsub.f32 %v938_v38, %v953_v46  ;;  %v6785_v49 = vsub.f32 %v940_v39, %v955_v47  ;;  %v5710_v38 = vld [vmem:[%s7853_s18] ss:$0 sm:$0xff] }
 0x1ae   : > { %v947_v50 = vpop.xlane.xlu0 %946  ;;  %v951_v51 = vpop.xlane.xlu1 %950 }
 0x1af   : > { %v954_v52 = vmul.f32 0.0078125, %v947_v50  ;;  %v961_v53 = vmul.f32 %v6783_v48, %v6783_v48  ;;  %v956_v54 = vmul.f32 0.0078125, %v951_v51  ;;  %v963_v55 = vmul.f32 %v6785_v49, %v6785_v49 }
 0x1b1   : > { %965 = vadd.xlane.f32.xlu0 %v961_v53  ;;  %v6791_v56 = vsub.f32 %v939_v40, %v954_v52  ;;  %v6793_v57 = vsub.f32 %v941_v41, %v956_v54  ;;  %v1043_v54 = vld [vmem:[%s6686_s21] sm:$0x7]  ;;  %s6541_s21 = smov 32  }
 0x1b3   : > { %v962_v58 = vmul.f32 %v6791_v56, %v6791_v56  ;;  %v964_v59 = vmul.f32 %v6793_v57, %v6793_v57 }
 0x1b5   : > { %969 = vadd.xlane.f32.xlu0 %v963_v55  ;;  %967 = vadd.xlane.f32.xlu1 %v962_v58 }
 0x1b9   : > { %971 = vadd.xlane.f32.xlu1 %v964_v59 }
 0x23a   : > { %v966_v19 = vpop.xlane.xlu0 %965 }
 0x23b   : > { %v973_v20 = vmul.f32 0.0078125, %v966_v19  ;;  %v1414_v19 = vunpack.c.0.s8 %v1413_v18 }
 0x23d   : > { %v977_v21 = vadd.f32 1e-06, %v973_v20 }
 0x23e   : > { %v968_v22 = vpop.xlane.xlu1 %967  ;;  %v970_v23 = vpop.xlane.xlu0 %969 }
 0x23f   : > { %6377 = vrsqrt.f32 %v977_v21  ;;  %v974_v24 = vmul.f32 0.0078125, %v968_v22  ;;  %v975_v25 = vmul.f32 0.0078125, %v970_v23  ;;  %v6543_v21 = vmov 1934713408  }
 0x240   : > { %v1477_v22 = vunpack.c.l.s4 %v6543_v21 }
 0x241   : > { %v978_v26 = vadd.f32 1e-06, %v974_v24  ;;  %v979_v27 = vadd.f32 1e-06, %v975_v25 }
 0x242   : > { %v972_v28 = vpop.xlane.xlu1 %971 }
 0x243   : > { %6379 = vrsqrt.f32 %v978_v26  ;;  %v976_v29 = vmul.f32 0.0078125, %v972_v28 }
 0x244   : > { %6381 = vrsqrt.f32 %v979_v27 }
 0x245   : > { %v980_v30 = vadd.f32 1e-06, %v976_v29 }
 0x247   : > { %6383 = vrsqrt.f32 %v980_v30  ;;  %v1478_v30 = vunpack.c.0.s8 %v1477_v22 }
 0x24c   : > { %v6378_v31 = vpop.eup %6377 }
 0x24d   : > { %v985_v32 = vmul.f32 %v6378_v31, %v6783_v48 }
 0x24f   : > { %v995_v37 = vmul.f32 %v5709_v33, %v985_v32 }
 0x250   : > { %v6380_v34 = vpop.eup %6379 }
 0x251   : > { %v6382_v35 = vpop.eup %6381  ;;  %v986_v36 = vmul.f32 %v6380_v34, %v6791_v56  ;;  %v1005_v42 = vadd.f32 %v5710_v38, %v995_v37 }
 0x252   : > { %v987_v39 = vmul.f32 %v6382_v35, %v6785_v49  ;;  %v1045_v49 = vlaneseq }
 0x253   : > { %v996_v40 = vmul.f32 %v5709_v33, %v986_v36 }
 0x254   : > { %v6384_v41 = vpop.eup %6383  ;;  %v997_v45 = vmul.f32 %v5709_v33, %v987_v39  ;;  %v6837_v52 = vshrl.u32 %v1045_v49, 7 }
 0x255   : > { %v1006_v43 = vadd.f32 %v5710_v38, %v996_v40  ;;  %v988_v44 = vmul.f32 %v6384_v41, %v6793_v57 }
 0x256   : > { %v1007_v48 = vadd.f32 %v5710_v38, %v997_v45  ;;  %v1051_v53 = vsub.s32 1, %v6837_v52  ;;  %v1047_v58 = vsub.s32 0, %v6837_v52  ;;  %v1055_v60 = vsub.s32 2, %v6837_v52 }
 0x257   : > { %v1009_v46 = vpack.c.bf16 %v1006_v43, %v1005_v42  ;;  %v998_v47 = vmul.f32 %v5709_v33, %v988_v44  ;;  %v6921_v23 = vsub.s32 %v1414_v19, %v6837_v52  ;;  %v6930_v36 = vsub.s32 %v1478_v30, %v6837_v52 }
 0x258   : > { %v1052_v55 = vrot.slane %v1043_v54, %v1051_v53  ;;  %v1048_v1 = vrot.slane %v1043_v54, %v1047_v58  ;;  %v6857_v2 = vrot.slane %v1043_v54, %v1055_v60 }
 0x259   : > { %1221 = vmatmul.mubr.bf16.vlgmr.msra.gmra.mxu0 %v1009_v46  ;;  %5965 = vmatprep.mubr.bf16.mxu1 %v1009_v46  ;;  %v1008_v50 = vadd.f32 %v5710_v38, %v998_v47 }
 0x25a   : > { %1230 = vmatprep.mubr.bf16.mxu0 %v6538_v13 }
 0x25b   : > { %v1010_v51 = vpack.c.bf16 %v1008_v50, %v1007_v48 }
 0x25d   : > { %5966 = vmatmul.mubr.bf16.vlgmr.msra.gmra.mxu1 %v1010_v51 }
 0x261   : > { %1231 = vmatmul.mubr.bf16.gmra.mxu0 %v1010_v51 }
 0x319   : > { %v1222_v56 = vpop.f32.mrf.mxu0 }
 0x31a   : > { %v6868_v7 = vadd.f32 %v1222_v56, %v1048_v1 }
 0x31b   : > { %v1224_v57 = vpop.f32.mrf.mxu0 }
 0x31c   : > { %v6844_v59 = vadd.f32 %v1224_v57, %v1052_v55 }
 0x31d   : > { %v1226_v61 = vpop.f32.mrf.mxu0  ;;  %v6847_v62 = vpop.f32.mrf.mxu1 }
 0x31e   : > { %1346 = vrot.lane.b32.xlu1 %v6844_v59, %s6539_s30  ;;  %1334 = vrot.lane.b32.xlu0 %v6844_v59, %s6540_s19  ;;  %v6894_v14 = vadd.f32 %v1226_v61, %v1048_v1 }
 0x31f   : > { %v1228_v63 = vpop.f32.mrf.mxu0  ;;  %v6853_v0 = vpop.f32.mrf.mxu1 }
 0x320   : > { %v6859_v3 = vadd.f32 %v1228_v63, %v1052_v55 }
 0x321   : > { %v1232_v4 = vpop.f32.mrf.mxu0  ;;  %v5968_v5 = vpop.f32.mrf.mxu1 }
 0x322   : > { %v6862_v6 = vadd.f32 %v5968_v5, %v6857_v2  ;;  %1358 = vrot.lane.b32.xlu1 %v6844_v59, %s6541_s21  ;;  %1348 = vrot.lane.b32.xlu0 %v6859_v3, %s6539_s30  ;;  %v6900_v15 = vadd.f32 %v1232_v4, %v1048_v1 }
 0x323   : > { %v1234_v8 = vpop.f32.mrf.mxu0 }
 0x324   : > { %v6874_v9 = vadd.f32 %v1234_v8, %v1052_v55 }
 0x325   : > { %v1236_v10 = vpop.f32.mrf.mxu0 }
 0x326   : > { %1336 = vrot.lane.b32.xlu1 %v6859_v3, %s6540_s19  ;;  %1294 = vrot.lane.b32.xlu0 %v6868_v7, %s6540_s19  ;;  %v6910_v16 = vadd.f32 %v1236_v10, %v1048_v1 }
 0x327   : > { %v1238_v11 = vpop.f32.mrf.mxu0 }
 0x328   : > { %v6884_v12 = vadd.f32 %v1238_v11, %v1052_v55 }
 0x32a   : > { %1360 = vrot.lane.b32.xlu1 %v6859_v3, %s6541_s21  ;;  %1338 = vrot.lane.b32.xlu0 %v6874_v9, %s6540_s19 }
 0x32e   : > { %1350 = vrot.lane.b32.xlu1 %v6874_v9, %s6539_s30  ;;  %1362 = vrot.lane.b32.xlu0 %v6874_v9, %s6541_s21 }
 0x332   : > { %1340 = vrot.lane.b32.xlu1 %v6884_v12, %s6540_s19  ;;  %1352 = vrot.lane.b32.xlu0 %v6884_v12, %s6539_s30 }
 0x336   : > { %1364 = vrot.lane.b32.xlu1 %v6884_v12, %s6541_s21  ;;  %1306 = vrot.lane.b32.xlu0 %v6868_v7, %s6539_s30 }
 0x33a   : > { %1296 = vrot.lane.b32.xlu1 %v6894_v14, %s6540_s19  ;;  %1318 = vrot.lane.b32.xlu0 %v6868_v7, %s6541_s21 }
 0x33e   : > { %1308 = vrot.lane.b32.xlu1 %v6894_v14, %s6539_s30  ;;  %1298 = vrot.lane.b32.xlu0 %v6900_v15, %s6540_s19 }
 0x342   : > { %1320 = vrot.lane.b32.xlu1 %v6894_v14, %s6541_s21  ;;  %1310 = vrot.lane.b32.xlu0 %v6900_v15, %s6539_s30 }
 0x346   : > { %1300 = vrot.lane.b32.xlu1 %v6910_v16, %s6540_s19  ;;  %1322 = vrot.lane.b32.xlu0 %v6900_v15, %s6541_s21 }
 0x34a   : > { %1312 = vrot.lane.b32.xlu1 %v6910_v16, %s6539_s30 }
 0x34e   : > { %1324 = vrot.lane.b32.xlu1 %v6910_v16, %s6541_s21 }
 0x390   : > { %v1347_v20 = vpop.permute.xlu1 %1346  ;;  %v1335_v24 = vpop.permute.xlu0 %1334 }
 0x391   : > { %v1442_v26 = vcombine.low %v6844_v59, %v1347_v20  ;;  %v1443_v27 = vcombine.high %v6844_v59, %v1347_v20 }
 0x393   : > { %v1450_v34 = vrot.slane %v1442_v26, %v6921_v23  ;;  %v1457_v35 = vrot.slane %v1443_v27, %v6921_v23 }
 0x394   : > { %v1359_v25 = vpop.permute.xlu1 %1358  ;;  %v1349_v42 = vpop.permute.xlu0 %1348 }
 0x395   : > { %v1458_v28 = vcombine.low %v1335_v24, %v1359_v25  ;;  %v1459_v29 = vcombine.high %v1335_v24, %v1359_v25  ;;  %v1646_v50 = vcombine.low %v6859_v3, %v1349_v42  ;;  %v1647_v51 = vcombine.high %v6859_v3, %v1349_v42 }
 0x397   : > { %v1466_v31 = vrot.slane %v1458_v28, %v6921_v23  ;;  %v1473_v32 = vrot.slane %v1459_v29, %v6921_v23  ;;  %v1654_v60 = vrot.slane %v1646_v50, %v6921_v23  ;;  %v1661_v61 = vrot.slane %v1647_v51, %v6921_v23 }
 0x398   : > { %v1337_v33 = vpop.permute.xlu1 %1336  ;;  %v6942_v63 = vpop.permute.xlu0 %1294 }
 0x399   : > { %v1506_v37 = vcombine.low %v1450_v34, %v1466_v31  ;;  %v1507_v38 = vcombine.high %v1450_v34, %v1466_v31  ;;  %v1522_v39 = vcombine.low %v1457_v35, %v1473_v32  ;;  %v1523_v40 = vcombine.high %v1457_v35, %v1473_v32 }
 0x39b   : > { %v1514_v45 = vrot.slane %v1506_v37, %v6930_v36  ;;  %v1521_v46 = vrot.slane %v1507_v38, %v6930_v36  ;;  %v1530_v47 = vrot.slane %v1522_v39, %v6930_v36  ;;  %v1537_v48 = vrot.slane %v1523_v40, %v6930_v36 }
 0x39c   : > { %v1361_v41 = vpop.permute.xlu1 %1360  ;;  %v1339_v24 = vpop.permute.xlu0 %1338 }
 0x39d   : > { %v1662_v43 = vcombine.low %v1337_v33, %v1361_v41  ;;  %v1663_v44 = vcombine.high %v1337_v33, %v1361_v41  ;;  %v5736_v55 = vcombine.low %v1514_v45, %v1521_v46  ;;  %v5738_v56 = vcombine.high %v1514_v45, %v1521_v46 }
 0x39e   : > { %v5740_v57 = vcombine.low %v1530_v47, %v1537_v48  ;;  %v5742_v59 = vcombine.high %v1530_v47, %v1537_v48 }
 0x39f   : > { %v1670_v49 = vrot.slane %v1662_v43, %v6921_v23  ;;  %v1677_v54 = vrot.slane %v1663_v44, %v6921_v23  ;;  %v2241_v3 = vrot.slane %v5736_v55, %v6921_v23  ;;  %v2257_v10 = vrot.slane %v5738_v56, %v6921_v23 }
 0x3a0   : > { %v2273_v11 = vrot.slane %v5740_v57, %v6921_v23  ;;  %v2289_v17 = vrot.slane %v5742_v59, %v6921_v23  ;;  %v1351_v18 = vpop.permute.xlu1 %1350  ;;  %v1363_v39 = vpop.permute.xlu0 %1362 }
 0x3a1   : > { %v1710_v1 = vcombine.low %v1654_v60, %v1670_v49  ;;  %v1711_v4 = vcombine.high %v1654_v60, %v1670_v49  ;;  %v1726_v5 = vcombine.low %v1661_v61, %v1677_v54  ;;  %v1727_v8 = vcombine.high %v1661_v61, %v1677_v54 }
 0x3a2   : > { %v2307_v25 = vcombine.high %v2241_v3, %v2257_v10  ;;  %v2339_v26 = vcombine.high %v2273_v11, %v2289_v17  ;;  %v2306_v37 = vcombine.low %v2241_v3, %v2257_v10  ;;  %v2338_v38 = vcombine.low %v2273_v11, %v2289_v17 }
 0x3a3   : > { %v1718_v19 = vrot.slane %v1710_v1, %v6930_v36  ;;  %v1725_v20 = vrot.slane %v1711_v4, %v6930_v36  ;;  %v1734_v21 = vrot.slane %v1726_v5, %v6930_v36  ;;  %v1741_v22 = vrot.slane %v1727_v8, %v6930_v36 }
 0x3a4   : > { %v2321_v27 = vrot.slane %v2307_v25, %v6930_v36  ;;  %v2353_v28 = vrot.slane %v2339_v26, %v6930_v36  ;;  %v1341_v33 = vpop.permute.xlu1 %1340  ;;  %v2314_v41 = vrot.slane %v2306_v37, %v6930_v36  ;;  %v2346_v42 = vrot.slane %v2338_v38, %v6930_v36  ;;  %v1353_v57 = vpop.permute.xlu0 %1352 }
 0x3a5   : > { %v5744_v29 = vcombine.low %v1718_v19, %v1725_v20  ;;  %v5746_v30 = vcombine.high %v1718_v19, %v1725_v20  ;;  %v5748_v31 = vcombine.low %v1734_v21, %v1741_v22  ;;  %v5750_v32 = vcombine.high %v1734_v21, %v1741_v22 }
 0x3a6   : > { %v2360_v34 = vcombine.low %v2321_v27, %v2353_v28  ;;  %v2361_v35 = vcombine.high %v2321_v27, %v2353_v28  ;;  %v1850_v47 = vcombine.low %v6874_v9, %v1351_v18  ;;  %v1866_v48 = vcombine.low %v1339_v24, %v1363_v39 }
 0x3a7   : > { %v2377_v43 = vrot.slane %v5744_v29, %v6921_v23  ;;  %v2393_v44 = vrot.slane %v5746_v30, %v6921_v23  ;;  %v2409_v45 = vrot.slane %v5748_v31, %v6921_v23  ;;  %v2425_v46 = vrot.slane %v5750_v32, %v6921_v23 }
 0x3a8   : > { %v6195_v40 = vpack.i.bf16 %v2361_v35, %v2360_v34  ;;  %v2358_v50 = vcombine.low %v2314_v41, %v2346_v42  ;;  %v2359_v51 = vcombine.high %v2314_v41, %v2346_v42  ;;  %v1851_v49 = vcombine.high %v6874_v9, %v1351_v18  ;;  %v1365_v55 = vpop.permute.xlu1 %1364 }
 0x3a9   : > { %v1867_v54 = vcombine.high %v1339_v24, %v1363_v39  ;;  %v2443_v59 = vcombine.high %v2377_v43, %v2393_v44  ;;  %v2475_v60 = vcombine.high %v2409_v45, %v2425_v46  ;;  %v1858_v61 = vrot.slane %v1850_v47, %v6921_v23 }
 0x3aa   : > { %6196 = vxpose.xlu1.b32.start [1/2] (short) (narrow) %v6195_v40, 32  ;;  %v6171_v56 = vpack.i.bf16 %v2359_v51, %v2358_v50  ;;  %v1874_v1 = vrot.slane %v1866_v48, %v6921_v23  ;;  %v2070_v4 = vcombine.low %v1341_v33, %v1365_v55  ;;  %v1865_v3 = vrot.slane %v1851_v49, %v6921_v23 }
 0x3ab   : > { %v2457_v5 = vrot.slane %v2443_v59, %v6930_v36  ;;  %v2489_v8 = vrot.slane %v2475_v60, %v6930_v36  ;;  %v1881_v9 = vrot.slane %v1867_v54, %v6921_v23  ;;  %v2054_v10 = vcombine.low %v6884_v12, %v1353_v57 }
 0x3ac   : > { %6172 = vxpose.xlu0.b32.start [1/2] (short) (narrow) %v6171_v56, 32  ;;  %v2442_v18 = vcombine.low %v2377_v43, %v2393_v44  ;;  %v2474_v19 = vcombine.low %v2409_v45, %v2425_v46  ;;  %v1914_v20 = vcombine.low %v1858_v61, %v1874_v1  ;;  %v1915_v21 = vcombine.high %v1858_v61, %v1874_v1 }
 0x3ad   : > { %v2496_v11 = vcombine.low %v2457_v5, %v2489_v8  ;;  %v2497_v17 = vcombine.high %v2457_v5, %v2489_v8  ;;  %v2071_v22 = vcombine.high %v1341_v33, %v1365_v55  ;;  %v2078_v24 = vrot.slane %v2070_v4, %v6921_v23 }
 0x3ae   : > { %v2450_v26 = vrot.slane %v2442_v18, %v6930_v36  ;;  %v2482_v27 = vrot.slane %v2474_v19, %v6930_v36  ;;  %v1930_v28 = vcombine.low %v1865_v3, %v1881_v9  ;;  %v2055_v29 = vcombine.high %v6884_v12, %v1353_v57 }
 0x3af   : > { %v6197_v25 = vpack.i.bf16 %v2497_v17, %v2496_v11  ;;  %v1931_v30 = vcombine.high %v1865_v3, %v1881_v9  ;;  %v2062_v31 = vrot.slane %v2054_v10, %v6921_v23  ;;  %v1922_v35 = vrot.slane %v1914_v20, %v6930_v36 }
 0x3b0   : > { %v2494_v32 = vcombine.low %v2450_v26, %v2482_v27  ;;  %v2495_v34 = vcombine.high %v2450_v26, %v2482_v27  ;;  %v2085_v33 = vrot.slane %v2071_v22, %v6921_v23  ;;  %v1929_v37 = vrot.slane %v1915_v21, %v6930_v36 }
 0x3b1   : > { %6198 = vxpose.xlu1.b32.end [2/2] (short) (narrow) %v6197_v25, 32  ;;  %v2118_v38 = vcombine.low %v2062_v31, %v2078_v24  ;;  %v2119_v39 = vcombine.high %v2062_v31, %v2078_v24  ;;  %v2069_v41 = vrot.slane %v2055_v29, %v6921_v23  ;;  %v1938_v42 = vrot.slane %v1930_v28, %v6930_v36 }
 0x3b2   : > { %v6173_v40 = vpack.i.bf16 %v2495_v34, %v2494_v32  ;;  %v1945_v12 = vrot.slane %v1931_v30, %v6930_v36  ;;  %v5756_v45 = vcombine.low %v1922_v35, %v1929_v37  ;;  %v5758_v46 = vcombine.high %v1922_v35, %v1929_v37 }
 0x3b3   : > { %v2134_v43 = vcombine.low %v2069_v41, %v2085_v33  ;;  %v2135_v44 = vcombine.high %v2069_v41, %v2085_v33  ;;  %v2126_v47 = vrot.slane %v2118_v38, %v6930_v36  ;;  %v2133_v48 = vrot.slane %v2119_v39, %v6930_v36 }
 0x3b4   : > { %6174 = vxpose.xlu0.b32.end [2/2] (short) (narrow) %v6173_v40, 32  ;;  %v5760_v50 = vcombine.low %v1938_v42, %v1945_v12  ;;  %v5762_v51 = vcombine.high %v1938_v42, %v1945_v12  ;;  %v2649_v57 = vrot.slane %v5756_v45, %v6921_v23  ;;  %v2665_v59 = vrot.slane %v5758_v46, %v6921_v23  ;;  %v1278_v46 = vpop.f32.mrf.mxu1 }
 0x3b5   : > { %v2142_v49 = vrot.slane %v2134_v43, %v6930_v36  ;;  %v2149_v54 = vrot.slane %v2135_v44, %v6930_v36  ;;  %v5764_v55 = vcombine.low %v2126_v47, %v2133_v48  ;;  %v5766_v56 = vcombine.high %v2126_v47, %v2133_v48  ;;  %v1297_v48 = vpop.permute.xlu1 %1296 }
 0x3b6   : > { %v2681_v60 = vrot.slane %v5760_v50, %v6921_v23  ;;  %v2697_v8 = vrot.slane %v5762_v51, %v6921_v23  ;;  %v2714_v3 = vcombine.low %v2649_v57, %v2665_v59  ;;  %v2715_v27 = vcombine.high %v2649_v57, %v2665_v59  ;;  %v1307_v50 = vpop.permute.xlu0 %1306 }
 0x3b7   : > { %v5768_v61 = vcombine.low %v2142_v49, %v2149_v54  ;;  %v5770_v1 = vcombine.high %v2142_v49, %v2149_v54  ;;  %v2785_v4 = vrot.slane %v5764_v55, %v6921_v23  ;;  %v2801_v5 = vrot.slane %v5766_v56, %v6921_v23 }
 0x3b8   : > { %v2722_v9 = vrot.slane %v2714_v3, %v6930_v36  ;;  %v2746_v10 = vcombine.low %v2681_v60, %v2697_v8  ;;  %v2747_v28 = vcombine.high %v2681_v60, %v2697_v8  ;;  %v6544_v31 = vmov 0.0  }
 0x3b9   : > { %v2817_v11 = vrot.slane %v5768_v61, %v6921_v23  ;;  %v2833_v17 = vrot.slane %v5770_v1, %v6921_v23  ;;  %v2850_v19 = vcombine.low %v2785_v4, %v2801_v5  ;;  %5969 = vmatprep.subr.bf16.mxu0 %v6544_v31  ;;  %5985 = vmatprep.subr.bf16.mxu1 %v6544_v31  ;;  %v1309_v51 = vpop.permute.xlu1 %1308 }
 0x3ba   : > { %v2754_v18 = vrot.slane %v2746_v10, %v6930_v36  ;;  %v2729_v34 = vrot.slane %v2715_v27, %v6930_v36  ;;  %v2761_v35 = vrot.slane %v2747_v28, %v6930_v36  ;;  %v2851_v33 = vcombine.high %v2785_v4, %v2801_v5  ;;  %5973 = vmatprep.mubr.msk.bf16.mxu0 %vm6545_vm1, %v6544_v31  ;;  %v1319_v49 = vpop.permute.xlu0 %1318 }
 0x3bb   : > { %v2858_v22 = vrot.slane %v2850_v19, %v6930_v36  ;;  %v2882_v24 = vcombine.low %v2817_v11, %v2833_v17  ;;  %v2883_v37 = vcombine.high %v2817_v11, %v2833_v17  ;;  %5989 = vmatprep.mubr.msk.bf16.mxu1 %vm6545_vm1, %v6544_v31  ;;  %v7008_v42 = vadd.f32 %v6853_v0, %v6857_v2 }
 0x3bc   : > { %v2766_v20 = vcombine.low %v2722_v9, %v2754_v18  ;;  %v2767_v21 = vcombine.high %v2722_v9, %v2754_v18  ;;  %v2768_v38 = vcombine.low %v2729_v34, %v2761_v35  ;;  %v2769_v39 = vcombine.high %v2729_v34, %v2761_v35 }
 0x3bd   : > { %v2890_v26 = vrot.slane %v2882_v24, %v6930_v36  ;;  %v2865_v40 = vrot.slane %v2851_v33, %v6930_v36  ;;  %v2897_v41 = vrot.slane %v2883_v37, %v6930_v36  ;;  %v7015_v47 = vadd.f32 %v1278_v46, %v6857_v2  ;;  %v1321_v54 = vpop.permute.xlu1 %1320 }
 0x3be   : > { %v6219_v25 = vpack.i.bf16 %v2767_v21, %v2766_v20  ;;  %v6243_v12 = vpack.i.bf16 %v2769_v39, %v2768_v38  ;;  %v7023_v0 = vadd.f32 %v6847_v62, %v6857_v2  ;;  %v1426_v55 = vcombine.low %v6942_v63, %v1319_v49  ;;  %v7041_v9 = vpop.permute.xlu0 %1298 }
 0x3bf   : > { %v2902_v29 = vcombine.low %v2858_v22, %v2890_v26  ;;  %v2903_v30 = vcombine.high %v2858_v22, %v2890_v26  ;;  %v2904_v43 = vcombine.low %v2865_v40, %v2897_v41  ;;  %v2905_v44 = vcombine.high %v2865_v40, %v2897_v41 }
 0x3c0   : > { %6220 = vxpose.xlu0.b32.start [1/2] (short) (narrow) %v6219_v25, 32  ;;  %v1427_v56 = vcombine.high %v6942_v63, %v1319_v49  ;;  %v1410_v62 = vcombine.low %v6868_v7, %v1307_v50  ;;  %v1411_v2 = vcombine.high %v6868_v7, %v1307_v50  ;;  %v1434_v57 = vrot.slane %v1426_v55, %v6921_v23 }
 0x3c1   : > { %v6221_v32 = vpack.i.bf16 %v2903_v30, %v2902_v29  ;;  %v6245_v45 = vpack.i.bf16 %v2905_v44, %v2904_v43  ;;  %v7036_v59 = vpop.permute.xlu1 %1300  ;;  %v1630_v4 = vcombine.low %v1297_v48, %v1321_v54  ;;  %v1631_v5 = vcombine.high %v1297_v48, %v1321_v54 }
 0x3c2   : > { %v1441_v60 = vrot.slane %v1427_v56, %v6921_v23  ;;  %v1418_v61 = vrot.slane %v1410_v62, %v6921_v23  ;;  %v1425_v1 = vrot.slane %v1411_v2, %v6921_v23  ;;  %v1614_v7 = vcombine.low %v6894_v14, %v1309_v51  ;;  %v7055_v27 = vpop.permute.xlu0 %1310 }
 0x3c3   : > { %v1615_v11 = vcombine.high %v6894_v14, %v1309_v51  ;;  %v1638_v18 = vrot.slane %v1630_v4, %v6921_v23  ;;  %v1645_v19 = vrot.slane %v1631_v5, %v6921_v23 }
 0x3c4   : > { %6222 = vxpose.xlu0.b32.end [2/2] (short) (narrow) %v6221_v32, 32  ;;  %v1474_v8 = vcombine.low %v1418_v61, %v1434_v57  ;;  %v1475_v3 = vcombine.high %v1418_v61, %v1434_v57  ;;  %v1490_v63 = vcombine.low %v1425_v1, %v1441_v60  ;;  %v1491_v10 = vcombine.high %v1425_v1, %v1441_v60 }
 0x3c5   : > { %v7045_v17 = vpop.permute.xlu1 %1312  ;;  %v1622_v25 = vrot.slane %v1614_v7, %v6921_v23  ;;  %v1629_v26 = vrot.slane %v1615_v11, %v6921_v23  ;;  %v1818_v61 = vcombine.low %v6900_v15, %v7055_v27 }
 0x3c6   : > { %v1482_v20 = vrot.slane %v1474_v8, %v6930_v36  ;;  %v1489_v21 = vrot.slane %v1475_v3, %v6930_v36  ;;  %v1498_v22 = vrot.slane %v1490_v63, %v6930_v36  ;;  %v1505_v24 = vrot.slane %v1491_v10, %v6930_v36  ;;  %v1323_v44 = vpop.permute.xlu0 %1322 }
 0x3c7   : > { %v1678_v14 = vcombine.low %v1622_v25, %v1638_v18  ;;  %v1679_v28 = vcombine.high %v1622_v25, %v1638_v18  ;;  %v1694_v29 = vcombine.low %v1629_v26, %v1645_v19  ;;  %v1695_v30 = vcombine.high %v1629_v26, %v1645_v19 }
 0x3c8   : > { %v5735_v32 = vcombine.low %v1482_v20, %v1489_v21  ;;  %v5737_v34 = vcombine.high %v1482_v20, %v1489_v21  ;;  %v5739_v33 = vcombine.low %v1498_v22, %v1505_v24  ;;  %v5741_v37 = vcombine.high %v1498_v22, %v1505_v24 }
 0x3c9   : > { %v7057_v35 = vpop.permute.xlu1 %1324  ;;  %v1686_v38 = vrot.slane %v1678_v14, %v6930_v36  ;;  %v1693_v39 = vrot.slane %v1679_v28, %v6930_v36  ;;  %v1702_v40 = vrot.slane %v1694_v29, %v6930_v36  ;;  %v1709_v41 = vrot.slane %v1695_v30, %v6930_v36 }
 0x3ca   : > { %v2250_v43 = vrot.slane %v5737_v34, %v6921_v23  ;;  %v2266_v46 = vrot.slane %v5739_v33, %v6921_v23  ;;  %v2282_v48 = vrot.slane %v5741_v37, %v6921_v23  ;;  %v1819_v21 = vcombine.high %v6900_v15, %v7055_v27 }
 0x3cb   : > { %v5743_v50 = vcombine.low %v1686_v38, %v1693_v39  ;;  %v5745_v51 = vcombine.high %v1686_v38, %v1693_v39  ;;  %v5747_v49 = vcombine.low %v1702_v40, %v1709_v41  ;;  %v5749_v54 = vcombine.high %v1702_v40, %v1709_v41 }
 0x3cc   : > { %v2322_v57 = vcombine.low %v2266_v46, %v2282_v48  ;;  %v2323_v60 = vcombine.high %v2266_v46, %v2282_v48  ;;  %v7098_v22 = vrot.slane %v1818_v61, %v6921_v23  ;;  %v1834_v24 = vcombine.low %v7041_v9, %v1323_v44 }
 0x3cd   : > { %6244 = vxpose.xlu0.b32.start [1/2] (short) (narrow) %v6243_v12, 32  ;;  %v2234_v12 = vrot.slane %v5735_v32, %v6921_v23  ;;  %v2370_v1 = vrot.slane %v5743_v50, %v6921_v23  ;;  %v2386_v4 = vrot.slane %v5745_v51, %v6921_v23  ;;  %v2402_v5 = vrot.slane %v5747_v49, %v6921_v23 }
 0x3ce   : > { %v2418_v8 = vrot.slane %v5749_v54, %v6921_v23  ;;  %v7090_v11 = vrot.slane %v2322_v57, %v6930_v36  ;;  %v7093_v18 = vrot.slane %v2323_v60, %v6930_v36  ;;  %v1835_v25 = vcombine.high %v7041_v9, %v1323_v44 }
 0x3cf   : > { %v2290_v55 = vcombine.low %v2234_v12, %v2250_v43  ;;  %v2291_v2 = vcombine.high %v2234_v12, %v2250_v43  ;;  %v2427_v19 = vcombine.high %v2370_v1, %v2386_v4  ;;  %v2038_v26 = vcombine.low %v7036_v59, %v7057_v35 }
 0x3d0   : > { %v2459_v20 = vcombine.high %v2402_v5, %v2418_v8  ;;  %v2426_v30 = vcombine.low %v2370_v1, %v2386_v4  ;;  %v2458_v32 = vcombine.low %v2402_v5, %v2418_v8  ;;  %v2039_v15 = vcombine.high %v7036_v59, %v7057_v35 }
 0x3d1   : > { %6246 = vxpose.xlu0.b32.end [2/2] (short) (narrow) %v6245_v45, 32  ;;  %v7084_v10 = vrot.slane %v2290_v55, %v6930_v36  ;;  %v7087_v7 = vrot.slane %v2291_v2, %v6930_v36  ;;  %v7113_v34 = vrot.slane %v2427_v19, %v6930_v36  ;;  %v2022_v33 = vcombine.low %v6910_v16, %v7045_v17 }
 0x3d2   : > { %v7116_v9 = vrot.slane %v2459_v20, %v6930_v36  ;;  %v2023_v37 = vcombine.high %v6910_v16, %v7045_v17  ;;  %v2046_v38 = vrot.slane %v2038_v26, %v6921_v23  ;;  %v7127_v43 = vrot.slane %v2426_v30, %v6930_v36 }
 0x3d3   : > { %v7130_v44 = vrot.slane %v2458_v32, %v6930_v36  ;;  %v1833_v46 = vrot.slane %v1819_v21, %v6921_v23  ;;  %v2053_v16 = vrot.slane %v2039_v15, %v6921_v23  ;;  %v2030_v17 = vrot.slane %v2022_v33, %v6921_v23 }
 0x3d4   : > { %v2492_v51 = vcombine.low %v7113_v34, %v7116_v9  ;;  %v1842_v49 = vrot.slane %v1834_v24, %v6921_v23  ;;  %v1849_v54 = vrot.slane %v1835_v25, %v6921_v23  ;;  %v2037_v55 = vrot.slane %v2023_v37, %v6921_v23 }
 0x3d5   : > { %v2086_v57 = vcombine.low %v2030_v17, %v2046_v38  ;;  %v2087_v60 = vcombine.high %v2030_v17, %v2046_v38  ;;  %v2356_v1 = vcombine.low %v7087_v7, %v7093_v18  ;;  %v2490_v4 = vcombine.low %v7127_v43, %v7130_v44 }
 0x3d6   : > { %v2102_v5 = vcombine.low %v2037_v55, %v2053_v16  ;;  %v2103_v8 = vcombine.high %v2037_v55, %v2053_v16  ;;  %v2354_v24 = vcombine.low %v7084_v10, %v7090_v11  ;;  %v1882_v25 = vcombine.low %v7098_v22, %v1842_v49 }
 0x3d7   : > { %1374 = vrot.lane.b32.xlu1 %v7008_v42, %s6540_s19  ;;  %v3044_v21 = vpack.c.bf16 %v2492_v51, %v2356_v1  ;;  %v1883_v26 = vcombine.high %v7098_v22, %v1842_v49  ;;  %v1899_v30 = vcombine.high %v1833_v46, %v1849_v54  ;;  %v2094_v32 = vrot.slane %v2086_v57, %v6930_v36 }
 0x3d8   : > { %v2101_v15 = vrot.slane %v2087_v60, %v6930_v36  ;;  %v2110_v33 = vrot.slane %v2102_v5, %v6930_v36  ;;  %v2117_v37 = vrot.slane %v2103_v8, %v6930_v36  ;;  %v3042_v38 = vpack.c.bf16 %v2490_v4, %v2354_v24 }
 0x3d9   : > { %v2491_v17 = vcombine.high %v7127_v43, %v7130_v44  ;;  %v2355_v55 = vcombine.high %v7084_v10, %v7090_v11 }
 0x3db   : > { %1386 = vrot.lane.b32.xlu1 %v7008_v42, %s6539_s30 }
 0x3df   : > { %1388 = vrot.lane.b32.xlu1 %v7015_v47, %s6539_s30 }
 0x3e3   : > { %1400 = vrot.lane.b32.xlu1 %v7015_v47, %s6541_s21 }
 0x3e7   : > { %1378 = vrot.lane.b32.xlu1 %v7023_v0, %s6540_s19 }
 0x402   : > { %1376 = vrot.lane.b32.xlu0 %v7015_v47, %s6540_s19 }
 0x406   : > { %1398 = vrot.lane.b32.xlu0 %v7008_v42, %s6541_s21 }
 0x429   : > { %v7065_v45 = vpop.trf.xlu1 }
 0x42a   : > { %v6200_v39 = vunpack.i.l.bf16 %v7065_v45  ;;  %v6203_v10 = vunpack.i.h.bf16 %v7065_v45  ;;  %v2493_v45 = vcombine.high %v7113_v34, %v7116_v9 }
 0x42c   : > { %v7069_v56 = vpop.trf.xlu0 }
 0x42d   : > { %v7071_v62 = vpop.trf.xlu1  ;;  %v6176_v61 = vunpack.i.l.bf16 %v7069_v56 }
 0x42e   : > { %v6205_v59 = vunpack.i.l.bf16 %v7071_v62  ;;  %v6208_v11 = vunpack.i.h.bf16 %v7071_v62 }
 0x430   : > { %v7079_v3 = vpop.trf.xlu0  ;;  %v3318_v2 = vpack.c.bf16 %v6205_v59, %v6200_v39  ;;  %v1890_v59 = vrot.slane %v1882_v25, %v6930_v36  ;;  %v3320_v24 = vpack.c.bf16 %v6208_v11, %v6203_v10  ;;  %v2357_v25 = vcombine.high %v7087_v7, %v7093_v18 }
 0x431   : > { %v7081_v63 = vpop.trf.xlu1  ;;  %v6181_v48 = vunpack.i.l.bf16 %v7079_v3  ;;  %v6184_v22 = vunpack.i.h.bf16 %v7079_v3  ;;  %v5767_v3 = vcombine.low %v2110_v33, %v2117_v37 }
 0x432   : > { %v6210_v14 = vunpack.i.l.bf16 %v7081_v63 }
 0x433   : > { %v3314_v20 = vpack.c.bf16 %v6181_v48, %v6176_v61  ;;  %v5769_v48 = vcombine.high %v2110_v33, %v2117_v37 }
 0x434   : > { %v7105_v28 = vpop.trf.xlu0 }
 0x435   : > { %v7107_v29 = vpop.trf.xlu1  ;;  %v6186_v41 = vunpack.i.l.bf16 %v7105_v28  ;;  %v7191_v44 = vrot.slane %v5769_v48, %v6921_v23 }
 0x436   : > { %v6215_v27 = vunpack.i.l.bf16 %v7107_v29  ;;  %v6218_v51 = vunpack.i.h.bf16 %v7107_v29  ;;  %v3043_v29 = vpack.c.bf16 %v2491_v17, %v2355_v55 }
 0x438   : > { %v6190_v35 = vpop.trf.xlu0  ;;  %v3319_v40 = vpack.c.bf16 %v6215_v27, %v6210_v14  ;;  %v1898_v14 = vcombine.low %v1833_v46, %v1849_v54  ;;  %v6189_v27 = vunpack.i.h.bf16 %v7105_v28  ;;  %v1897_v28 = vrot.slane %v1883_v26, %v6930_v36 }
 0x439   : > { %v6191_v12 = vunpack.i.l.bf16 %v6190_v35  ;;  %v6194_v19 = vunpack.i.h.bf16 %v6190_v35  ;;  %v6179_v46 = vunpack.i.h.bf16 %v7069_v56 }
 0x43a   : > { %5986 = vmatpush3.bf16.msra.mxu1 %v3319_v40  ;;  %v1906_v35 = vrot.slane %v1898_v14, %v6930_v36  ;;  %v1913_v40 = vrot.slane %v1899_v30, %v6930_v36  ;;  %v5755_v54 = vcombine.low %v1890_v59, %v1897_v28  ;;  %v5757_v56 = vcombine.high %v1890_v59, %v1897_v28 }
 0x43b   : > { %v3315_v50 = vpack.c.bf16 %v6191_v12, %v6186_v41  ;;  %5987 = vmatprep.subr.bf16.mxu1 %v6544_v31  ;;  %v3317_v39 = vpack.c.bf16 %v6194_v19, %v6189_v27  ;;  %v5763_v41 = vcombine.low %v2094_v32, %v2101_v15  ;;  %v5765_v12 = vcombine.high %v2094_v32, %v2101_v15 }
 0x43c   : > { %v7169_v16 = vpop.trf.xlu0  ;;  %v3316_v49 = vpack.c.bf16 %v6184_v22, %v6179_v46  ;;  %v5761_v57 = vcombine.high %v1906_v35, %v1913_v40  ;;  %v7196_v4 = vrot.slane %v5755_v54, %v6921_v23  ;;  %v7199_v5 = vrot.slane %v5757_v56, %v6921_v23 }
 0x43d   : > { %5970 = vmatpush3.bf16.msra.mxu0 %v3315_v50  ;;  %v6213_v50 = vunpack.i.h.bf16 %v7081_v63  ;;  %v7181_v60 = vrot.slane %v5763_v41, %v6921_v23  ;;  %v7184_v61 = vrot.slane %v5765_v12, %v6921_v23  ;;  %v7187_v63 = vrot.slane %v5767_v3, %v6921_v23 }
 0x43e   : > { %5971 = vmatprep.subr.bf16.mxu0 %v6544_v31  ;;  %5988 = vmatpush3.bf16.msra.mxu1 %v3318_v2  ;;  %v5759_v2 = vcombine.low %v1906_v35, %v1913_v40  ;;  %v7206_v19 = vrot.slane %v5761_v57, %v6921_v23  ;;  %v2698_v26 = vcombine.low %v7196_v4, %v7199_v5  ;;  %v6227_v35 = vunpack.i.h.bf16 %v7169_v16 }
 0x43f   : > { %6001 = vmatprep.subr.bf16.mxu1 %v6544_v31  ;;  %v3321_v1 = vpack.c.bf16 %v6218_v51, %v6213_v50  ;;  %v2834_v62 = vcombine.low %v7181_v60, %v7184_v61  ;;  %v3045_v32 = vpack.c.bf16 %v2493_v45, %v2357_v25  ;;  %v6224_v40 = vunpack.i.l.bf16 %v7169_v16 }
 0x440   : > { %v6228_v43 = vpop.trf.xlu0  ;;  %v7203_v8 = vrot.slane %v5759_v2, %v6921_v23  ;;  %v2835_v54 = vcombine.high %v7181_v60, %v7184_v61  ;;  %v2867_v56 = vcombine.high %v7187_v63, %v7191_v44  ;;  %v2699_v55 = vcombine.high %v7196_v4, %v7199_v5 }
 0x441   : > { %5972 = vmatpush3.bf16.msra.mxu0 %v3314_v20  ;;  %5990 = vmatmul.mubr.msk.bf16.vlgmr.msra.gmra.mxu1 %vm3330_vm2, %v3044_v21  ;;  %v2866_v21 = vcombine.low %v7187_v63, %v7191_v44  ;;  %v2842_v33 = vrot.slane %v2834_v62, %v6930_v36  ;;  %v6232_v7 = vunpack.i.h.bf16 %v6228_v43  ;;  %v6229_v18 = vunpack.i.l.bf16 %v6228_v43 }
 0x442   : > { %5977 = vmatprep.subr.bf16.mxu0 %v6544_v31  ;;  %6005 = vmatprep.mubr.msk.bf16.mxu1 %vm6545_vm1, %v6544_v31  ;;  %v2730_v14 = vcombine.low %v7203_v8, %v7206_v19  ;;  %v2731_v2 = vcombine.high %v7203_v8, %v7206_v19  ;;  %v2713_v63 = vrot.slane %v2699_v55, %v6930_v36 }
 0x443   : > { %v2874_v37 = vrot.slane %v2866_v21, %v6930_v36  ;;  %v3322_v46 = vpack.c.bf16 %v6229_v18, %v6224_v40  ;;  %v3324_v3 = vpack.c.bf16 %v6232_v7, %v6227_v35 }
 0x444   : > { %5974 = vmatmul.mubr.msk.bf16.vlgmr.msra.gmra.mxu0 %vm3330_vm2, %v3042_v38  ;;  %v6233_v20 = vpop.trf.xlu0  ;;  %v2738_v59 = vrot.slane %v2730_v14, %v6930_v36  ;;  %v2745_v44 = vrot.slane %v2731_v2, %v6930_v36 }
 0x445   : > { %5978 = vmatpush3.bf16.msra.mxu0 %v3317_v39  ;;  %5981 = vmatprep.mubr.msk.bf16.mxu0 %vm6545_vm1, %v6544_v31  ;;  %v6237_v30 = vunpack.i.h.bf16 %v6233_v20  ;;  %v6234_v34 = vunpack.i.l.bf16 %v6233_v20  ;;  %v2706_v39 = vrot.slane %v2698_v26, %v6930_v36  ;;  %v2898_v41 = vcombine.low %v2842_v33, %v2874_v37 }
 0x446   : > { %5979 = vmatprep.subr.bf16.mxu0 %v6544_v31  ;;  %v2899_v12 = vcombine.high %v2842_v33, %v2874_v37  ;;  %v2881_v20 = vrot.slane %v2867_v56, %v6930_v36  ;;  %v2764_v25 = vcombine.low %v2713_v63, %v2745_v44  ;;  %v2765_v26 = vcombine.high %v2713_v63, %v2745_v44 }
 0x447   : > { %v2762_v48 = vcombine.low %v2706_v39, %v2738_v59  ;;  %v2763_v50 = vcombine.high %v2706_v39, %v2738_v59 }
 0x448   : > { %v6238_v9 = vpop.trf.xlu0 }
 0x449   : > { %5980 = vmatpush3.bf16.msra.mxu0 %v3316_v49  ;;  %v6242_v15 = vunpack.i.h.bf16 %v6238_v9  ;;  %v6239_v27 = vunpack.i.l.bf16 %v6238_v9  ;;  %v3046_v51 = vpack.c.bf16 %v2898_v41, %v2762_v48  ;;  %v3047_v49 = vpack.c.bf16 %v2899_v12, %v2763_v50  ;;  %v1375_v14 = vpop.permute.xlu1 %1374 }
 0x44a   : > { %5993 = vmatprep.subr.bf16.mxu0 %v6544_v31 }
 0x44b   : > { %v3323_v38 = vpack.c.bf16 %v6239_v27, %v6234_v34  ;;  %v3325_v22 = vpack.c.bf16 %v6242_v15, %v6237_v30 }
 0x44c   : > { %5982 = vmatmul.mubr.msk.bf16.vlgmr.msra.gmra.mxu0 %vm3330_vm2, %v3043_v29  ;;  %v6247_v28 = vpop.trf.xlu0 }
 0x44d   : > { %5994 = vmatpush3.bf16.msra.mxu0 %v3321_v1  ;;  %5997 = vmatprep.mubr.msk.bf16.mxu0 %vm6545_vm1, %v6544_v31  ;;  %v2849_v1 = vrot.slane %v2835_v54, %v6930_v36  ;;  %v6251_v4 = vunpack.i.h.bf16 %v6247_v28  ;;  %v6248_v5 = vunpack.i.l.bf16 %v6247_v28  ;;  %v1387_v9 = vpop.permute.xlu1 %1386 }
 0x44e   : > { %5995 = vmatprep.subr.bf16.mxu0 %v6544_v31  ;;  %6002 = vmatpush3.bf16.msra.mxu1 %v3323_v38  ;;  %v1546_v28 = vcombine.low %v7008_v42, %v1387_v9  ;;  %v1547_v35 = vcombine.high %v7008_v42, %v1387_v9 }
 0x44f   : > { %6003 = vmatprep.subr.bf16.mxu1 %v6544_v31  ;;  %v2900_v8 = vcombine.low %v2849_v1, %v2881_v20  ;;  %v2901_v19 = vcombine.high %v2849_v1, %v2881_v20 }
 0x450   : > { %v6252_v17 = vpop.trf.xlu0  ;;  %v1561_v54 = vrot.slane %v1547_v35, %v6921_v23 }
 0x451   : > { %5996 = vmatpush3.bf16.msra.mxu0 %v3320_v24  ;;  %v6256_v45 = vunpack.i.h.bf16 %v6252_v17  ;;  %v6253_v60 = vunpack.i.l.bf16 %v6252_v17  ;;  %v3048_v30 = vpack.c.bf16 %v2900_v8, %v2764_v25  ;;  %v3049_v34 = vpack.c.bf16 %v2901_v19, %v2765_v26 }
 0x452   : > { %6009 = vmatprep.subr.bf16.mxu0 %v6544_v31  ;;  %6004 = vmatpush3.bf16.msra.mxu1 %v3322_v46 }
 0x453   : > { %6017 = vmatprep.subr.bf16.mxu1 %v6544_v31  ;;  %v3326_v21 = vpack.c.bf16 %v6253_v60, %v6248_v5  ;;  %v3328_v24 = vpack.c.bf16 %v6256_v45, %v6251_v4 }
 0x454   : > { %5998 = vmatmul.mubr.msk.bf16.vlgmr.msra.gmra.mxu0 %vm3330_vm2, %v3045_v32  ;;  %v6257_v16 = vpop.trf.xlu0  ;;  %v1389_v32 = vpop.permute.xlu1 %1388 }
 0x455   : > { %6013 = vmatprep.mubr.msk.bf16.mxu0 %vm6545_vm1, %v6544_v31  ;;  %6010 = vmatpush3.bf16.msra.mxu0 %v3325_v22  ;;  %v6261_v57 = vunpack.i.h.bf16 %v6257_v16  ;;  %v6258_v43 = vunpack.i.l.bf16 %v6257_v16  ;;  %v1750_v15 = vcombine.low %v7015_v47, %v1389_v32  ;;  %v1751_v27 = vcombine.high %v7015_v47, %v1389_v32 }
 0x456   : > { %6011 = vmatprep.subr.bf16.mxu0 %v6544_v31  ;;  %6006 = vmatmul.mubr.msk.bf16.vlgmr.msra.gmra.mxu1 %vm3330_vm2, %v3046_v51  ;;  %v1554_v16 = vrot.slane %v1546_v28, %v6921_v23 }
 0x457   : > { %6021 = vmatprep.mubr.msk.bf16.mxu1 %vm6545_vm1, %v6544_v31  ;;  %v1758_v38 = vrot.slane %v1750_v15, %v6921_v23  ;;  %v1765_v22 = vrot.slane %v1751_v27, %v6921_v23 }
 0x458   : > { %v6262_v29 = vpop.trf.xlu0  ;;  %v1401_v33 = vpop.permute.xlu1 %1400 }
 0x459   : > { %6012 = vmatpush3.bf16.msra.mxu0 %v3324_v3  ;;  %v6266_v10 = vunpack.i.h.bf16 %v6262_v29  ;;  %v6263_v11 = vunpack.i.l.bf16 %v6262_v29 }
 0x45a   : > { %6025 = vmatprep.subr.bf16.mxu0 %v6544_v31 }
 0x45b   : > { %v3327_v61 = vpack.c.bf16 %v6263_v11, %v6258_v43  ;;  %v3329_v62 = vpack.c.bf16 %v6266_v10, %v6261_v57 }
 0x45c   : > { %6014 = vmatmul.mubr.msk.bf16.vlgmr.msra.gmra.mxu0 %vm3330_vm2, %v3047_v49 }
 0x45d   : > { %6029 = vmatprep.mubr.msk.bf16.mxu0 %vm6545_vm1, %v6544_v31  ;;  %6018 = vmatpush3.bf16.msra.mxu1 %v3327_v61 }
 0x45e   : > { %6026 = vmatpush3.bf16.msra.mxu0 %v3329_v62  ;;  %6019 = vmatprep.subr.bf16.mxu1 %v6544_v31 }
 0x45f   : > { %6027 = vmatprep.subr.bf16.mxu0 %v6544_v31 }
 0x461   : > { %6020 = vmatpush3.bf16.msra.mxu1 %v3326_v21 }
 0x462   : > { %6028 = vmatpush3.bf16.msra.mxu0 %v3328_v24  ;;  %6033 = vmatprep.subr.bf16.mxu1 %v6544_v31 }
 0x463   : > { %6039 = vmatprep.subr.bf16.mxu0 %v6544_v31 }
 0x464   : > { %6022 = vmatmul.mubr.msk.bf16.vlgmr.msra.gmra.mxu1 %vm3330_vm2, %v3048_v30 }
 0x465   : > { %6030 = vmatmul.mubr.msk.bf16.vlgmr.msra.gmra.mxu0 %vm3330_vm2, %v3049_v34  ;;  %6035 = vmatprep.mubr.msk.bf16.mxu1 %vm6545_vm1, %v6544_v31 }
 0x466   : > { %6041 = vmatprep.mubr.msk.bf16.mxu0 %vm6545_vm1, %v6544_v31 }
 0x474   : > { %v1377_v37 = vpop.permute.xlu0 %1376 }
 0x475   : > { %v1766_v7 = vcombine.low %v1377_v37, %v1401_v33  ;;  %v1767_v18 = vcombine.high %v1377_v37, %v1401_v33 }
 0x477   : > { %v1774_v39 = vrot.slane %v1766_v7, %v6921_v23  ;;  %v1781_v59 = vrot.slane %v1767_v18, %v6921_v23 }
 0x478   : > { %v1399_v40 = vpop.permute.xlu0 %1398 }
 0x479   : > { %v1782_v41 = vcombine.low %v1758_v38, %v1774_v39  ;;  %v1783_v12 = vcombine.high %v1758_v38, %v1774_v39  ;;  %v1798_v47 = vcombine.low %v1765_v22, %v1781_v59  ;;  %v1799_v46 = vcombine.high %v1765_v22, %v1781_v59 }
 0x47a   : > { %v1562_v3 = vcombine.low %v1375_v14, %v1399_v40  ;;  %v1563_v17 = vcombine.high %v1375_v14, %v1399_v40 }
 0x47b   : > { %v1790_v48 = vrot.slane %v1782_v41, %v6930_v36  ;;  %v1797_v50 = vrot.slane %v1783_v12, %v6930_v36  ;;  %v1806_v51 = vrot.slane %v1798_v47, %v6930_v36  ;;  %v1813_v49 = vrot.slane %v1799_v46, %v6930_v36 }
 0x47c   : > { %v1570_v42 = vrot.slane %v1562_v3, %v6921_v23  ;;  %v1577_v56 = vrot.slane %v1563_v17, %v6921_v23 }
 0x47d   : > { %v2566_v55 = vcombine.low %v1790_v48, %v1797_v50  ;;  %v5753_v2 = vcombine.high %v1790_v48, %v1797_v50  ;;  %v2582_v57 = vcombine.low %v1806_v51, %v1813_v49  ;;  %v5754_v43 = vcombine.high %v1806_v51, %v1813_v49 }
 0x47e   : > { %v1578_v29 = vcombine.low %v1554_v16, %v1570_v42  ;;  %v1579_v10 = vcombine.high %v1554_v16, %v1570_v42  ;;  %v1594_v11 = vcombine.low %v1561_v54, %v1577_v56  ;;  %v1595_v1 = vcombine.high %v1561_v54, %v1577_v56 }
 0x47f   : > { %v2573_v20 = vrot.slane %v2566_v55, %v6921_v23  ;;  %v2581_v45 = vrot.slane %v5753_v2, %v6921_v23  ;;  %v2589_v60 = vrot.slane %v2582_v57, %v6921_v23  ;;  %v2597_v61 = vrot.slane %v5754_v43, %v6921_v23 }
 0x480   : > { %v1586_v62 = vrot.slane %v1578_v29, %v6930_v36  ;;  %v1593_v63 = vrot.slane %v1579_v10, %v6930_v36  ;;  %v1602_v44 = vrot.slane %v1594_v11, %v6930_v36  ;;  %v1609_v4 = vrot.slane %v1595_v1, %v6930_v36 }
 0x481   : > { %v2598_v5 = vcombine.low %v2573_v20, %v2581_v45  ;;  %v2614_v8 = vcombine.low %v2589_v60, %v2597_v61  ;;  %v2599_v19 = vcombine.high %v2573_v20, %v2581_v45  ;;  %v2615_v21 = vcombine.high %v2589_v60, %v2597_v61 }
 0x482   : > { %v2498_v24 = vcombine.low %v1586_v62, %v1593_v63  ;;  %v5751_v25 = vcombine.high %v1586_v62, %v1593_v63  ;;  %v2514_v26 = vcombine.low %v1602_v44, %v1609_v4  ;;  %v5752_v14 = vcombine.high %v1602_v44, %v1609_v4 }
 0x483   : > { %v2613_v30 = vrot.slane %v2599_v19, %v6930_v36  ;;  %v2629_v34 = vrot.slane %v2615_v21, %v6930_v36  ;;  %v2606_v33 = vrot.slane %v2598_v5, %v6930_v36  ;;  %v2622_v37 = vrot.slane %v2614_v8, %v6930_v36 }
 0x484   : > { %v2505_v9 = vrot.slane %v2498_v24, %v6921_v23  ;;  %v2513_v32 = vrot.slane %v5751_v25, %v6921_v23  ;;  %v2521_v15 = vrot.slane %v2514_v26, %v6921_v23  ;;  %v2529_v27 = vrot.slane %v5752_v14, %v6921_v23 }
 0x485   : > { %v2632_v7 = vcombine.low %v2613_v30, %v2629_v34  ;;  %v2633_v18 = vcombine.high %v2613_v30, %v2629_v34  ;;  %v2630_v12 = vcombine.low %v2606_v33, %v2622_v37  ;;  %v2631_v47 = vcombine.high %v2606_v33, %v2622_v37 }
 0x486   : > { %v2530_v38 = vcombine.low %v2505_v9, %v2513_v32  ;;  %v2546_v22 = vcombine.low %v2521_v15, %v2529_v27  ;;  %v2531_v39 = vcombine.high %v2505_v9, %v2513_v32  ;;  %v2547_v59 = vcombine.high %v2521_v15, %v2529_v27 }
 0x488   : > { %v2538_v28 = vrot.slane %v2530_v38, %v6930_v36  ;;  %v2554_v35 = vrot.slane %v2546_v22, %v6930_v36  ;;  %v2545_v40 = vrot.slane %v2531_v39, %v6930_v36  ;;  %v2561_v41 = vrot.slane %v2547_v59, %v6930_v36 }
 0x48a   : > { %v2562_v46 = vcombine.low %v2538_v28, %v2554_v35  ;;  %v2563_v3 = vcombine.high %v2538_v28, %v2554_v35  ;;  %v2564_v17 = vcombine.low %v2545_v40, %v2561_v41  ;;  %v2565_v48 = vcombine.high %v2545_v40, %v2561_v41 }
 0x48c   : > { %v3050_v50 = vpack.c.bf16 %v2630_v12, %v2562_v46  ;;  %v3051_v51 = vpack.c.bf16 %v2631_v47, %v2563_v3  ;;  %v7301_v49 = vpack.c.bf16 %v2632_v7, %v2564_v17  ;;  %v7303_v16 = vpack.c.bf16 %v2633_v18, %v2565_v48  ;;  %v7379_v3 = vpop.permute.xlu1 %1378 }
 0x48e   : > { %6034 = vmatpush3.bf16.msra.mxu1 %v3050_v50  ;;  %6040 = vmatpush3.bf16.msra.mxu0 %v3051_v51 }
 0x48f   : > { %6045 = vmatprep.subr.bf16.mxu1 %v6544_v31  ;;  %6051 = vmatprep.subr.bf16.mxu0 %v6544_v31 }
 0x501   : > { %v7307_v54 = vpop.f32.mrf.mxu1 }
 0x502   : > { %v3696_v10 = vsel %vm3683_vm3, %v7307_v54, -inf }
 0x503   : > { %v5991_v42 = vpop.f32.mrf.mxu1 }
 0x504   : > { %v7309_v56 = vpop.f32.mrf.mxu0 }
 0x505   : > { %v3684_v55 = vsel %vm3683_vm3, %v7309_v56, -inf  ;;  %v7313_v2 = vpop.f32.mrf.mxu1 }
 0x506   : > { %3685 = vmax.xlane.f32.xlu1 %v3684_v55  ;;  %v5975_v57 = vpop.f32.mrf.mxu0  ;;  %v3699_v45 = vsel %vm3683_vm3, %v7313_v2, -inf }
 0x507   : > { %v5992_v43 = vpop.f32.mrf.mxu1 }
 0x508   : > { %v7315_v29 = vpop.f32.mrf.mxu0 }
 0x509   : > { %v3687_v11 = vsel %vm3683_vm3, %v7315_v29, -inf }
 0x50a   : > { %3697 = vmax.xlane.f32.xlu1 %v3696_v10  ;;  %3688 = vmax.xlane.f32.xlu0 %v3687_v11  ;;  %v5976_v1 = vpop.f32.mrf.mxu0 }
 0x50c   : > { %v7321_v20 = vpop.f32.mrf.mxu0 }
 0x50d   : > { %v3690_v62 = vsel %vm3683_vm3, %v7321_v20, -inf }
 0x50e   : > { %3700 = vmax.xlane.f32.xlu1 %v3699_v45  ;;  %v5983_v60 = vpop.f32.mrf.mxu0 }
 0x510   : > { %v7325_v61 = vpop.f32.mrf.mxu0 }
 0x511   : > { %v3693_v9 = vsel %vm3683_vm3, %v7325_v61, -inf }
 0x512   : > { %3691 = vmax.xlane.f32.xlu1 %v3690_v62  ;;  %v5984_v63 = vpop.f32.mrf.mxu0 }
 0x514   : > { %v7329_v44 = vpop.f32.mrf.mxu0 }
 0x515   : > { %v3702_v27 = vsel %vm3683_vm3, %v7329_v44, -inf }
 0x516   : > { %v5999_v4 = vpop.f32.mrf.mxu0  ;;  %v7333_v19 = vpop.f32.mrf.mxu1 }
 0x517   : > { %v3708_v24 = vsel %vm3683_vm3, %v7333_v19, -inf }
 0x518   : > { %v7331_v5 = vpop.f32.mrf.mxu0  ;;  %v6007_v25 = vpop.f32.mrf.mxu1  ;;  %3709 = vmax.xlane.f32.xlu1 %v3708_v24 }
 0x519   : > { %v3705_v33 = vsel %vm3683_vm3, %v7331_v5, -inf }
 0x51a   : > { %v6000_v8 = vpop.f32.mrf.mxu0  ;;  %v7339_v14 = vpop.f32.mrf.mxu1 }
 0x51b   : > { %v3711_v34 = vsel %vm3683_vm3, %v7339_v14, -inf }
 0x51c   : > { %v7335_v21 = vpop.f32.mrf.mxu0  ;;  %v6008_v32 = vpop.f32.mrf.mxu1  ;;  %3712 = vmax.xlane.f32.xlu0 %v3711_v34  ;;  %3694 = vmax.xlane.f32.xlu1 %v3693_v9 }
 0x51d   : > { %v3714_v35 = vsel %vm3683_vm3, %v7335_v21, -inf }
 0x51e   : > { %v6015_v26 = vpop.f32.mrf.mxu0 }
 0x520   : > { %v7341_v30 = vpop.f32.mrf.mxu0  ;;  %3703 = vmax.xlane.f32.xlu1 %v3702_v27  ;;  %3706 = vmax.xlane.f32.xlu0 %v3705_v33 }
 0x521   : > { %v3717_v12 = vsel %vm3683_vm3, %v7341_v30, -inf }
 0x522   : > { %v6016_v15 = vpop.f32.mrf.mxu0 }
 0x524   : > { %v7351_v37 = vpop.f32.mrf.mxu1 }
 0x525   : > { %v7353_v7 = vpop.f32.mrf.mxu0  ;;  %v3720_v18 = vsel %vm3683_vm3, %v7351_v37, -inf }
 0x526   : > { %v6023_v38 = vpop.f32.mrf.mxu1  ;;  %3721 = vmax.xlane.f32.xlu1 %v3720_v18  ;;  %v3726_v47 = vsel %vm3683_vm3, %v7353_v7, -inf }
 0x527   : > { %v6031_v22 = vpop.f32.mrf.mxu0 }
 0x528   : > { %v7357_v39 = vpop.f32.mrf.mxu1 }
 0x529   : > { %v7359_v59 = vpop.f32.mrf.mxu0  ;;  %v3723_v28 = vsel %vm3683_vm3, %v7357_v39, -inf }
 0x52a   : > { %v6024_v40 = vpop.f32.mrf.mxu1  ;;  %3724 = vmax.xlane.f32.xlu0 %v3723_v28  ;;  %3715 = vmax.xlane.f32.xlu1 %v3714_v35  ;;  %v3729_v46 = vsel %vm3683_vm3, %v7359_v59, -inf }
 0x52b   : > { %v6032_v41 = vpop.f32.mrf.mxu0 }
 0x52e   : > { %3718 = vmax.xlane.f32.xlu0 %v3717_v12 }
 0x53b   : > { %1390 = vrot.lane.b32.xlu1 %v7023_v0, %s6539_s30 }
 0x544   : > { %1380 = vrot.lane.b32.xlu0 %v6862_v6, %s6540_s19 }
 0x55f   : > { %3727 = vmax.xlane.f32.xlu1 %v3726_v47 }
 0x563   : > { %3730 = vmax.xlane.f32.xlu0 %v3729_v46 }
 0x570   : > { %1392 = vrot.lane.b32.xlu1 %v6862_v6, %s6539_s30 }
 0x579   : > { %1402 = vrot.lane.b32.xlu0 %v7023_v0, %s6541_s21 }
 0x58f   : > { %v3686_v17 = vpop.xlane.xlu1 %3685 }
 0x590   : > { %v3732_v48 = vsub.f32 %v7309_v56, %v3686_v17 }
 0x592   : > { %v3748_v50 = vmul.f32 1.442695, %v3732_v48 }
 0x593   : > { %v3698_v51 = vpop.xlane.xlu1 %3697  ;;  %v3689_v42 = vpop.xlane.xlu0 %3688 }
 0x594   : > { %6385 = vpow2.f32 %v3748_v50  ;;  %v3736_v55 = vsub.f32 %v7307_v54, %v3698_v51  ;;  %v3733_v57 = vsub.f32 %v7315_v29, %v3689_v42 }
 0x596   : > { %v3756_v43 = vmul.f32 1.442695, %v3736_v55  ;;  %v3750_v10 = vmul.f32 1.442695, %v3733_v57 }
 0x597   : > { %v3701_v11 = vpop.xlane.xlu1 %3700 }
 0x598   : > { %6387 = vpow2.f32 %v3756_v43  ;;  %v3737_v1 = vsub.f32 %v7313_v2, %v3701_v11 }
 0x599   : > { %6389 = vpow2.f32 %v3750_v10 }
 0x59a   : > { %v3758_v45 = vmul.f32 1.442695, %v3737_v1 }
 0x59b   : > { %v3692_v60 = vpop.xlane.xlu1 %3691 }
 0x59c   : > { %6391 = vpow2.f32 %v3758_v45  ;;  %v3734_v56 = vsub.f32 %v7321_v20, %v3692_v60 }
 0x59e   : > { %v3752_v62 = vmul.f32 1.442695, %v3734_v56 }
 0x5a0   : > { %6393 = vpow2.f32 %v3752_v62 }
 0x5a1   : > { %v7386_v63 = vpop.eup %6385  ;;  %v3710_v8 = vpop.xlane.xlu1 %3709 }
 0x5a2   : > { %v3780_v54 = vsel %vm3683_vm3, %v7386_v63, 0.0  ;;  %v3740_v20 = vsub.f32 %v7333_v19, %v3710_v8 }
 0x5a3   : > { %3781 = vadd.xlane.f32.xlu1 %v3780_v54 }
 0x5a4   : > { %v3764_v34 = vmul.f32 1.442695, %v3740_v20 }
 0x5a5   : > { %v7390_v29 = vpop.eup %6387  ;;  %v3713_v9 = vpop.xlane.xlu0 %3712 }
 0x5a6   : > { %v3792_v4 = vsel %vm3683_vm3, %v7390_v29, 0.0  ;;  %v7394_v2 = vpop.eup %6389  ;;  %v3695_v32 = vpop.xlane.xlu1 %3694  ;;  %6395 = vpow2.f32 %v3764_v34  ;;  %v3741_v27 = vsub.f32 %v7339_v14, %v3713_v9 }
 0x5a7   : > { %3793 = vadd.xlane.f32.xlu0 %v3792_v4  ;;  %v3783_v26 = vsel %vm3683_vm3, %v7394_v2, 0.0  ;;  %v3735_v33 = vsub.f32 %v7325_v61, %v3695_v32 }
 0x5a8   : > { %v3766_v38 = vmul.f32 1.442695, %v3741_v27 }
 0x5a9   : > { %v7396_v24 = vpop.eup %6391  ;;  %v3754_v18 = vmul.f32 1.442695, %v3735_v33  ;;  %v3707_v35 = vpop.xlane.xlu0 %3706 }
 0x5aa   : > { %v3795_v25 = vsel %vm3683_vm3, %v7396_v24, 0.0  ;;  %v3704_v22 = vpop.xlane.xlu1 %3703  ;;  %v3739_v41 = vsub.f32 %v7331_v5, %v3707_v35 }
 0x5ab   : > { %3796 = vadd.xlane.f32.xlu1 %v3795_v25  ;;  %3784 = vadd.xlane.f32.xlu0 %v3783_v26  ;;  %v3738_v28 = vsub.f32 %v7329_v44, %v3704_v22  ;;  %6397 = vpow2.f32 %v3754_v18 }
 0x5ac   : > { %6399 = vpow2.f32 %v3766_v38  ;;  %v3762_v12 = vmul.f32 1.442695, %v3739_v41 }
 0x5ad   : > { %v7403_v15 = vpop.eup %6393  ;;  %v3760_v40 = vmul.f32 1.442695, %v3738_v28 }
 0x5ae   : > { %v3786_v19 = vsel %vm3683_vm3, %v7403_v15, 0.0 }
 0x5af   : > { %3787 = vadd.xlane.f32.xlu1 %v3786_v19  ;;  %6401 = vpow2.f32 %v3760_v40  ;;  %v3722_v14 = vpop.xlane.xlu1 %3721 }
 0x5b0   : > { %v3744_v61 = vsub.f32 %v7351_v37, %v3722_v14  ;;  %6403 = vpow2.f32 %v3762_v12 }
 0x5b2   : > { %v3772_v17 = vmul.f32 1.442695, %v3744_v61 }
 0x5b3   : > { %v7412_v47 = vpop.eup %6395  ;;  %v3725_v48 = vpop.xlane.xlu0 %3724 }
 0x5b4   : > { %v3804_v46 = vsel %vm3683_vm3, %v7412_v47, 0.0  ;;  %v3716_v44 = vpop.xlane.xlu1 %3715  ;;  %6405 = vpow2.f32 %v3772_v17  ;;  %v3745_v8 = vsub.f32 %v7357_v39, %v3725_v48 }
 0x5b5   : > { %3805 = vadd.xlane.f32.xlu1 %v3804_v46  ;;  %v3742_v50 = vsub.f32 %v7335_v21, %v3716_v44 }
 0x5b6   : > { %v3774_v25 = vmul.f32 1.442695, %v3745_v8 }
 0x5b7   : > { %v3768_v5 = vmul.f32 1.442695, %v3742_v50  ;;  %v3719_v42 = vpop.xlane.xlu0 %3718 }
 0x5b8   : > { %v7417_v51 = vpop.eup %6397  ;;  %v3743_v57 = vsub.f32 %v7341_v30, %v3719_v42  ;;  %v1391_v20 = vpop.permute.xlu1 %1390 }
 0x5b9   : > { %v3789_v37 = vsel %vm3683_vm3, %v7417_v51, 0.0  ;;  %v7421_v55 = vpop.eup %6399  ;;  %6407 = vpow2.f32 %v3768_v5 }
 0x5ba   : > { %3790 = vadd.xlane.f32.xlu0 %v3789_v37  ;;  %v3770_v43 = vmul.f32 1.442695, %v3743_v57  ;;  %v3807_v10 = vsel %vm3683_vm3, %v7421_v55, 0.0 }
 0x5bb   : > { %v7449_v26 = vpop.permute.xlu0 %1380 }
 0x5bc   : > { %v7426_v11 = vpop.eup %6401  ;;  %6409 = vpow2.f32 %v3770_v43 }
 0x5bd   : > { %v3798_v21 = vsel %vm3683_vm3, %v7426_v11, 0.0  ;;  %v7430_v1 = vpop.eup %6403  ;;  %6411 = vpow2.f32 %v3774_v25 }
 0x5be   : > { %3808 = vadd.xlane.f32.xlu0 %v3807_v10  ;;  %v3801_v45 = vsel %vm3683_vm3, %v7430_v1, 0.0 }
 0x5c1   : > { %v7434_v30 = vpop.eup %6405 }
 0x5c2   : > { %3799 = vadd.xlane.f32.xlu0 %v3798_v21  ;;  %v3816_v62 = vsel %vm3683_vm3, %v7434_v30, 0.0 }
 0x5c6   : > { %3802 = vadd.xlane.f32.xlu0 %v3801_v45  ;;  %v7436_v60 = vpop.eup %6407  ;;  %v1954_v45 = vcombine.low %v7023_v0, %v1391_v20 }
 0x5c7   : > { %v3810_v56 = vsel %vm3683_vm3, %v7436_v60, 0.0 }
 0x5c8   : > { %3811 = vadd.xlane.f32.xlu1 %v3810_v56 }
 0x5c9   : > { %v7442_v54 = vpop.eup %6409 }
 0x5ca   : > { %3817 = vadd.xlane.f32.xlu0 %v3816_v62  ;;  %v3813_v4 = vsel %vm3683_vm3, %v7442_v54, 0.0  ;;  %v7453_v18 = vpop.eup %6411  ;;  %v1962_v62 = vrot.slane %v1954_v45, %v6921_v23 }
 0x5cb   : > { %v3819_v39 = vsel %vm3683_vm3, %v7453_v18, 0.0 }
 0x5ce   : > { %3814 = vadd.xlane.f32.xlu0 %v3813_v4 }
 0x5d9   : > { %1404 = vrot.lane.b32.xlu1 %v6862_v6, %s6541_s21 }
 0x5e8   : > { %v3728_v34 = vpop.xlane.xlu1 %3727 }
 0x5e9   : > { %v3746_v9 = vsub.f32 %v7353_v7, %v3728_v34 }
 0x5eb   : > { %v3776_v32 = vmul.f32 1.442695, %v3746_v9 }
 0x5ec   : > { %v3731_v27 = vpop.xlane.xlu0 %3730  ;;  %v7465_v35 = vpop.permute.xlu1 %1392 }
 0x5ed   : > { %6413 = vpow2.f32 %v3776_v32  ;;  %v3747_v33 = vsub.f32 %v7359_v59, %v3731_v27 }
 0x5ef   : > { %v3778_v19 = vmul.f32 1.442695, %v3747_v33 }
 0x5f0   : > { %v1403_v59 = vpop.permute.xlu0 %1402 }
 0x5f1   : > { %6415 = vpow2.f32 %v3778_v19  ;;  %v1971_v43 = vcombine.high %v7379_v3, %v1403_v59 }
 0x5fa   : > { %v7455_v38 = vpop.eup %6413 }
 0x5fb   : > { %v3822_v22 = vsel %vm3683_vm3, %v7455_v38, 0.0 }
 0x5fc   : > { %3823 = vadd.xlane.f32.xlu0 %v3822_v22 }
 0x5fd   : > { %3820 = vadd.xlane.f32.xlu1 %v3819_v39 }
 0x5fe   : > { %v7461_v7 = vpop.eup %6415 }
 0x5ff   : > { %v3825_v28 = vsel %vm3683_vm3, %v7461_v7, 0.0 }
 0x600   : > { %3826 = vadd.xlane.f32.xlu0 %v3825_v28 }
 0x62c   : > { %v3782_v41 = vpop.xlane.xlu1 %3781 }
 0x62d   : > { %6417 = vrcp.f32 %v3782_v41 }
 0x630   : > { %v3794_v40 = vpop.xlane.xlu0 %3793 }
 0x634   : > { %v3785_v12 = vpop.xlane.xlu0 %3784  ;;  %v3797_v14 = vpop.xlane.xlu1 %3796 }
 0x635   : > { %6419 = vrcp.f32 %v3785_v12  ;;  %v2158_v12 = vcombine.low %v6862_v6, %v7465_v35 }
 0x636   : > { %6421 = vrcp.f32 %v3797_v14  ;;  %v2159_v14 = vcombine.high %v6862_v6, %v7465_v35 }
 0x637   : > { %6423 = vrcp.f32 %v3794_v40  ;;  %v2166_v6 = vrot.slane %v2158_v12, %v6921_v23 }
 0x638   : > { %v3788_v44 = vpop.xlane.xlu1 %3787  ;;  %v2173_v35 = vrot.slane %v2159_v14, %v6921_v23 }
 0x639   : > { %6425 = vrcp.f32 %v3788_v44 }
 0x63a   : > { %v6418_v61 = vpop.eup %6417 }
 0x63b   : > { %v3844_v17 = vmul.f32 %v6418_v61, %v7386_v63 }
 0x642   : > { %v6420_v46 = vpop.eup %6419 }
 0x643   : > { %v3845_v48 = vmul.f32 %v6420_v46, %v7394_v2  ;;  %v6422_v5 = vpop.eup %6421  ;;  %v3791_v37 = vpop.xlane.xlu0 %3790  ;;  %v1970_v2 = vcombine.low %v7379_v3, %v1403_v59 }
 0x644   : > { %v6424_v42 = vpop.eup %6423  ;;  %v3849_v57 = vmul.f32 %v6422_v5, %v7396_v24  ;;  %6427 = vrcp.f32 %v3791_v37  ;;  %v1985_v24 = vrot.slane %v1971_v43, %v6921_v23 }
 0x645   : > { %v3860_v50 = vpack.c.bf16 %v3845_v48, %v3844_v17  ;;  %v3848_v63 = vmul.f32 %v6424_v42, %v7390_v29  ;;  %v1978_v56 = vrot.slane %v1970_v2, %v6921_v23 }
 0x646   : > { %v6426_v25 = vpop.eup %6425 }
 0x647   : > { %6036 = vmatmul.mubr.msk.bf16.vlgmr.msra.gmra.mxu1 %vm3683_vm3, %v3860_v50  ;;  %v3809_v10 = vpop.xlane.xlu0 %3808  ;;  %v3862_v21 = vpack.c.bf16 %v3849_v57, %v3848_v63  ;;  %v1986_v4 = vcombine.low %v1962_v62, %v1978_v56  ;;  %v1987_v8 = vcombine.high %v1962_v62, %v1978_v56  ;;  %v3846_v19 = vmul.f32 %v6426_v25, %v7403_v15 }
 0x648   : > { %6046 = vmatpush3.bf16.msra.mxu1 %v7301_v49  ;;  %6047 = vmatprep.mubr.msk.bf16.mxu1 %vm6545_vm1, %v6544_v31  ;;  %v1955_v49 = vcombine.high %v7023_v0, %v1391_v20  ;;  %v3806_v0 = vpop.xlane.xlu1 %3805 }
 0x649   : > { %6057 = vmatprep.subr.bf16.mxu1 %v6544_v31  ;;  %v1994_v27 = vrot.slane %v1986_v4, %v6930_v36  ;;  %v2001_v33 = vrot.slane %v1987_v8, %v6930_v36 }
 0x64a   : > { %v1969_v3 = vrot.slane %v1955_v49, %v6921_v23 }
 0x64b   : > { %v3800_v29 = vpop.xlane.xlu0 %3799  ;;  %v2906_v61 = vcombine.low %v1994_v27, %v2001_v33  ;;  %v5771_v15 = vcombine.high %v1994_v27, %v2001_v33 }
 0x64c   : > { %v2002_v34 = vcombine.low %v1969_v3, %v1985_v24  ;;  %v2003_v9 = vcombine.high %v1969_v3, %v1985_v24  ;;  %6429 = vrcp.f32 %v3800_v29 }
 0x64d   : > { %v2913_v5 = vrot.slane %v2906_v61, %v6921_v23  ;;  %v2921_v37 = vrot.slane %v5771_v15, %v6921_v23 }
 0x64e   : > { %v2010_v22 = vrot.slane %v2002_v34, %v6930_v36  ;;  %v2017_v28 = vrot.slane %v2003_v9, %v6930_v36 }
 0x64f   : > { %6048 = vmatmul.mubr.msk.bf16.vlgmr.msra.gmra.mxu1 %vm3683_vm3, %v3862_v21  ;;  %v3803_v20 = vpop.xlane.xlu0 %3802  ;;  %v2938_v4 = vcombine.low %v2913_v5, %v2921_v37 }
 0x650   : > { %6059 = vmatprep.mubr.msk.bf16.mxu1 %vm6545_vm1, %v6544_v31  ;;  %6431 = vrcp.f32 %v3803_v20  ;;  %v2922_v46 = vcombine.low %v2010_v22, %v2017_v28 }
 0x651   : > { %v6428_v32 = vpop.eup %6427  ;;  %v3812_v59 = vpop.xlane.xlu1 %3811  ;;  %6433 = vrcp.f32 %v3809_v10 }
 0x652   : > { %v3847_v39 = vmul.f32 %v6428_v32, %v7417_v51  ;;  %v5772_v51 = vcombine.high %v2010_v22, %v2017_v28  ;;  %v2929_v57 = vrot.slane %v2922_v46, %v6921_v23 }
 0x653   : > { %v7493_v40 = vpop.xlane.xlu0 %3817 }
 0x654   : > { %v3861_v41 = vpack.c.bf16 %v3847_v39, %v3846_v19  ;;  %v2939_v39 = vcombine.high %v2913_v5, %v2921_v37 }
 0x655   : > { %v1405_v17 = vpop.permute.xlu1 %1404 }
 0x656   : > { %6042 = vmatmul.mubr.msk.bf16.vlgmr.msra.gmra.mxu0 %vm3683_vm3, %v3861_v41  ;;  %v2174_v44 = vcombine.low %v7449_v26, %v1405_v17  ;;  %v2175_v50 = vcombine.high %v7449_v26, %v1405_v17  ;;  %v2937_v26 = vrot.slane %v5772_v51, %v6921_v23 }
 0x657   : > { %6052 = vmatpush3.bf16.msra.mxu0 %v7303_v16  ;;  %v3815_v48 = vpop.xlane.xlu0 %3814  ;;  %6053 = vmatprep.mubr.msk.bf16.mxu0 %vm6545_vm1, %v6544_v31 }
 0x658   : > { %6063 = vmatprep.subr.bf16.mxu0 %v6544_v31  ;;  %6435 = vrcp.f32 %v3815_v48  ;;  %v2182_v16 = vrot.slane %v2174_v44, %v6921_v23  ;;  %v2189_v42 = vrot.slane %v2175_v50, %v6921_v23  ;;  %v2954_v8 = vcombine.low %v2929_v57, %v2937_v26 }
 0x659   : > { %6437 = vrcp.f32 %v3806_v0  ;;  %v6430_v63 = vpop.eup %6429  ;;  %v2955_v22 = vcombine.high %v2929_v57, %v2937_v26  ;;  %v2953_v48 = vrot.slane %v2939_v39, %v6930_v36 }
 0x65a   : > { %6439 = vrcp.f32 %v3812_v59  ;;  %v2190_v2 = vcombine.low %v2166_v6, %v2182_v16  ;;  %v2191_v43 = vcombine.high %v2166_v6, %v2182_v16  ;;  %v2206_v10 = vcombine.low %v2173_v35, %v2189_v42 }
 0x65b   : > { %v2207_v21 = vcombine.high %v2173_v35, %v2189_v42  ;;  %v3850_v62 = vmul.f32 %v6430_v63, %v7426_v11  ;;  %v2946_v11 = vrot.slane %v2938_v4, %v6930_v36  ;;  %v2969_v44 = vrot.slane %v2955_v22, %v6930_v36 }
 0x65c   : > { %v2198_v49 = vrot.slane %v2190_v2, %v6930_v36  ;;  %v2205_v56 = vrot.slane %v2191_v43, %v6930_v36  ;;  %v2214_v24 = vrot.slane %v2206_v10, %v6930_v36  ;;  %6441 = vrcp.f32 %v7493_v40 }
 0x65d   : > { %v6432_v45 = vpop.eup %6431  ;;  %v2221_v29 = vrot.slane %v2207_v21, %v6930_v36 }
 0x65e   : > { %v3851_v3 = vmul.f32 %v6432_v45, %v7430_v1  ;;  %v2974_v25 = vcombine.low %v2198_v49, %v2205_v56  ;;  %v5773_v34 = vcombine.high %v2198_v49, %v2205_v56  ;;  %v2962_v1 = vrot.slane %v2954_v8, %v6930_v36  ;;  %v6434_v14 = vpop.eup %6433 }
 0x65f   : > { %v2990_v9 = vcombine.low %v2214_v24, %v2221_v29  ;;  %v5774_v0 = vcombine.high %v2214_v24, %v2221_v29  ;;  %v3853_v37 = vmul.f32 %v6434_v14, %v7421_v55  ;;  %v2972_v45 = vcombine.low %v2953_v48, %v2969_v44 }
 0x660   : > { %v3863_v20 = vpack.c.bf16 %v3851_v3, %v3850_v62  ;;  %v2981_v32 = vrot.slane %v2974_v25, %v6921_v23  ;;  %v2989_v27 = vrot.slane %v5773_v34, %v6921_v23  ;;  %v2970_v35 = vcombine.low %v2946_v11, %v2962_v1 }
 0x661   : > { %v2997_v33 = vrot.slane %v2990_v9, %v6921_v23  ;;  %v3005_v19 = vrot.slane %v5774_v0, %v6921_v23  ;;  %v2971_v16 = vcombine.high %v2946_v11, %v2962_v1  ;;  %v2973_v49 = vcombine.high %v2953_v48, %v2969_v44 }
 0x662   : > { %6054 = vmatmul.mubr.msk.bf16.vlgmr.msra.gmra.mxu0 %vm3683_vm3, %v3863_v20  ;;  %v3006_v28 = vcombine.low %v2981_v32, %v2989_v27  ;;  %v3007_v41 = vcombine.high %v2981_v32, %v2989_v27 }
 0x663   : > { %v3022_v59 = vcombine.low %v2997_v33, %v3005_v19  ;;  %6065 = vmatprep.mubr.msk.bf16.mxu0 %vm6545_vm1, %v6544_v31  ;;  %v3023_v12 = vcombine.high %v2997_v33, %v3005_v19 }
 0x664   : > { %v3014_v15 = vrot.slane %v3006_v28, %v6930_v36  ;;  %v3021_v51 = vrot.slane %v3007_v41, %v6930_v36 }
 0x665   : > { %v6436_v61 = vpop.eup %6435  ;;  %v3030_v46 = vrot.slane %v3022_v59, %v6930_v36  ;;  %v3037_v50 = vrot.slane %v3023_v12, %v6930_v36 }
 0x666   : > { %v6438_v17 = vpop.eup %6437  ;;  %v3855_v57 = vmul.f32 %v6436_v61, %v7442_v54 }
 0x667   : > { %v6440_v6 = vpop.eup %6439  ;;  %v3038_v5 = vcombine.low %v3014_v15, %v3030_v46  ;;  %v3039_v42 = vcombine.high %v3014_v15, %v3030_v46  ;;  %v3040_v2 = vcombine.low %v3021_v51, %v3037_v50  ;;  %v3041_v43 = vcombine.high %v3021_v51, %v3037_v50 }
 0x668   : > { %v3852_v10 = vmul.f32 %v6438_v17, %v7412_v47  ;;  %v3854_v21 = vmul.f32 %v6440_v6, %v7436_v60 }
 0x669   : > { %v3054_v26 = vpack.c.bf16 %v3038_v5, %v2970_v35  ;;  %v3055_v63 = vpack.c.bf16 %v3039_v42, %v2971_v16  ;;  %v3056_v55 = vpack.c.bf16 %v3040_v2, %v2972_v45  ;;  %v3057_v54 = vpack.c.bf16 %v3041_v43, %v2973_v49  ;;  %v6442_v62 = vpop.eup %6441 }
 0x66a   : > { %v3864_v56 = vpack.c.bf16 %v3853_v37, %v3852_v10  ;;  %v3865_v24 = vpack.c.bf16 %v3855_v57, %v3854_v21  ;;  %v3856_v4 = vmul.f32 %v6442_v62, %v7434_v30 }
 0x66b   : > { %6058 = vmatpush3.bf16.msra.mxu1 %v3054_v26  ;;  %6064 = vmatpush3.bf16.msra.mxu0 %v3055_v63 }
 0x66c   : > { %6069 = vmatprep.subr.bf16.mxu1 %v6544_v31  ;;  %6075 = vmatprep.subr.bf16.mxu0 %v6544_v31 }
 0x66e   : > { %6060 = vmatmul.mubr.msk.bf16.vlgmr.msra.gmra.mxu1 %vm3683_vm3, %v3864_v56  ;;  %6066 = vmatmul.mubr.msk.bf16.vlgmr.msra.gmra.mxu0 %vm3683_vm3, %v3865_v24 }
 0x66f   : > { %6070 = vmatpush3.bf16.msra.mxu1 %v3056_v55  ;;  %6076 = vmatpush3.bf16.msra.mxu0 %v3057_v54 }
 0x670   : > { %6071 = vmatprep.mubr.msk.bf16.mxu1 %vm6545_vm1, %v6544_v31  ;;  %6077 = vmatprep.mubr.msk.bf16.mxu0 %vm6545_vm1, %v6544_v31 }
 0x685   : > { %v3824_v60 = vpop.xlane.xlu0 %3823 }
 0x686   : > { %v3821_v47 = vpop.xlane.xlu1 %3820 }
 0x687   : > { %6443 = vrcp.f32 %v3821_v47 }
 0x688   : > { %6445 = vrcp.f32 %v3824_v60 }
 0x689   : > { %v3827_v29 = vpop.xlane.xlu0 %3826 }
 0x68a   : > { %6447 = vrcp.f32 %v3827_v29 }
 0x694   : > { %v6444_v3 = vpop.eup %6443 }
 0x695   : > { %v3857_v8 = vmul.f32 %v6444_v3, %v7453_v18  ;;  %v6446_v25 = vpop.eup %6445 }
 0x696   : > { %v3858_v31 = vmul.f32 %v6446_v25, %v7455_v38 }
 0x697   : > { %v3866_v34 = vpack.c.bf16 %v3857_v8, %v3856_v4  ;;  %v6448_v9 = vpop.eup %6447 }
 0x698   : > { %v3859_v40 = vmul.f32 %v6448_v9, %v7461_v7 }
 0x699   : > { %6072 = vmatmul.mubr.msk.bf16.vlgmr.msra.gmra.mxu1 %vm3683_vm3, %v3866_v34 }
 0x69a   : > { %v3867_v0 = vpack.c.bf16 %v3859_v40, %v3858_v31 }
 0x69c   : > { %6078 = vmatmul.mubr.msk.bf16.vlgmr.msra.gmra.mxu0 %vm3683_vm3, %v3867_v0 }
 0x69d   : > { %5160 = vmatprep.mubr.bf16.mxu0 %v6538_v13 }
 0x707   : > { %v3905_v20 = vpop.f32.mrf.mxu1 }
 0x709   : > { %v6037_v32 = vpop.f32.mrf.mxu1 }
 0x70b   : > { %v3908_v27 = vpop.f32.mrf.mxu1 }
 0x70d   : > { %v6038_v30 = vpop.f32.mrf.mxu1 }
 0x70f   : > { %v3993_v33 = vpop.f32.mrf.mxu1 }
 0x710   : > { %v4220_v38 = vcombine.low %v3905_v20, %v3993_v33  ;;  %v4221_v59 = vcombine.high %v3905_v20, %v3993_v33 }
 0x711   : > { %v6049_v18 = vpop.f32.mrf.mxu1 }
 0x712   : > { %v4228_v61 = vrot.slane %v4220_v38, %v6921_v23  ;;  %v4235_v15 = vrot.slane %v4221_v59, %v6921_v23 }
 0x713   : > { %v3996_v19 = vpop.f32.mrf.mxu1 }
 0x714   : > { %v4288_v17 = vcombine.low %v3908_v27, %v3996_v19  ;;  %v4289_v48 = vcombine.high %v3908_v27, %v3996_v19 }
 0x715   : > { %v6050_v11 = vpop.f32.mrf.mxu1 }
 0x716   : > { %v3949_v1 = vpop.f32.mrf.mxu0  ;;  %v4296_v43 = vrot.slane %v4288_v17, %v6921_v23  ;;  %v4303_v10 = vrot.slane %v4289_v48, %v6921_v23 }
 0x718   : > { %v6043_v39 = vpop.f32.mrf.mxu0 }
 0x71a   : > { %v3952_v22 = vpop.f32.mrf.mxu0 }
 0x71c   : > { %v6044_v28 = vpop.f32.mrf.mxu0 }
 0x722   : > { %v4037_v7 = vpop.f32.mrf.mxu0 }
 0x723   : > { %v4236_v41 = vcombine.low %v3949_v1, %v4037_v7  ;;  %v4237_v12 = vcombine.high %v3949_v1, %v4037_v7 }
 0x724   : > { %v6055_v14 = vpop.f32.mrf.mxu0 }
 0x725   : > { %v4244_v46 = vrot.slane %v4236_v41, %v6921_v23  ;;  %v4251_v51 = vrot.slane %v4237_v12, %v6921_v23 }
 0x726   : > { %v4040_v44 = vpop.f32.mrf.mxu0 }
 0x727   : > { %v4252_v50 = vcombine.low %v4228_v61, %v4244_v46  ;;  %v4253_v6 = vcombine.high %v4228_v61, %v4244_v46  ;;  %v4268_v35 = vcombine.low %v4235_v15, %v4251_v51  ;;  %v4269_v5 = vcombine.high %v4235_v15, %v4251_v51 }
 0x728   : > { %v4304_v16 = vcombine.low %v3952_v22, %v4040_v44  ;;  %v4305_v42 = vcombine.high %v3952_v22, %v4040_v44  ;;  %v6056_v37 = vpop.f32.mrf.mxu0 }
 0x729   : > { %v4260_v57 = vrot.slane %v4252_v50, %v6930_v36  ;;  %v4267_v26 = vrot.slane %v4253_v6, %v6930_v36  ;;  %v4276_v63 = vrot.slane %v4268_v35, %v6930_v36  ;;  %v4283_v2 = vrot.slane %v4269_v5, %v6930_v36  ;;  %v6329_v50 = vld [vmem:[%s6672_s26 + $0x38] sm:$0xff]   ;;  %v6330_v6 = vld [vmem:[%s6672_s26 + $0x30] sm:$0xff]  }
 0x72a   : > { %v4312_v21 = vrot.slane %v4304_v16, %v6921_v23  ;;  %v4319_v45 = vrot.slane %v4305_v42, %v6921_v23  ;;  %6081 = vmatprep.subr.bf16.mxu1 %v6329_v50 }
 0x72b   : > { %v4492_v49 = vcombine.low %v4260_v57, %v4267_v26  ;;  %v5791_v56 = vcombine.high %v4260_v57, %v4267_v26  ;;  %v4508_v24 = vcombine.low %v4276_v63, %v4283_v2  ;;  %v5792_v55 = vcombine.high %v4276_v63, %v4283_v2  ;;  %6082 = vmatpush3.bf16.msra.mxu1 %v6329_v50 }
 0x72c   : > { %v4320_v54 = vcombine.low %v4296_v43, %v4312_v21  ;;  %v4321_v47 = vcombine.high %v4296_v43, %v4312_v21  ;;  %v4336_v60 = vcombine.low %v4303_v10, %v4319_v45  ;;  %v4337_v29 = vcombine.high %v4303_v10, %v4319_v45  ;;  %6083 = vmatprep.subr.bf16.mxu1 %v6330_v6  ;;  %v6331_v43 = vld [vmem:[%s6672_s26 + $0x28] sm:$0xff]  }
 0x72d   : > { %v4499_v62 = vrot.slane %v4492_v49, %v6921_v23  ;;  %v4507_v3 = vrot.slane %v5791_v56, %v6921_v23  ;;  %v4515_v4 = vrot.slane %v4508_v24, %v6921_v23  ;;  %v4523_v8 = vrot.slane %v5792_v55, %v6921_v23  ;;  %v6332_v49 = vld [vmem:[%s6672_s26 + $0x20] sm:$0xff]   ;;  %v6333_v24 = vld [vmem:[%s6672_s26 + $0x18] sm:$0xff]   ;;  %v6334_v55 = vld [vmem:[%s6672_s26 + $0x10] sm:$0xff]  }
 0x72e   : > { %v4328_v25 = vrot.slane %v4320_v54, %v6930_v36  ;;  %v4335_v34 = vrot.slane %v4321_v47, %v6930_v36  ;;  %v4344_v9 = vrot.slane %v4336_v60, %v6930_v36  ;;  %v4351_v31 = vrot.slane %v4337_v29, %v6930_v36  ;;  %v7575_v40 = vpop.f32.mrf.mxu1  ;;  %v7577_v0 = vpop.f32.mrf.mxu0 }
 0x72f   : > { %v4524_v20 = vcombine.low %v4499_v62, %v4507_v3  ;;  %v4540_v32 = vcombine.low %v4515_v4, %v4523_v8  ;;  %v4525_v14 = vcombine.high %v4499_v62, %v4507_v3  ;;  %v4541_v61 = vcombine.high %v4515_v4, %v4523_v8  ;;  %6084 = vmatpush3.bf16.msra.mxu1 %v6330_v6 }
 0x730   : > { %v4560_v27 = vcombine.low %v4328_v25, %v4335_v34  ;;  %v5793_v30 = vcombine.high %v4328_v25, %v4335_v34  ;;  %v4576_v33 = vcombine.low %v4344_v9, %v4351_v31  ;;  %v5794_v18 = vcombine.high %v4344_v9, %v4351_v31  ;;  %v6061_v19 = vpop.f32.mrf.mxu1  ;;  %v6067_v11 = vpop.f32.mrf.mxu0  ;;  %6085 = vmatprep.subr.bf16.mxu1 %v6331_v43 }
 0x731   : > { %v7580_v1 = vrot.slane %v4524_v20, %v6930_v36  ;;  %v7583_v39 = vrot.slane %v4540_v32, %v6930_v36  ;;  %v7610_v37 = vrot.slane %v4525_v14, %v6930_v36  ;;  %v7619_v2 = vrot.slane %v4541_v61, %v6930_v36 }
 0x732   : > { %v4567_v22 = vrot.slane %v4560_v27, %v6921_v23  ;;  %v4575_v28 = vrot.slane %v5793_v30, %v6921_v23  ;;  %v4583_v38 = vrot.slane %v4576_v33, %v6921_v23  ;;  %v4591_v59 = vrot.slane %v5794_v18, %v6921_v23  ;;  %v7589_v7 = vpop.f32.mrf.mxu1  ;;  %v7591_v41 = vpop.f32.mrf.mxu0 }
 0x733   : > { %v4556_v12 = vcombine.low %v7580_v1, %v7583_v39  ;;  %v4557_v57 = vcombine.high %v7580_v1, %v7583_v39  ;;  %v4558_v45 = vcombine.low %v7610_v37, %v7619_v2  ;;  %6086 = vmatpush3.bf16.msra.mxu1 %v6331_v43 }
 0x734   : > { %v6062_v15 = vpop.f32.mrf.mxu1  ;;  %v6068_v46 = vpop.f32.mrf.mxu0  ;;  %v4592_v51 = vcombine.low %v4567_v22, %v4575_v28  ;;  %v4608_v17 = vcombine.low %v4583_v38, %v4591_v59  ;;  %v4593_v48 = vcombine.high %v4567_v22, %v4575_v28  ;;  %v4609_v44 = vcombine.high %v4583_v38, %v4591_v59  ;;  %6087 = vmatprep.subr.bf16.mxu1 %v6332_v49 }
 0x736   : > { %v7598_v35 = vrot.slane %v4592_v51, %v6930_v36  ;;  %v7601_v5 = vrot.slane %v4608_v17, %v6930_v36  ;;  %v7604_v16 = vrot.slane %v4593_v48, %v6930_v36  ;;  %v7607_v42 = vrot.slane %v4609_v44, %v6930_v36 }
 0x737   : > { %6088 = vmatpush3.bf16.msra.mxu1 %v6332_v49 }
 0x738   : > { %v4625_v26 = vcombine.high %v7598_v35, %v7601_v5  ;;  %v4624_v63 = vcombine.low %v7598_v35, %v7601_v5  ;;  %v4626_v21 = vcombine.low %v7604_v16, %v7607_v42  ;;  %6089 = vmatprep.subr.bf16.mxu1 %v6333_v24 }
 0x73a   : > { %v6267_v10 = vpack.i.bf16 %v4625_v26, %v4557_v57  ;;  %v6272_v56 = vpack.i.bf16 %v4626_v21, %v4558_v45 }
 0x73b   : > { %6090 = vmatpush3.bf16.msra.mxu1 %v6333_v24 }
 0x73c   : > { %6268 = vrot.lane.b32.xlu1 %v6267_v10, %s6541_s21  ;;  %6091 = vmatprep.subr.bf16.mxu1 %v6334_v55 }
 0x73f   : > { %6092 = vmatpush3.bf16.msra.mxu1 %v6334_v55 }
 0x740   : > { %6273 = vrot.lane.b32.xlu1 %v6272_v56, %s6539_s30 }
 0x759   : > { %v4169_v54 = vpop.f32.mrf.mxu1 }
 0x75a   : > { %v4356_v60 = vcombine.low %v7575_v40, %v4169_v54  ;;  %v4357_v29 = vcombine.high %v7575_v40, %v4169_v54 }
 0x75b   : > { %v6073_v47 = vpop.f32.mrf.mxu1 }
 0x75c   : > { %v4213_v3 = vpop.f32.mrf.mxu0  ;;  %v4364_v9 = vrot.slane %v4356_v60, %v6921_v23  ;;  %v4371_v31 = vrot.slane %v4357_v29, %v6921_v23 }
 0x75d   : > { %v4172_v62 = vpop.f32.mrf.mxu1  ;;  %v4372_v4 = vcombine.low %v7577_v0, %v4213_v3  ;;  %v4373_v8 = vcombine.high %v7577_v0, %v4213_v3 }
 0x75e   : > { %v6079_v34 = vpop.f32.mrf.mxu0  ;;  %v4424_v27 = vcombine.low %v7589_v7, %v4172_v62  ;;  %v4425_v40 = vcombine.high %v7589_v7, %v4172_v62 }
 0x75f   : > { %v6074_v25 = vpop.f32.mrf.mxu1  ;;  %v4380_v20 = vrot.slane %v4372_v4, %v6921_v23  ;;  %v4387_v32 = vrot.slane %v4373_v8, %v6921_v23 }
 0x760   : > { %v4216_v30 = vpop.f32.mrf.mxu0  ;;  %v4432_v7 = vrot.slane %v4424_v27, %v6921_v23  ;;  %v4439_v15 = vrot.slane %v4425_v40, %v6921_v23 }
 0x761   : > { %v4388_v33 = vcombine.low %v4364_v9, %v4380_v20  ;;  %v4389_v18 = vcombine.high %v4364_v9, %v4380_v20  ;;  %v4404_v19 = vcombine.low %v4371_v31, %v4387_v32  ;;  %v4405_v11 = vcombine.high %v4371_v31, %v4387_v32  ;;  %v6335_v9 = vld [vmem:[%s6672_s26 + $0x8] sm:$0xff]  }
 0x762   : > { %v4440_v0 = vcombine.low %v7591_v41, %v4216_v30  ;;  %v4441_v22 = vcombine.high %v7591_v41, %v4216_v30  ;;  %v6080_v28 = vpop.f32.mrf.mxu0  ;;  %6093 = vmatprep.subr.bf16.mxu1 %v6335_v9 }
 0x763   : > { %v4396_v38 = vrot.slane %v4388_v33, %v6930_v36  ;;  %v4403_v59 = vrot.slane %v4389_v18, %v6930_v36  ;;  %v4412_v14 = vrot.slane %v4404_v19, %v6930_v36  ;;  %v4419_v61 = vrot.slane %v4405_v11, %v6930_v36  ;;  %6094 = vmatpush3.bf16.msra.mxu1 %v6335_v9 }
 0x764   : > { %v4448_v46 = vrot.slane %v4440_v0, %v6921_v23  ;;  %v4455_v51 = vrot.slane %v4441_v22, %v6921_v23 }
 0x765   : > { %v4628_v17 = vcombine.low %v4396_v38, %v4403_v59  ;;  %v5795_v48 = vcombine.high %v4396_v38, %v4403_v59  ;;  %v4644_v41 = vcombine.low %v4412_v14, %v4419_v61  ;;  %v5796_v44 = vcombine.high %v4412_v14, %v4419_v61 }
 0x766   : > { %v4456_v50 = vcombine.low %v4432_v7, %v4448_v46  ;;  %v4457_v6 = vcombine.high %v4432_v7, %v4448_v46  ;;  %v4472_v57 = vcombine.low %v4439_v15, %v4455_v51  ;;  %v4473_v26 = vcombine.high %v4439_v15, %v4455_v51 }
 0x767   : > { %v4635_v43 = vrot.slane %v4628_v17, %v6921_v23  ;;  %v4643_v10 = vrot.slane %v5795_v48, %v6921_v23  ;;  %v4651_v21 = vrot.slane %v4644_v41, %v6921_v23  ;;  %v4659_v45 = vrot.slane %v5796_v44, %v6921_v23 }
 0x768   : > { %v4464_v49 = vrot.slane %v4456_v50, %v6930_v36  ;;  %v4471_v56 = vrot.slane %v4457_v6, %v6930_v36  ;;  %v4480_v24 = vrot.slane %v4472_v57, %v6930_v36  ;;  %v4487_v55 = vrot.slane %v4473_v26, %v6930_v36 }
 0x769   : > { %v4661_v54 = vcombine.high %v4635_v43, %v4643_v10  ;;  %v4677_v47 = vcombine.high %v4651_v21, %v4659_v45  ;;  %v4660_v60 = vcombine.low %v4635_v43, %v4643_v10  ;;  %v4676_v29 = vcombine.low %v4651_v21, %v4659_v45 }
 0x76a   : > { %v4696_v62 = vcombine.low %v4464_v49, %v4471_v56  ;;  %v5797_v3 = vcombine.high %v4464_v49, %v4471_v56  ;;  %v4712_v4 = vcombine.low %v4480_v24, %v4487_v55  ;;  %v5798_v8 = vcombine.high %v4480_v24, %v4487_v55 }
 0x76b   : > { %v4668_v25 = vrot.slane %v4660_v60, %v6930_v36  ;;  %v4684_v34 = vrot.slane %v4676_v29, %v6930_v36  ;;  %v4675_v40 = vrot.slane %v4661_v54, %v6930_v36  ;;  %v4691_v30 = vrot.slane %v4677_v47, %v6930_v36 }
 0x76c   : > { %v4703_v31 = vrot.slane %v4696_v62, %v6921_v23  ;;  %v4711_v20 = vrot.slane %v5797_v3, %v6921_v23  ;;  %v4719_v32 = vrot.slane %v4712_v4, %v6921_v23  ;;  %v4727_v27 = vrot.slane %v5798_v8, %v6921_v23  ;;  %v6336_v23 = vld [vmem:[%s6672_s26] sm:$0xff]  }
 0x76d   : > { %v4692_v33 = vcombine.low %v4668_v25, %v4684_v34  ;;  %v4694_v14 = vcombine.low %v4675_v40, %v4691_v30  ;;  %v4693_v7 = vcombine.high %v4668_v25, %v4684_v34  ;;  %6095 = vmatprep.subr.bf16.mxu1 %v6336_v23  ;;  %v4627_v41 = vcombine.high %v7604_v16, %v7607_v42 }
 0x76e   : > { %v4729_v18 = vcombine.high %v4703_v31, %v4711_v20  ;;  %v4745_v19 = vcombine.high %v4719_v32, %v4727_v27  ;;  %v4728_v11 = vcombine.low %v4703_v31, %v4711_v20  ;;  %v4744_v0 = vcombine.low %v4719_v32, %v4727_v27  ;;  %6096 = vmatpush3.bf16.msra.mxu1 %v6336_v23 }
 0x76f   : > { %v4695_v44 = vcombine.high %v4675_v40, %v4691_v30 }
 0x770   : > { %v4743_v22 = vrot.slane %v4729_v18, %v6930_v36  ;;  %v4759_v28 = vrot.slane %v4745_v19, %v6930_v36  ;;  %v4736_v38 = vrot.slane %v4728_v11, %v6930_v36  ;;  %v4752_v59 = vrot.slane %v4744_v0, %v6930_v36  ;;  %v6489_v18 = vld [vmem:[#allocation2] sm:$0xff] }
 0x771   : > { %v4559_v36 = vcombine.high %v7610_v37, %v7619_v2 }
 0x772   : > { %v4762_v61 = vcombine.low %v4743_v22, %v4759_v28  ;;  %v4761_v15 = vcombine.high %v4736_v38, %v4752_v59  ;;  %v4760_v46 = vcombine.low %v4736_v38, %v4752_v59  ;;  %v4763_v48 = vcombine.high %v4743_v22, %v4759_v28  ;;  %v6490_v22 = vld [vmem:[#allocation2 + $0x10] sm:$0xff]  ;;  %v6491_v59 = vld [vmem:[#allocation2 + $0x8] sm:$0xff] }
 0x773   : > { %v6282_v6 = vpack.i.bf16 %v4627_v41, %v4559_v36 }
 0x774   : > { %v6287_v51 = vpack.i.bf16 %v4762_v61, %v4694_v14  ;;  %v6277_v17 = vpack.i.bf16 %v4761_v15, %v4693_v7  ;;  %v6292_v50 = vpack.i.bf16 %v4763_v48, %v4695_v44  ;;  %v6492_v14 = vld [vmem:[#allocation2 + $0x18] sm:$0xff] }
 0x775   : > { %v6337_v7 = vld [vmem:[%s6700_s6 + $0x70] ss:$8 sps:$4 sm:$0xff]   ;;  %v6339_v15 = vld [vmem:[%s6700_s6 + $0x74] ss:$8 sps:$4 sm:$0xff]  }
 0x776   : > { %6288 = vrot.lane.b32.xlu1 %v6287_v51, %s6539_s30  ;;  %6278 = vrot.lane.b32.xlu0 %v6277_v17, %s6541_s21  ;;  %s7857_s30 = sld [smem:[#allocation13_spill]] (!%p5851_p5) }
 0x777   : > { %5128 = vmatprep.subr.bf16.mxu0 %v6339_v15 }
 0x778   : > { %5129 = vmatpush1.bf16.msra.mxu0 %v6337_v7 }
 0x77a   : > { %6293 = vrot.lane.b32.xlu1 %v6292_v50, %s6540_s19  ;;  %6283 = vrot.lane.b32.xlu0 %v6282_v6, %s6540_s19 }
 0x7ae   : > { %v6269_v57 = vpop.permute.xlu1 %6268 }
 0x7af   : > { %v6271_v43 = vunpack.i.h.bf16 %v6269_v57  ;;  %v6270_v10 = vunpack.i.l.bf16 %v6269_v57 }
 0x7b1   : > { %v4812_v54 = vsel %vm3330_vm2, %v4556_v12, %v6270_v10  ;;  %v4813_v47 = vsel %vm3330_vm2, %v4624_v63, %v6271_v43  ;;  %v5799_v63 = vld [vmem:[%s7854_s27] ss:$0 sm:$0xff] }
 0x7b2   : > { %v6274_v26 = vpop.permute.xlu1 %6273 }
 0x7b3   : > { %v6276_v49 = vunpack.i.h.bf16 %v6274_v26  ;;  %v6275_v56 = vunpack.i.l.bf16 %v6274_v26 }
 0x7b5   : > { %v4817_v25 = vsel %vm4816_vm4, %v4812_v54, %v6275_v56  ;;  %v4818_v34 = vsel %vm4816_vm4, %v4813_v47, %v6276_v49  ;;  %v6342_v49 = vld [vmem:[%s6700_s6 + $0x64] ss:$8 sps:$4 sm:$0xff]   ;;  %v6343_v56 = vld [vmem:[%s6700_s6 + $0x50] ss:$8 sps:$4 sm:$0xff]  }
 0x7b6   : > { %5130 = vmatprep.subr.bf16.mxu0 %v6342_v49  ;;  %v6349_v54 = vld [vmem:[%s6700_s6 + $0x30] ss:$8 sps:$4 sm:$0xff]   ;;  %v6354_v47 = vld [vmem:[%s6700_s6 + $0x24] ss:$8 sps:$4 sm:$0xff]  }
 0x7b7   : > { %v6373_v49 = vld [vmem:[%s6711_s5 + $0x48] sm:$0xff]  }
 0x7e8   : > { %v6289_v21 = vpop.permute.xlu1 %6288  ;;  %v6279_v16 = vpop.permute.xlu0 %6278 }
 0x7e9   : > { %v6281_v42 = vunpack.i.h.bf16 %v6279_v16  ;;  %v6280_v45 = vunpack.i.l.bf16 %v6279_v16  ;;  %v6291_v24 = vunpack.i.h.bf16 %v6289_v21  ;;  %v6290_v55 = vunpack.i.l.bf16 %v6289_v21 }
 0x7eb   : > { %v4814_v37 = vsel %vm3330_vm2, %v4692_v33, %v6280_v45  ;;  %v4815_v2 = vsel %vm3330_vm2, %v4760_v46, %v6281_v42  ;;  %v6340_v45 = vld [vmem:[%s6700_s6 + $0x60] ss:$8 sps:$4 sm:$0xff]  }
 0x7ec   : > { %v6294_v60 = vpop.permute.xlu1 %6293  ;;  %v6284_v29 = vpop.permute.xlu0 %6283  ;;  %v4819_v9 = vsel %vm4816_vm4, %v4814_v37, %v6290_v55  ;;  %v4820_v31 = vsel %vm4816_vm4, %v4815_v2, %v6291_v24  ;;  %5131 = vmatpush1.bf16.msra.mxu0 %v6340_v45  ;;  %v6345_v24 = vld [vmem:[%s6700_s6 + $0x54] ss:$8 sps:$4 sm:$0xff]   ;;  %v6346_v55 = vld [vmem:[%s6700_s6 + $0x40] ss:$8 sps:$4 sm:$0xff]   ;;  %v6348_v37 = vld [vmem:[%s6700_s6 + $0x44] ss:$8 sps:$4 sm:$0xff]  }
 0x7ed   : > { %v6296_v62 = vunpack.i.h.bf16 %v6294_v60  ;;  %v6295_v3 = vunpack.i.l.bf16 %v6294_v60  ;;  %v6286_v4 = vunpack.i.h.bf16 %v6284_v29  ;;  %v6285_v8 = vunpack.i.l.bf16 %v6284_v29  ;;  %5132 = vmatprep.subr.bf16.mxu0 %v6345_v24  ;;  %v6351_v2 = vld [vmem:[%s6700_s6 + $0x34] ss:$8 sps:$4 sm:$0xff]   ;;  %v6352_v60 = vld [vmem:[%s6700_s6 + $0x20] ss:$8 sps:$4 sm:$0xff]  }
 0x7ee   : > { %v6357_v29 = vld [vmem:[%s6700_s6 + $0x14] ss:$8 sps:$4 sm:$0xff]   ;;  %v6375_v24 = vld [vmem:[%s6711_s5 + $0x40] sm:$0xff]  }
 0x7ef   : > { %v4824_v1 = vsel %vm4821_vm5, %v4819_v9, %v6295_v3  ;;  %v4825_v39 = vsel %vm4821_vm5, %v4820_v31, %v6296_v62  ;;  %v4822_v12 = vsel %vm4821_vm5, %v4817_v25, %v6285_v8  ;;  %v4823_v20 = vsel %vm4821_vm5, %v4818_v34, %v6286_v4  ;;  %v6355_v62 = vld [vmem:[%s6700_s6 + $0x10] ss:$8 sps:$4 sm:$0xff]   ;;  %v6360_v3 = vld [vmem:[%s6700_s6 + $0x4] ss:$8 sps:$4 sm:$0xff]   ;;  %v6358_v4 = vld [vmem:[%s6700_s6] ss:$8 sps:$4 sm:$0xff]  }
 0x7f0   : > { %v4827_v32 = vpack.c.bf16 %v4825_v39, %v4824_v1  ;;  %v4826_v35 = vpack.c.bf16 %v4823_v20, %v4822_v12  ;;  %5133 = vmatpush1.bf16.msra.mxu0 %v6343_v56  ;;  %v6372_v45 = vld [vmem:[%s6711_s5 + $0x10] sm:$0xff]   ;;  %v6374_v56 = vld [vmem:[%s6711_s5 + $0x8] sm:$0xff]  }
 0x7f1   : > { %5134 = vmatprep.subr.bf16.mxu0 %v6348_v37  ;;  %v5036_v37 = vld [vmem:[%s6706_s23] sm:$0x3] }
 0x7f2   : > { %6097 = vmatprep.mubr.bf16.mxu1 %v4826_v35 }
 0x7f3   : > { %6098 = vmatmul.mubr.bf16.vlgmr.msra.gmra.mxu1 %v4827_v32 }
 0x7f4   : > { %5135 = vmatpush1.bf16.msra.mxu0 %v6346_v55  ;;  %v6376_v55 = vld [vmem:[%s6711_s5] sm:$0xff]  }
 0x7f5   : > { %5136 = vmatprep.subr.bf16.mxu0 %v6351_v2  ;;  %v5041_v2 = vrot.slane %v5036_v37, %v1047_v58 }
 0x7f8   : > { %5137 = vmatpush1.bf16.msra.mxu0 %v6349_v54  ;;  %v5045_v54 = vrot.slane %v5036_v37, %v1051_v53 }
 0x7f9   : > { %5138 = vmatprep.subr.bf16.mxu0 %v6354_v47 }
 0x7fc   : > { %5139 = vmatpush1.bf16.msra.mxu0 %v6352_v60 }
 0x7fd   : > { %5140 = vmatprep.subr.bf16.mxu0 %v6357_v29 }
 0x800   : > { %5141 = vmatpush1.bf16.msra.mxu0 %v6355_v62 }
 0x801   : > { %5142 = vmatprep.subr.bf16.mxu0 %v6360_v3 }
 0x804   : > { %5143 = vmatpush1.bf16.msra.mxu0 %v6358_v4 }
 0x8b3   : > { %v6099_v5 = vpop.f32.mrf.mxu1 }
 0x8b4   : > { %v4942_v33 = vadd.f32 %v6099_v5, %v5799_v63 }
 0x8b5   : > { %v4933_v27 = vpop.f32.mrf.mxu1 }
 0x8b6   : > { %v4934_v40 = vadd.f32 %v5799_v63, %v4933_v27  ;;  %v7699_v28 = vadd.f32 %v6490_v22, %v4942_v33 }
 0x8b7   : > { %v6100_v30 = vpop.f32.mrf.mxu1 }
 0x8b8   : > { %v7696_v19 = vadd.f32 %v6489_v18, %v4934_v40  ;;  %v4945_v38 = vadd.f32 %v6100_v30, %v5799_v63  ;;  %v5808_v40 = vld [vmem:[%s719_s24] ss:$0 sm:$0xff] }
 0x8b9   : > { %v4936_v11 = vpop.f32.mrf.mxu1 }
 0x8ba   : > { %v4937_v0 = vadd.f32 %v5799_v63, %v4936_v11  ;;  %4954 = vadd.xlane.f32.xlu0 %v7696_v19  ;;  %v7705_v61 = vadd.f32 %v6492_v14, %v4945_v38 }
 0x8bc   : > { %v7701_v23 = vadd.f32 %v6491_v59, %v4937_v0  ;;  %v5809_v0 = vld [vmem:[%s7855_s0] ss:$0 sm:$0xff] }
 0x8be   : > { %4956 = vadd.xlane.f32.xlu1 %v7701_v23  ;;  %4958 = vadd.xlane.f32.xlu0 %v7699_v28 }
 0x8c2   : > { %4960 = vadd.xlane.f32.xlu0 %v7705_v61 }
 0x943   : > { %v4955_v46 = vpop.xlane.xlu0 %4954 }
 0x944   : > { %v4962_v51 = vmul.f32 0.0078125, %v4955_v46 }
 0x946   : > { %v7711_v17 = vsub.f32 %v7696_v19, %v4962_v51 }
 0x947   : > { %v4957_v48 = vpop.xlane.xlu1 %4956  ;;  %v4959_v41 = vpop.xlane.xlu0 %4958 }
 0x948   : > { %v4963_v44 = vmul.f32 0.0078125, %v4957_v48  ;;  %v4964_v36 = vmul.f32 0.0078125, %v4959_v41  ;;  %v4970_v50 = vmul.f32 %v7711_v17, %v7711_v17 }
 0x94a   : > { %v4967_v6 = vsub.f32 %v7701_v23, %v4963_v44  ;;  %v7717_v57 = vsub.f32 %v7699_v28, %v4964_v36  ;;  %4974 = vadd.xlane.f32.xlu1 %v4970_v50  ;;  %v6361_v36 = vld [vmem:[%s6711_s5 + $0x78] sm:$0xff]  }
 0x94b   : > { %v4961_v26 = vpop.xlane.xlu0 %4960  ;;  %v6362_v50 = vld [vmem:[%s6711_s5 + $0x38] sm:$0xff]   ;;  %5921 = vmatprep.subr.bf16.mxu1 %v6361_v36 }
 0x94c   : > { %v4965_v43 = vmul.f32 0.0078125, %v4961_v26  ;;  %v4971_v10 = vmul.f32 %v4967_v6, %v4967_v6  ;;  %v4972_v21 = vmul.f32 %v7717_v57, %v7717_v57  ;;  %5922 = vmatpush3.bf16.msra.mxu1 %v6362_v50  ;;  %v6365_v26 = vld [vmem:[%s6711_s5 + $0x68] sm:$0xff]  }
 0x94e   : > { %v4969_v16 = vsub.f32 %v7705_v61, %v4965_v43  ;;  %4976 = vadd.xlane.f32.xlu0 %v4971_v10  ;;  %4978 = vadd.xlane.f32.xlu1 %v4972_v21  ;;  %v6367_v43 = vld [vmem:[%s6711_s5 + $0x60] sm:$0xff]   ;;  %v6369_v21 = vld [vmem:[%s6711_s5 + $0x58] sm:$0xff]  }
 0x94f   : > { %v6368_v10 = vld [vmem:[%s6711_s5 + $0x20] sm:$0xff]  }
 0x950   : > { %v4973_v42 = vmul.f32 %v4969_v16, %v4969_v16 }
 0x952   : > { %4980 = vadd.xlane.f32.xlu0 %v4973_v42  ;;  %v6371_v42 = vld [vmem:[%s6711_s5 + $0x50] sm:$0xff]  }
 0x9d3   : > { %v4975_v8 = vpop.xlane.xlu1 %4974 }
 0x9d4   : > { %v4982_v25 = vmul.f32 0.0078125, %v4975_v8 }
 0x9d6   : > { %v4986_v34 = vadd.f32 1e-06, %v4982_v25 }
 0x9d7   : > { %v4979_v9 = vpop.xlane.xlu1 %4978  ;;  %v4977_v31 = vpop.xlane.xlu0 %4976 }
 0x9d8   : > { %6449 = vrsqrt.f32 %v4986_v34  ;;  %v4984_v1 = vmul.f32 0.0078125, %v4979_v9  ;;  %v4983_v39 = vmul.f32 0.0078125, %v4977_v31 }
 0x9da   : > { %v4987_v12 = vadd.f32 1e-06, %v4983_v39  ;;  %v4988_v20 = vadd.f32 1e-06, %v4984_v1 }
 0x9db   : > { %v4981_v32 = vpop.xlane.xlu0 %4980 }
 0x9dc   : > { %v4985_v35 = vmul.f32 0.0078125, %v4981_v32  ;;  %6451 = vrsqrt.f32 %v4987_v12 }
 0x9dd   : > { %6453 = vrsqrt.f32 %v4988_v20 }
 0x9de   : > { %v4989_v5 = vadd.f32 1e-06, %v4985_v35 }
 0x9e0   : > { %6455 = vrsqrt.f32 %v4989_v5 }
 0x9e5   : > { %v6450_v63 = vpop.eup %6449 }
 0x9e6   : > { %v4994_v27 = vmul.f32 %v6450_v63, %v7711_v17 }
 0x9e8   : > { %v5004_v18 = vmul.f32 %v5808_v40, %v4994_v27 }
 0x9e9   : > { %v6452_v30 = vpop.eup %6451 }
 0x9ea   : > { %v4995_v33 = vmul.f32 %v6452_v30, %v4967_v6  ;;  %v6454_v11 = vpop.eup %6453  ;;  %v5014_v14 = vadd.f32 %v5809_v0, %v5004_v18  ;;  %v6363_v6 = vld [vmem:[%s6711_s5 + $0x70] sm:$0xff]  }
 0x9eb   : > { %v4996_v15 = vmul.f32 %v6454_v11, %v7717_v57  ;;  %v6364_v57 = vld [vmem:[%s6711_s5 + $0x30] sm:$0xff]   ;;  %5923 = vmatprep.subr.bf16.mxu1 %v6363_v6 }
 0x9ec   : > { %v5005_v38 = vmul.f32 %v5808_v40, %v4995_v33  ;;  %5924 = vmatpush3.bf16.msra.mxu1 %v6364_v57 }
 0x9ed   : > { %v6456_v22 = vpop.eup %6455  ;;  %v5006_v17 = vmul.f32 %v5808_v40, %v4996_v15  ;;  %5925 = vmatprep.subr.bf16.mxu1 %v6365_v26 }
 0x9ee   : > { %v4997_v59 = vmul.f32 %v6456_v22, %v4969_v16  ;;  %v5015_v7 = vadd.f32 %v5809_v0, %v5005_v38  ;;  %v6370_v16 = vld [vmem:[%s6711_s5 + $0x18] sm:$0xff]  }
 0x9ef   : > { %v5016_v41 = vadd.f32 %v5809_v0, %v5006_v17 }
 0x9f0   : > { %v5018_v46 = vpack.c.bf16 %v5015_v7, %v5014_v14  ;;  %v5007_v51 = vmul.f32 %v5808_v40, %v4997_v59 }
 0x9f2   : > { %5161 = vmatmul.mubr.bf16.vlgmr.msra.gmra.mxu0 %v5018_v46  ;;  %v5017_v48 = vadd.f32 %v5809_v0, %v5007_v51 }
 0x9f3   : > { %5170 = vmatprep.mubr.bf16.mxu0 %v6538_v13  ;;  %v6366_v13 = vld [vmem:[%s6711_s5 + $0x28] sm:$0xff]  }
 0x9f4   : > { %v5019_v44 = vpack.c.bf16 %v5017_v48, %v5016_v41  ;;  %5926 = vmatpush3.bf16.msra.mxu1 %v6366_v13 }
 0x9f5   : > { %5927 = vmatprep.subr.bf16.mxu1 %v6367_v43 }
 0x9f8   : > { %5928 = vmatpush3.bf16.msra.mxu1 %v6368_v10 }
 0x9f9   : > { %5929 = vmatprep.subr.bf16.mxu1 %v6369_v21 }
 0x9fa   : > { %5171 = vmatmul.mubr.bf16.gmra.mxu0 %v5019_v44 }
 0x9fc   : > { %5930 = vmatpush3.bf16.msra.mxu1 %v6370_v16 }
 0x9fd   : > { %5931 = vmatprep.subr.bf16.mxu1 %v6371_v42 }
 0xa00   : > { %5932 = vmatpush3.bf16.msra.mxu1 %v6372_v45 }
 0xa01   : > { %5933 = vmatprep.subr.bf16.mxu1 %v6373_v49 }
 0xa04   : > { %5934 = vmatpush3.bf16.msra.mxu1 %v6374_v56 }
 0xa05   : > { %5935 = vmatprep.subr.bf16.mxu1 %v6375_v24 }
 0xa08   : > { %5936 = vmatpush3.bf16.msra.mxu1 %v6376_v55 }
 0xab2   : > { %v5162_v47 = vpop.f32.mrf.mxu0 }
 0xab3   : > { %v7770_v60 = vadd.f32 %v5162_v47, %v5041_v2 }
 0xab4   : > { %v5164_v29 = vpop.f32.mrf.mxu0 }
 0xab5   : > { %v5826_v62 = vmul.f32 -1.702, %v7770_v60  ;;  %v7773_v3 = vadd.f32 %v5164_v29, %v5045_v54 }
 0xab6   : > { %v5166_v4 = vpop.f32.mrf.mxu0 }
 0xab7   : > { %v5197_v8 = vmul.f32 1.442695, %v5826_v62  ;;  %v5827_v25 = vmul.f32 -1.702, %v7773_v3  ;;  %v5167_v34 = vadd.f32 %v5166_v4, %v5041_v2 }
 0xab8   : > { %v5168_v9 = vpop.f32.mrf.mxu0 }
 0xab9   : > { %v5199_v31 = vmul.f32 1.442695, %v5827_v25  ;;  %v5828_v1 = vmul.f32 -1.702, %v5167_v34  ;;  %v5169_v58 = vadd.f32 %v5168_v9, %v5045_v54  ;;  %6457 = vpow2.f32 %v5197_v8 }
 0xaba   : > { %v5172_v52 = vpop.f32.mrf.mxu0 }
 0xabb   : > { %6459 = vpow2.f32 %v5199_v31  ;;  %v5201_v53 = vmul.f32 1.442695, %v5828_v1  ;;  %v5829_v39 = vmul.f32 -1.702, %v5169_v58  ;;  %v7776_v12 = vadd.f32 %v5172_v52, %v5041_v2 }
 0xabc   : > { %v5174_v20 = vpop.f32.mrf.mxu0 }
 0xabd   : > { %6461 = vpow2.f32 %v5201_v53  ;;  %v5203_v32 = vmul.f32 1.442695, %v5829_v39  ;;  %v5830_v35 = vmul.f32 -1.702, %v7776_v12  ;;  %v5175_v5 = vadd.f32 %v5174_v20, %v5045_v54 }
 0xabe   : > { %v5176_v63 = vpop.f32.mrf.mxu0 }
 0xabf   : > { %6463 = vpow2.f32 %v5203_v32  ;;  %v5205_v27 = vmul.f32 1.442695, %v5830_v35  ;;  %v5831_v40 = vmul.f32 -1.702, %v5175_v5  ;;  %v5177_v30 = vadd.f32 %v5176_v63, %v5041_v2 }
 0xac0   : > { %v5178_v33 = vpop.f32.mrf.mxu0 }
 0xac1   : > { %v5207_v18 = vmul.f32 1.442695, %v5831_v40  ;;  %v5832_v11 = vmul.f32 -1.702, %v5177_v30  ;;  %v5179_v0 = vadd.f32 %v5178_v33, %v5045_v54  ;;  %6465 = vpow2.f32 %v5205_v27 }
 0xac3   : > { %6467 = vpow2.f32 %v5207_v18  ;;  %v5209_v22 = vmul.f32 1.442695, %v5832_v11  ;;  %v5833_v38 = vmul.f32 -1.702, %v5179_v0 }
 0xac5   : > { %6469 = vpow2.f32 %v5209_v22  ;;  %v5211_v59 = vmul.f32 1.442695, %v5833_v38 }
 0xac6   : > { %v6458_v14 = vpop.eup %6457 }
 0xac7   : > { %6471 = vpow2.f32 %v5211_v59  ;;  %v5213_v51 = vadd.f32 1.0, %v6458_v14 }
 0xac8   : > { %v6460_v7 = vpop.eup %6459 }
 0xac9   : > { %v5214_v15 = vadd.f32 1.0, %v6460_v7 }
 0xaca   : > { %v6462_v46 = vpop.eup %6461 }
 0xacb   : > { %v5215_v17 = vadd.f32 1.0, %v6462_v46  ;;  %6473 = vrcp.f32 %v5214_v15 }
 0xacc   : > { %v6464_v48 = vpop.eup %6463 }
 0xacd   : > { %6475 = vrcp.f32 %v5215_v17  ;;  %v5216_v41 = vadd.f32 1.0, %v6464_v48 }
 0xace   : > { %6477 = vrcp.f32 %v5213_v51  ;;  %v6466_v44 = vpop.eup %6465 }
 0xacf   : > { %6479 = vrcp.f32 %v5216_v41  ;;  %v5217_v57 = vadd.f32 1.0, %v6466_v44 }
 0xad0   : > { %v6468_v36 = vpop.eup %6467 }
 0xad1   : > { %v5218_v50 = vadd.f32 1.0, %v6468_v36 }
 0xad2   : > { %v6470_v6 = vpop.eup %6469 }
 0xad3   : > { %v5219_v26 = vadd.f32 1.0, %v6470_v6  ;;  %6481 = vrcp.f32 %v5218_v50 }
 0xad4   : > { %v6472_v13 = vpop.eup %6471 }
 0xad5   : > { %6483 = vrcp.f32 %v5219_v26  ;;  %v5220_v43 = vadd.f32 1.0, %v6472_v13 }
 0xad6   : > { %6485 = vrcp.f32 %v5217_v57 }
 0xad7   : > { %6487 = vrcp.f32 %v5220_v43 }
 0xad8   : > { %v6474_v10 = vpop.eup %6473 }
 0xad9   : > { %v5238_v49 = vmul.f32 %v6474_v10, %v7773_v3 }
 0xada   : > { %v6476_v21 = vpop.eup %6475 }
 0xadb   : > { %v6478_v16 = vpop.eup %6477  ;;  %v5239_v45 = vmul.f32 %v6476_v21, %v5167_v34 }
 0xadc   : > { %v6480_v42 = vpop.eup %6479  ;;  %v5237_v24 = vmul.f32 %v6478_v16, %v7770_v60  ;;  %v5834_v60 = vld [vmem:[%s739_s25] ss:$0 sm:$0xff]  ;;  %s7856_s25 = sld [smem:[#allocation12_spill]] (!%p5851_p5) }
 0xadd   : > { %v5240_v56 = vmul.f32 %v6480_v42, %v5169_v58 }
 0xade   : > { %v5245_v37 = vpack.c.bf16 %v5239_v45, %v5237_v24 }
 0xadf   : > { %v5246_v55 = vpack.c.bf16 %v5240_v56, %v5238_v49 }
 0xae0   : > { %v6482_v2 = vpop.eup %6481 }
 0xae1   : > { %5416 = vmatprep.mubr.bf16.mxu1 %v5246_v55  ;;  %v5242_v4 = vmul.f32 %v6482_v2, %v5175_v5 }
 0xae2   : > { %v6484_v54 = vpop.eup %6483  ;;  %5417 = vmatmul.mubr.bf16.vlgmr.msra.gmra.mxu1 %v5245_v37 }
 0xae3   : > { %v6486_v47 = vpop.eup %6485  ;;  %v5243_v62 = vmul.f32 %v6484_v54, %v5177_v30 }
 0xae4   : > { %v6488_v29 = vpop.eup %6487  ;;  %v5241_v25 = vmul.f32 %v6486_v47, %v7776_v12 }
 0xae5   : > { %v5244_v8 = vmul.f32 %v6488_v29, %v5179_v0 }
 0xae6   : > { %v5247_v9 = vpack.c.bf16 %v5243_v62, %v5241_v25 }
 0xae7   : > { %v5248_v34 = vpack.c.bf16 %v5244_v8, %v5242_v4 }
 0xae9   : > { %5424 = vmatprep.mubr.bf16.mxu1 %v5248_v34 }
 0xaea   : > { %5425 = vmatmul.mubr.bf16.gmra.mxu1 %v5247_v9 }
 0xba2   : > { %v5937_v3 = vpop.f32.mrf.mxu1 }
 0xba4   : > { %v5938_v31 = vpop.f32.mrf.mxu1 }
 0xba5   : > { %v5939_v1 = vadd.f32 %v5938_v31, %v5937_v3 }
 0xba6   : > { %v5940_v58 = vpop.f32.mrf.mxu1 }
 0xba7   : > { %v5419_v52 = vadd.f32 %v5939_v1, %v5834_v60 }
 0xba8   : > { %v5941_v53 = vpop.f32.mrf.mxu1 }
 0xba9   : > { %v5433_v39 = vadd.f32 %v5419_v52, %v7696_v19  ;;  %v5942_v20 = vadd.f32 %v5941_v53, %v5940_v58 }
 0xbaa   : > { %v5943_v32 = vpop.f32.mrf.mxu1 }
 0xbab   : > { %5437 = vst [vmem:[#allocation2] sm:$0xff] %v5433_v39  ;;  %v5422_v12 = vadd.f32 %v5942_v20, %v5834_v60 }
 0xbac   : > { %v5944_v35 = vpop.f32.mrf.mxu1 }
 0xbad   : > { %v5434_v5 = vadd.f32 %v5422_v12, %v7701_v23  ;;  %v5945_v63 = vadd.f32 %v5944_v35, %v5943_v32 }
 0xbae   : > { %v5946_v27 = vpop.f32.mrf.mxu1 }
 0xbaf   : > { %5438 = vst [vmem:[#allocation2 + $0x8] sm:$0xff] %v5434_v5  ;;  %v5427_v40 = vadd.f32 %v5945_v63, %v5834_v60 }
 0xbb0   : > { %v5947_v30 = vpop.f32.mrf.mxu1 }
 0xbb1   : > { %v5435_v33 = vadd.f32 %v5427_v40, %v7699_v28  ;;  %v5948_v18 = vadd.f32 %v5947_v30, %v5946_v27 }
 0xbb3   : > { %5439 = vst [vmem:[#allocation2 + $0x10] sm:$0xff] %v5435_v33  ;;  %v5430_v11 = vadd.f32 %v5948_v18, %v5834_v60  ;;  %5444 = sbr.rel (%p5851_p5) target bundleno = 3315 (0xcf3), region = 100 }
 0xbb5   : > { %v5436_v0 = vadd.f32 %v5430_v11, %v7705_v61 }
 0xbb7   : > { %5440 = vst [vmem:[#allocation2 + $0x18] sm:$0xff] %v5436_v0 }
 0xbb8   : > { %5447 = vadd.xlane.f32.xlu0 %v5433_v39  ;;  %5451 = vadd.xlane.f32.xlu1 %v5435_v33  ;;  %v5852_v56 = vld [vmem:[%s7856_s25] ss:$0 sm:$0xff] }
 0xbb9   : > { %v5853_v55 = vld [vmem:[%s7857_s30] ss:$0 sm:$0xff] }
 0xbbc   : > { %5449 = vadd.xlane.f32.xlu0 %v5434_v5  ;;  %5453 = vadd.xlane.f32.xlu1 %v5436_v0 }
 0xc41   : > { %v5448_v19 = vpop.xlane.xlu0 %5447  ;;  %v5452_v23 = vpop.xlane.xlu1 %5451 }
 0xc42   : > { %v5455_v22 = vmul.f32 0.0078125, %v5448_v19  ;;  %v5457_v38 = vmul.f32 0.0078125, %v5452_v23 }
 0xc44   : > { %v5459_v59 = vsub.f32 %v5433_v39, %v5455_v22  ;;  %v5461_v14 = vsub.f32 %v5435_v33, %v5457_v38 }
 0xc45   : > { %v5450_v28 = vpop.xlane.xlu0 %5449  ;;  %v5454_v7 = vpop.xlane.xlu1 %5453 }
 0xc46   : > { %v5456_v15 = vmul.f32 0.0078125, %v5450_v28  ;;  %v5463_v46 = vmul.f32 %v5459_v59, %v5459_v59  ;;  %v5458_v51 = vmul.f32 0.0078125, %v5454_v7  ;;  %v5465_v48 = vmul.f32 %v5461_v14, %v5461_v14 }
 0xc48   : > { %v5460_v61 = vsub.f32 %v5434_v5, %v5456_v15  ;;  %5467 = vadd.xlane.f32.xlu0 %v5463_v46  ;;  %v5462_v17 = vsub.f32 %v5436_v0, %v5458_v51 }
 0xc4a   : > { %v5464_v41 = vmul.f32 %v5460_v61, %v5460_v61  ;;  %v5466_v44 = vmul.f32 %v5462_v17, %v5462_v17 }
 0xc4c   : > { %5471 = vadd.xlane.f32.xlu0 %v5465_v48  ;;  %5469 = vadd.xlane.f32.xlu1 %v5464_v41 }
 0xc50   : > { %5473 = vadd.xlane.f32.xlu1 %v5466_v44 }
 0xcd1   : > { %v5468_v36 = vpop.xlane.xlu0 %5467 }
 0xcd2   : > { %v5475_v50 = vmul.f32 0.0078125, %v5468_v36 }
 0xcd4   : > { %v5479_v6 = vadd.f32 1e-06, %v5475_v50 }
 0xcd5   : > { %v5470_v57 = vpop.xlane.xlu1 %5469  ;;  %v5472_v26 = vpop.xlane.xlu0 %5471 }
 0xcd6   : > { %6493 = vrsqrt.f32 %v5479_v6  ;;  %v5476_v13 = vmul.f32 0.0078125, %v5470_v57  ;;  %v5477_v43 = vmul.f32 0.0078125, %v5472_v26 }
 0xcd8   : > { %v5480_v10 = vadd.f32 1e-06, %v5476_v13  ;;  %v5481_v21 = vadd.f32 1e-06, %v5477_v43 }
 0xcd9   : > { %v5474_v16 = vpop.xlane.xlu1 %5473 }
 0xcda   : > { %6495 = vrsqrt.f32 %v5480_v10  ;;  %v5478_v42 = vmul.f32 0.0078125, %v5474_v16 }
 0xcdb   : > { %6497 = vrsqrt.f32 %v5481_v21 }
 0xcdc   : > { %v5482_v45 = vadd.f32 1e-06, %v5478_v42 }
 0xcde   : > { %6499 = vrsqrt.f32 %v5482_v45 }
 0xce3   : > { %v6494_v49 = vpop.eup %6493 }
 0xce4   : > { %v5487_v24 = vmul.f32 %v6494_v49, %v5459_v59 }
 0xce6   : > { %v5497_v37 = vmul.f32 %v5852_v56, %v5487_v24 }
 0xce7   : > { %v6496_v2 = vpop.eup %6495 }
 0xce8   : > { %v6498_v54 = vpop.eup %6497  ;;  %v5507_v47 = vadd.f32 %v5853_v55, %v5497_v37  ;;  %v5488_v29 = vmul.f32 %v6496_v2, %v5460_v61 }
 0xce9   : > { %v5489_v62 = vmul.f32 %v6498_v54, %v5461_v14 }
 0xcea   : > { %5511 = vst [vmem:[#allocation2] sm:$0xff] %v5507_v47  ;;  %v5498_v4 = vmul.f32 %v5852_v56, %v5488_v29 }
 0xceb   : > { %v6500_v8 = vpop.eup %6499  ;;  %v5499_v25 = vmul.f32 %v5852_v56, %v5489_v62 }
 0xcec   : > { %v5508_v34 = vadd.f32 %v5853_v55, %v5498_v4  ;;  %v5490_v9 = vmul.f32 %v6500_v8, %v5462_v17 }
 0xced   : > { %v5509_v3 = vadd.f32 %v5853_v55, %v5499_v25 }
 0xcee   : > { %5512 = vst [vmem:[#allocation2 + $0x8] sm:$0xff] %v5508_v34  ;;  %v5500_v60 = vmul.f32 %v5852_v56, %v5490_v9 }
 0xcef   : > { %5513 = vst [vmem:[#allocation2 + $0x10] sm:$0xff] %v5509_v3 }
 0xcf0   : > { %v5510_v31 = vadd.f32 %v5853_v55, %v5500_v60 }
 0xcf2   : > { %5514 = vst [vmem:[#allocation2 + $0x18] sm:$0xff] %v5510_v31 }
 0xcf3 PF: > { %p6131_p6 = scmp.eq.s32.totalorder %s6650_s28, 1  ;;  %s6546_s19 = smov [#allocation2]  }
 0xcf4   : > { %s5521_s21 = sshll.u32 %s6546_s19, 4  ;;  %s5522_s21 = int_to_ptr.vmem [resolvable:$true] %s5521_s21 }
 0xcf5   : > { %s6501_s26 = scalar_lea.vmem %s5522_s21, 512  ;;  %p6508_p10 = scmp.lt.s32.totalorder %s5522_s21, %s5522_s21 }
 0xcf6   : > { %p6502_p7 = scmp.ne.s32.totalorder %s5522_s21, %s6501_s26  ;;  %p6509_p11 = scmp.lt.s32.totalorder %s6501_s26, %s6501_s26 }
 0xcf8   : > { %p6503_p8 = pnand %p6502_p7, %p6131_p6  ;;  %p6510_p12 = por %p6509_p11, %p6508_p10 }
 0xcfa   : > { %p6504_p9 = pneg %p6503_p8 }
 0xcfc   : > { %p6511_p13 = pnand %p6510_p12, %p6504_p9 }
 0xcfe   : > { %6514 = shalt.err (!%p6511_p13)
}
 0xcff   : > { %s6547_s1 = smov 128   ;;  %s6548_s27 = smov 8  }
 0xd00   : > { %s7858_s16 = sld [smem:[#allocation14_spill]] }
 0xd06   : > { %6128 = dma.vmem_to_hbm [thread:$0]  (%p6131_p6), %s5522_s21, 512, %s7858_s16, [#allocation3], %s6547_s1, %s6547_s1, %s6548_s27  }
 0xd07   : > { %6530 = dma.done.wait (%p6131_p6), [#allocation3], 512  }
 0xd08   : > { %6532 = vsyncadd (%p6131_p6), [#allocation3], 4294966784 }
 0xd09 PF: > { %s7859_s2 = sld [smem:[#allocation5_spill]] }
 0xd0f   : > { %s29_s27 = sadd.s32 1, %s7859_s2  }
 0xd10   : > { %p26_p0 = scmp.ge.s32.totalorder %s29_s27, 4  }
 0xd12   :  { %28 = sbr.rel (!%p26_p0) target bundleno = 11 (0xb), region = 160 }
 0xd17   :  { %5537 = vsyncpa [#allocation3], 1 }
 0xd18   :  { %5539 = vsyncpa [#allocation3 + $0x1], 1 }

</bundles_post_ra>
